<compile_context>
chip_gen: v6e
topology: v6e:2x2x1
jax: 0.10.0
libtpu: 0.0.40
codegen_flags: <defaults>
</compile_context>

<pallas_src>
import functools

import numpy as np

import jax
import jax.numpy as jnp
from jax.experimental import pallas as pl
from jax.experimental.pallas import tpu as pltpu  # noqa: F401  (TPU backend assumed)

BETA = 0.2     # VQVAE commitment weight (matches the module)
BN_EPS = 1e-5  # nn.BatchNorm2d default eps


# ---------------------------------------------------------------------------
# Weight packing (eager NumPy, runs once on weight-sized data).
# ---------------------------------------------------------------------------
def _pack_conv(w, batch, hin, win, hout, wout, stride=2, pad=1):
  """w: torch Conv2d weight (Cout, Cin, K, K) -> (gh, wm) matrices."""
  cout, cin, k, _ = w.shape
  wm = np.zeros((k, win * cin, wout * cout), np.float32)
  for kh in range(k):
    for oj in range(wout):
      for kw in range(k):
        j = stride * oj + kw - pad
        if 0 <= j < win:
          wm[kh, j * cin:(j + 1) * cin, oj * cout:(oj + 1) * cout] = w[:, :, kh, kw].T
  gh = np.zeros((k, batch * hout, batch * hin), np.float32)
  for kh in range(k):
    for oi in range(hout):
      i = stride * oi + kh - pad
      if 0 <= i < hin:
        for b in range(batch):
          gh[kh, b * hout + oi, b * hin + i] = 1.0
  return gh, wm


def _pack_convT(w, batch, hin, win, hout, wout, stride=2, pad=1):
  """w: torch ConvTranspose2d weight (Cin, Cout, K, K) -> (gh, wm) matrices."""
  cin, cout, k, _ = w.shape
  wm = np.zeros((k, win * cin, wout * cout), np.float32)
  for kh in range(k):
    for j in range(win):
      for kw in range(k):
        oj = stride * j + kw - pad
        if 0 <= oj < wout:
          wm[kh, j * cin:(j + 1) * cin, oj * cout:(oj + 1) * cout] = w[:, :, kh, kw]
  gh = np.zeros((k, batch * hout, batch * hin), np.float32)
  for kh in range(k):
    for i in range(hin):
      oi = stride * i + kh - pad
      if 0 <= oi < hout:
        for b in range(batch):
          gh[kh, b * hout + oi, b * hin + i] = 1.0
  return gh, wm


def pack_params(p, batch):
  """One-time packing of VQVAE params into the fused kernel's operand dict."""
  f = lambda a: np.asarray(jax.device_get(a), np.float32)
  eye = lambda n: np.eye(n, dtype=np.float32)
  widen = lambda b, groups: np.tile(f(b).reshape(1, -1), (1, groups))
  ne = int(p["emb"].shape[1])

  gh1, wm1 = _pack_conv(f(p["enc1_w"]), batch, 16, 16, 8, 8)
  gh2, wm2 = _pack_conv(f(p["enc2_w"]), batch, 8, 8, 4, 4)
  gh5, wm5 = _pack_convT(f(p["decT1_w"]), batch, 4, 4, 8, 8)
  gh6, wm6 = _pack_convT(f(p["decT2_w"]), batch, 8, 8, 16, 16)

  wm3 = np.kron(eye(4), f(p["enc3_w"]).reshape(ne, 4).T)   # 1x1 conv, (16, 4*ne)
  wm4 = np.kron(eye(4), f(p["dec1_w"]).reshape(4, ne).T)   # 1x1 conv, (4*ne, 16)

  emb = f(p["emb"])                                        # (3, ne)
  ops = dict(
      gh1=gh1, wm1=wm1, b1=widen(p["enc1_b"], 8),
      g1=f(p["bn1_g"]).reshape(1, -1), bt1=widen(p["bn1_b"], 8),
      rn16=np.kron(np.ones((8, 1), np.float32), eye(16)),
      gh2=gh2, wm2=wm2, b2=widen(p["enc2_b"], 4),
      g2=f(p["bn2_g"]).reshape(1, -1), bt2=widen(p["bn2_b"], 4),
      rn4=np.kron(np.ones((4, 1), np.float32), eye(4)),
      wm3=wm3, b3=widen(p["enc3_b"], 4),
      cgrp=np.stack([np.kron(eye(4), emb[k][:, None]) for k in range(3)]),
      cn=np.sum(emb * emb, axis=1, keepdims=True),
      embw=np.tile(emb, (1, 4)),
      rgn=np.kron(eye(4), np.ones((ne, 1), np.float32)),
      wm4=wm4, b4=widen(p["dec1_b"], 4),
      gh5=gh5, wm5=wm5, b5=widen(p["decT1_b"], 8),
      g3=f(p["bn3_g"]).reshape(1, -1), bt3=widen(p["bn3_b"], 8),
      gh6=gh6, wm6=wm6, b6=widen(p["decT2_b"], 16),
  )
  ops["rw16"] = ops["rn16"].T.copy()
  ops["rw4"] = ops["rn4"].T.copy()
  ops["rgw"] = ops["rgn"].T.copy()
  return {k: jnp.asarray(v, jnp.float32) for k, v in ops.items()}


# ---------------------------------------------------------------------------
# The fused Pallas kernel (single invocation, everything in VMEM).
# ---------------------------------------------------------------------------
def _vqvae_kernel(x_ref,
                  gh1_ref, wm1_ref, b1_ref, g1_ref, bt1_ref, rn16_ref, rw16_ref,
                  gh2_ref, wm2_ref, b2_ref, g2_ref, bt2_ref, rn4_ref, rw4_ref,
                  wm3_ref, b3_ref,
                  cgrp_ref, cn_ref, embw_ref, rgn_ref, rgw_ref,
                  wm4_ref, b4_ref,
                  gh5_ref, wm5_ref, b5_ref, g3_ref, bt3_ref,
                  gh6_ref, wm6_ref, b6_ref,
                  y_ref, loss_ref, tok_ref,
                  *, batch, n_embd):
  f32 = jnp.float32

  def dot(a, b):
    return jnp.dot(a, b, preferred_element_type=f32)

  def conv4(a, gh_ref, wm_ref, b_ref):
    """Conv / ConvTranspose (k=4, s=2, p=1) as sum over kernel rows kh."""
    acc = None
    for kh in range(4):
      c = dot(gh_ref[kh], dot(a, wm_ref[kh]))
      acc = c if acc is None else acc + c
    return acc + b_ref[...]

  def bn_relu(y, n, g_ref, btw_ref, rn_ref, rw_ref):
    """Training-mode BatchNorm (centred two-pass batch stats) + ReLU."""
    rn, rw = rn_ref[...], rw_ref[...]
    mean = dot(jnp.sum(y, axis=0, keepdims=True), rn) * (1.0 / n)
    yc = y - dot(mean, rw)
    var = dot(jnp.sum(yc * yc, axis=0, keepdims=True), rn) * (1.0 / n)
    scale = g_ref[...] * jax.lax.rsqrt(var + BN_EPS)
    return jnp.maximum(yc * dot(scale, rw) + btw_ref[...], 0.0)

  # -------- encoder --------
  h = conv4(x_ref[...], gh1_ref, wm1_ref, b1_ref)                # (B*8, 8*16)
  h = bn_relu(h, batch * 64.0, g1_ref, bt1_ref, rn16_ref, rw16_ref)
  h = conv4(h, gh2_ref, wm2_ref, b2_ref)                         # (B*4, 4*4)
  h = bn_relu(h, batch * 16.0, g2_ref, bt2_ref, rn4_ref, rw4_ref)
  z = dot(h, wm3_ref[...]) + b3_ref[...]                         # (B*4, 4*ne)

  # -------- vector quantisation against the 3-entry codebook --------
  rgn, rgw = rgn_ref[...], rgw_ref[...]
  cn, embw = cn_ref[...], embw_ref[...]
  znorm = dot(z * z, rgn)                                        # (B*4, 4)
  d = [znorm - 2.0 * dot(z, cgrp_ref[k]) + cn[k:k + 1, :] for k in range(3)]
  pick0 = jnp.logical_and(d[0] <= d[1], d[0] <= d[2])            # first-min ties,
  pick1 = d[1] <= d[2]                                           # same as argmin
  tok_ref[...] = jnp.where(pick0, 0, jnp.where(pick1, 1, 2)).astype(jnp.int32)
  m0 = pick0.astype(f32)
  m1 = (1.0 - m0) * pick1.astype(f32)
  m2 = 1.0 - m0 - m1
  e = (dot(m0, rgw) * embw[0:1, :] + dot(m1, rgw) * embw[1:2, :]
       + dot(m2, rgw) * embw[2:3, :])                            # (B*4, 4*ne)

  diff = z - e
  total = jnp.sum(jnp.sum(diff * diff, axis=1, keepdims=True),
                  axis=0, keepdims=True)                         # (1, 1)
  # codebook + beta*commitment losses share the same forward value (mse)
  loss_ref[...] = total * ((1.0 + BETA) / (batch * 16.0 * n_embd))

  # -------- decoder (straight-through: forward value is e) --------
  dct = dot(e, wm4_ref[...]) + b4_ref[...]                       # (B*4, 4*4)
  dct = conv4(dct, gh5_ref, wm5_ref, b5_ref)                     # (B*8, 8*16)
  dct = bn_relu(dct, batch * 64.0, g3_ref, bt3_ref, rn16_ref, rw16_ref)
  out = conv4(dct, gh6_ref, wm6_ref, b6_ref)                     # (B*16, 16)
  y_ref[...] = jnp.tanh(out)


# ---------------------------------------------------------------------------
# Forward wrapper (one pallas_call; NCHW only at the boundary).
# ---------------------------------------------------------------------------
@jax.jit
def vqvae_forward(x, ops):
  """x: (B, 1, 16, 16) NCHW.  ops: dict from pack_params(params, batch=B)."""
  b = x.shape[0]
  n_embd = ops["embw"].shape[1] // 4
  kernel = functools.partial(_vqvae_kernel, batch=b, n_embd=n_embd)
  y2d, loss, tok = pl.pallas_call(
      kernel,
      out_shape=(jax.ShapeDtypeStruct((b * 16, 16), jnp.float32),
                 jax.ShapeDtypeStruct((1, 1), jnp.float32),
                 jax.ShapeDtypeStruct((b * 4, 4), jnp.int32)),
  )(x.reshape(b * 16, 16),
    ops["gh1"], ops["wm1"], ops["b1"], ops["g1"], ops["bt1"],
    ops["rn16"], ops["rw16"],
    ops["gh2"], ops["wm2"], ops["b2"], ops["g2"], ops["bt2"],
    ops["rn4"], ops["rw4"],
    ops["wm3"], ops["b3"],
    ops["cgrp"], ops["cn"], ops["embw"], ops["rgn"], ops["rgw"],
    ops["wm4"], ops["b4"],
    ops["gh5"], ops["wm5"], ops["b5"], ops["g3"], ops["bt3"],
    ops["gh6"], ops["wm6"], ops["b6"])
  return y2d.reshape(b, 1, 16, 16), loss[0, 0], tok.reshape(b, 4, 4)


# ---------------------------------------------------------------------------
# Deterministic parameter init (shapes follow VQVAE.__init__)
# ---------------------------------------------------------------------------
def init_params(key, n_embd):
  ks = jax.random.split(key, 20)
  w = lambda k, s, sc: (sc * jax.random.normal(k, s)).astype(jnp.float32)
  return dict(
      enc1_w=w(ks[0], (16, 1, 4, 4), 0.20), enc1_b=w(ks[1], (16,), 0.10),
      bn1_g=(1.0 + w(ks[2], (16,), 0.10)), bn1_b=w(ks[3], (16,), 0.10),
      enc2_w=w(ks[4], (4, 16, 4, 4), 0.10), enc2_b=w(ks[5], (4,), 0.10),
      bn2_g=(1.0 + w(ks[6], (4,), 0.10)), bn2_b=w(ks[7], (4,), 0.10),
      enc3_w=w(ks[8], (n_embd, 4, 1, 1), 0.30), enc3_b=w(ks[9], (n_embd,), 0.10),
      emb=w(ks[10], (3, n_embd), 1.00),                     # nn.Embedding(3, n_embd)
      dec1_w=w(ks[11], (4, n_embd, 1, 1), 0.30), dec1_b=w(ks[12], (4,), 0.10),
      decT1_w=w(ks[13], (4, 16, 4, 4), 0.10), decT1_b=w(ks[14], (16,), 0.10),
      bn3_g=(1.0 + w(ks[15], (16,), 0.10)), bn3_b=w(ks[16], (16,), 0.10),
      decT2_w=w(ks[17], (16, 1, 4, 4), 0.10), decT2_b=w(ks[18], (1,), 0.10),
  )


# ---------------------------------------------------------------------------
# Pure-JAX reference (XLA convs) for correctness checking
# ---------------------------------------------------------------------------
def ref_forward(x, p):
  def conv(x, w, b, s, pad):
    y = jax.lax.conv_general_dilated(
        x, w, (s, s), [(pad, pad), (pad, pad)],
        dimension_numbers=("NCHW", "OIHW", "NCHW"))
    return y + b.reshape(1, -1, 1, 1)

  def bn_relu(y, g, bt):
    mean = jnp.mean(y, axis=(0, 2, 3), keepdims=True)
    var = jnp.var(y, axis=(0, 2, 3), keepdims=True)
    yh = (y - mean) / jnp.sqrt(var + BN_EPS)
    return jnp.maximum(yh * g.reshape(1, -1, 1, 1) + bt.reshape(1, -1, 1, 1), 0.0)

  def convT(x, w, b, s, pad):
    k = w.shape[2]
    wf = w[:, :, ::-1, ::-1].transpose(1, 0, 2, 3)
    y = jax.lax.conv_general_dilated(
        x, wf, (1, 1), [(k - 1 - pad, k - 1 - pad)] * 2, lhs_dilation=(s, s),
        dimension_numbers=("NCHW", "OIHW", "NCHW"))
    return y + b.reshape(1, -1, 1, 1)

  h = bn_relu(conv(x, p["enc1_w"], p["enc1_b"], 2, 1), p["bn1_g"], p["bn1_b"])
  h = bn_relu(conv(h, p["enc2_w"], p["enc2_b"], 2, 1), p["bn2_g"], p["bn2_b"])
  z = conv(h, p["enc3_w"], p["enc3_b"], 1, 0)
  B, C, H, W = z.shape
  zf = z.transpose(0, 2, 3, 1).reshape(B, H * W, C)
  cb = p["emb"]
  dist = jnp.sqrt(jnp.sum((zf[:, :, None, :] - cb[None, None, :, :]) ** 2, -1))
  tokens = jnp.argmin(dist, axis=-1)
  e = cb[tokens.reshape(-1)]
  mse = jnp.mean((zf.reshape(B * H * W, C) - e) ** 2)
  loss = mse + BETA * mse
  e_img = e.reshape(B, H, W, C).transpose(0, 3, 1, 2)
  d = conv(e_img, p["dec1_w"], p["dec1_b"], 1, 0)
  d = bn_relu(convT(d, p["decT1_w"], p["decT1_b"], 2, 1), p["bn3_g"], p["bn3_b"])
  out = jnp.tanh(convT(d, p["decT2_w"], p["decT2_b"], 2, 1))
  return out, loss, tokens.reshape(B, H, W).astype(jnp.int32)


if __name__ == "__main__":
  n_embd = 8
  key = jax.random.PRNGKey(0)
  kp, kx = jax.random.split(key)
  params = init_params(kp, n_embd)
  x = jax.random.normal(kx, (2, 1, 16, 16), dtype=jnp.float32)  # NCHW, like torch

  ops = pack_params(params, batch=2)      # one-time weight-sized preprocessing
  out, loss, tokens = jax.block_until_ready(vqvae_forward(x, ops))

  assert out.shape == (2, 1, 16, 16), out.shape
  assert tokens.shape == (2, 4, 4), tokens.shape

  ref_out, ref_loss, ref_tok = ref_forward(x, params)
  assert jnp.allclose(out, ref_out, atol=2e-3, rtol=2e-3), \
      float(jnp.max(jnp.abs(out - ref_out)))
  assert jnp.allclose(loss, ref_loss, atol=2e-3, rtol=2e-3)
  assert jnp.array_equal(tokens, ref_tok)

  print("KERNEL_OK")
</pallas_src>

<mosaic_0001>
module attributes {stable_mosaic.version = 11 : i64} {
  func.func @_vqvae_kernel(%arg0: memref<32x16xf32, #tpu.memory_space<vmem>>, %arg1: memref<4x16x32xf32, #tpu.memory_space<vmem>>, %arg2: memref<4x16x128xf32, #tpu.memory_space<vmem>>, %arg3: memref<1x128xf32, #tpu.memory_space<vmem>>, %arg4: memref<1x16xf32, #tpu.memory_space<vmem>>, %arg5: memref<1x128xf32, #tpu.memory_space<vmem>>, %arg6: memref<128x16xf32, #tpu.memory_space<vmem>>, %arg7: memref<16x128xf32, #tpu.memory_space<vmem>>, %arg8: memref<4x8x16xf32, #tpu.memory_space<vmem>>, %arg9: memref<4x128x16xf32, #tpu.memory_space<vmem>>, %arg10: memref<1x16xf32, #tpu.memory_space<vmem>>, %arg11: memref<1x4xf32, #tpu.memory_space<vmem>>, %arg12: memref<1x16xf32, #tpu.memory_space<vmem>>, %arg13: memref<16x4xf32, #tpu.memory_space<vmem>>, %arg14: memref<4x16xf32, #tpu.memory_space<vmem>>, %arg15: memref<16x32xf32, #tpu.memory_space<vmem>>, %arg16: memref<1x32xf32, #tpu.memory_space<vmem>>, %arg17: memref<3x32x4xf32, #tpu.memory_space<vmem>>, %arg18: memref<3x1xf32, #tpu.memory_space<vmem>>, %arg19: memref<3x32xf32, #tpu.memory_space<vmem>>, %arg20: memref<32x4xf32, #tpu.memory_space<vmem>>, %arg21: memref<4x32xf32, #tpu.memory_space<vmem>>, %arg22: memref<32x16xf32, #tpu.memory_space<vmem>>, %arg23: memref<1x16xf32, #tpu.memory_space<vmem>>, %arg24: memref<4x16x8xf32, #tpu.memory_space<vmem>>, %arg25: memref<4x16x128xf32, #tpu.memory_space<vmem>>, %arg26: memref<1x128xf32, #tpu.memory_space<vmem>>, %arg27: memref<1x16xf32, #tpu.memory_space<vmem>>, %arg28: memref<1x128xf32, #tpu.memory_space<vmem>>, %arg29: memref<4x32x16xf32, #tpu.memory_space<vmem>>, %arg30: memref<4x128x16xf32, #tpu.memory_space<vmem>>, %arg31: memref<1x16xf32, #tpu.memory_space<vmem>>, %arg32: memref<32x16xf32, #tpu.memory_space<vmem>>, %arg33: memref<1x1xf32, #tpu.memory_space<vmem>>, %arg34: memref<8x4xi32, #tpu.memory_space<vmem>>) attributes {dimension_semantics = [], scalar_prefetch = 0 : i64, scratch_operands = 0 : i64, tpu.core_type = #tpu.core_type<tc>} {
    %c0 = arith.constant 0 : index
    %c0_0 = arith.constant 0 : index
    %0 = vector.load %arg0[%c0, %c0_0] : memref<32x16xf32, #tpu.memory_space<vmem>>, vector<32x16xf32>
    %c0_1 = arith.constant 0 : index
    %c0_2 = arith.constant 0 : index
    %c0_3 = arith.constant 0 : index
    %1 = vector.load %arg1[%c0_1, %c0_2, %c0_3] : memref<4x16x32xf32, #tpu.memory_space<vmem>>, vector<1x16x32xf32>
    %2 = vector.shape_cast %1 : vector<1x16x32xf32> to vector<16x32xf32>
    %c0_4 = arith.constant 0 : index
    %c0_5 = arith.constant 0 : index
    %c0_6 = arith.constant 0 : index
    %3 = vector.load %arg2[%c0_4, %c0_5, %c0_6] : memref<4x16x128xf32, #tpu.memory_space<vmem>>, vector<1x16x128xf32>
    %4 = vector.shape_cast %3 : vector<1x16x128xf32> to vector<16x128xf32>
    %cst = arith.constant dense<0.000000e+00> : vector<32x128xf32>
    %5 = tpu.matmul %0, %4, %cst {dimension_numbers = #tpu.dot_dimension_numbers<[1], [0], [0], [1], [0, 0, 1, 1], [], []>} : vector<32x16xf32>, vector<16x128xf32>, vector<32x128xf32> -> vector<32x128xf32>
    %cst_7 = arith.constant dense<0.000000e+00> : vector<16x128xf32>
    %6 = tpu.matmul %2, %5, %cst_7 {dimension_numbers = #tpu.dot_dimension_numbers<[1], [0], [0], [1], [0, 0, 1, 1], [], []>} : vector<16x32xf32>, vector<32x128xf32>, vector<16x128xf32> -> vector<16x128xf32>
    %c1 = arith.constant 1 : index
    %c0_8 = arith.constant 0 : index
    %c0_9 = arith.constant 0 : index
    %7 = vector.load %arg1[%c1, %c0_8, %c0_9] : memref<4x16x32xf32, #tpu.memory_space<vmem>>, vector<1x16x32xf32>
    %8 = vector.shape_cast %7 : vector<1x16x32xf32> to vector<16x32xf32>
    %c1_10 = arith.constant 1 : index
    %c0_11 = arith.constant 0 : index
    %c0_12 = arith.constant 0 : index
    %9 = vector.load %arg2[%c1_10, %c0_11, %c0_12] : memref<4x16x128xf32, #tpu.memory_space<vmem>>, vector<1x16x128xf32>
    %10 = vector.shape_cast %9 : vector<1x16x128xf32> to vector<16x128xf32>
    %cst_13 = arith.constant dense<0.000000e+00> : vector<32x128xf32>
    %11 = tpu.matmul %0, %10, %cst_13 {dimension_numbers = #tpu.dot_dimension_numbers<[1], [0], [0], [1], [0, 0, 1, 1], [], []>} : vector<32x16xf32>, vector<16x128xf32>, vector<32x128xf32> -> vector<32x128xf32>
    %cst_14 = arith.constant dense<0.000000e+00> : vector<16x128xf32>
    %12 = tpu.matmul %8, %11, %cst_14 {dimension_numbers = #tpu.dot_dimension_numbers<[1], [0], [0], [1], [0, 0, 1, 1], [], []>} : vector<16x32xf32>, vector<32x128xf32>, vector<16x128xf32> -> vector<16x128xf32>
    %13 = arith.addf %6, %12 : vector<16x128xf32>
    %c2 = arith.constant 2 : index
    %c0_15 = arith.constant 0 : index
    %c0_16 = arith.constant 0 : index
    %14 = vector.load %arg1[%c2, %c0_15, %c0_16] : memref<4x16x32xf32, #tpu.memory_space<vmem>>, vector<1x16x32xf32>
    %15 = vector.shape_cast %14 : vector<1x16x32xf32> to vector<16x32xf32>
    %c2_17 = arith.constant 2 : index
    %c0_18 = arith.constant 0 : index
    %c0_19 = arith.constant 0 : index
    %16 = vector.load %arg2[%c2_17, %c0_18, %c0_19] : memref<4x16x128xf32, #tpu.memory_space<vmem>>, vector<1x16x128xf32>
    %17 = vector.shape_cast %16 : vector<1x16x128xf32> to vector<16x128xf32>
    %cst_20 = arith.constant dense<0.000000e+00> : vector<32x128xf32>
    %18 = tpu.matmul %0, %17, %cst_20 {dimension_numbers = #tpu.dot_dimension_numbers<[1], [0], [0], [1], [0, 0, 1, 1], [], []>} : vector<32x16xf32>, vector<16x128xf32>, vector<32x128xf32> -> vector<32x128xf32>
    %cst_21 = arith.constant dense<0.000000e+00> : vector<16x128xf32>
    %19 = tpu.matmul %15, %18, %cst_21 {dimension_numbers = #tpu.dot_dimension_numbers<[1], [0], [0], [1], [0, 0, 1, 1], [], []>} : vector<16x32xf32>, vector<32x128xf32>, vector<16x128xf32> -> vector<16x128xf32>
    %20 = arith.addf %13, %19 : vector<16x128xf32>
    %c3 = arith.constant 3 : index
    %c0_22 = arith.constant 0 : index
    %c0_23 = arith.constant 0 : index
    %21 = vector.load %arg1[%c3, %c0_22, %c0_23] : memref<4x16x32xf32, #tpu.memory_space<vmem>>, vector<1x16x32xf32>
    %22 = vector.shape_cast %21 : vector<1x16x32xf32> to vector<16x32xf32>
    %c3_24 = arith.constant 3 : index
    %c0_25 = arith.constant 0 : index
    %c0_26 = arith.constant 0 : index
    %23 = vector.load %arg2[%c3_24, %c0_25, %c0_26] : memref<4x16x128xf32, #tpu.memory_space<vmem>>, vector<1x16x128xf32>
    %24 = vector.shape_cast %23 : vector<1x16x128xf32> to vector<16x128xf32>
    %cst_27 = arith.constant dense<0.000000e+00> : vector<32x128xf32>
    %25 = tpu.matmul %0, %24, %cst_27 {dimension_numbers = #tpu.dot_dimension_numbers<[1], [0], [0], [1], [0, 0, 1, 1], [], []>} : vector<32x16xf32>, vector<16x128xf32>, vector<32x128xf32> -> vector<32x128xf32>
    %cst_28 = arith.constant dense<0.000000e+00> : vector<16x128xf32>
    %26 = tpu.matmul %22, %25, %cst_28 {dimension_numbers = #tpu.dot_dimension_numbers<[1], [0], [0], [1], [0, 0, 1, 1], [], []>} : vector<16x32xf32>, vector<32x128xf32>, vector<16x128xf32> -> vector<16x128xf32>
    %27 = arith.addf %20, %26 : vector<16x128xf32>
    %c0_29 = arith.constant 0 : index
    %c0_30 = arith.constant 0 : index
    %28 = vector.load %arg3[%c0_29, %c0_30] : memref<1x128xf32, #tpu.memory_space<vmem>>, vector<1x128xf32>
    %29 = vector.broadcast %28 : vector<1x128xf32> to vector<16x128xf32>
    %30 = arith.addf %27, %29 : vector<16x128xf32>
    %c0_31 = arith.constant 0 : index
    %c0_32 = arith.constant 0 : index
    %31 = vector.load %arg6[%c0_31, %c0_32] : memref<128x16xf32, #tpu.memory_space<vmem>>, vector<128x16xf32>
    %c0_33 = arith.constant 0 : index
    %c0_34 = arith.constant 0 : index
    %32 = vector.load %arg7[%c0_33, %c0_34] : memref<16x128xf32, #tpu.memory_space<vmem>>, vector<16x128xf32>
    %cst_35 = arith.constant dense<0.000000e+00> : vector<128xf32>
    %33 = vector.multi_reduction <add>, %30, %cst_35 [0] : vector<16x128xf32> to vector<128xf32>
    %34 = vector.shape_cast %33 : vector<128xf32> to vector<1x128xf32>
    %cst_36 = arith.constant dense<0.000000e+00> : vector<1x16xf32>
    %35 = tpu.matmul %34, %31, %cst_36 {dimension_numbers = #tpu.dot_dimension_numbers<[1], [0], [0], [1], [0, 0, 1, 1], [], []>} : vector<1x128xf32>, vector<128x16xf32>, vector<1x16xf32> -> vector<1x16xf32>
    %cst_37 = arith.constant 7.812500e-03 : f32
    %36 = vector.broadcast %cst_37 : f32 to vector<1x16xf32>
    %37 = arith.mulf %35, %36 : vector<1x16xf32>
    %cst_38 = arith.constant dense<0.000000e+00> : vector<1x128xf32>
    %38 = tpu.matmul %37, %32, %cst_38 {dimension_numbers = #tpu.dot_dimension_numbers<[1], [0], [0], [1], [0, 0, 1, 1], [], []>} : vector<1x16xf32>, vector<16x128xf32>, vector<1x128xf32> -> vector<1x128xf32>
    %39 = vector.broadcast %38 : vector<1x128xf32> to vector<16x128xf32>
    %40 = arith.subf %30, %39 : vector<16x128xf32>
    %41 = arith.mulf %40, %40 : vector<16x128xf32>
    %cst_39 = arith.constant dense<0.000000e+00> : vector<128xf32>
    %42 = vector.multi_reduction <add>, %41, %cst_39 [0] : vector<16x128xf32> to vector<128xf32>
    %43 = vector.shape_cast %42 : vector<128xf32> to vector<1x128xf32>
    %cst_40 = arith.constant dense<0.000000e+00> : vector<1x16xf32>
    %44 = tpu.matmul %43, %31, %cst_40 {dimension_numbers = #tpu.dot_dimension_numbers<[1], [0], [0], [1], [0, 0, 1, 1], [], []>} : vector<1x128xf32>, vector<128x16xf32>, vector<1x16xf32> -> vector<1x16xf32>
    %cst_41 = arith.constant 7.812500e-03 : f32
    %45 = vector.broadcast %cst_41 : f32 to vector<1x16xf32>
    %46 = arith.mulf %44, %45 : vector<1x16xf32>
    %c0_42 = arith.constant 0 : index
    %c0_43 = arith.constant 0 : index
    %47 = vector.load %arg4[%c0_42, %c0_43] : memref<1x16xf32, #tpu.memory_space<vmem>>, vector<1x16xf32>
    %cst_44 = arith.constant 9.99999974E-6 : f32
    %48 = vector.broadcast %cst_44 : f32 to vector<1x16xf32>
    %49 = arith.addf %46, %48 : vector<1x16xf32>
    %50 = math.rsqrt %49 : vector<1x16xf32>
    %51 = arith.mulf %47, %50 : vector<1x16xf32>
    %cst_45 = arith.constant dense<0.000000e+00> : vector<1x128xf32>
    %52 = tpu.matmul %51, %32, %cst_45 {dimension_numbers = #tpu.dot_dimension_numbers<[1], [0], [0], [1], [0, 0, 1, 1], [], []>} : vector<1x16xf32>, vector<16x128xf32>, vector<1x128xf32> -> vector<1x128xf32>
    %53 = vector.broadcast %52 : vector<1x128xf32> to vector<16x128xf32>
    %54 = arith.mulf %40, %53 : vector<16x128xf32>
    %c0_46 = arith.constant 0 : index
    %c0_47 = arith.constant 0 : index
    %55 = vector.load %arg5[%c0_46, %c0_47] : memref<1x128xf32, #tpu.memory_space<vmem>>, vector<1x128xf32>
    %56 = vector.broadcast %55 : vector<1x128xf32> to vector<16x128xf32>
    %57 = arith.addf %54, %56 : vector<16x128xf32>
    %cst_48 = arith.constant 0.000000e+00 : f32
    %58 = vector.broadcast %cst_48 : f32 to vector<16x128xf32>
    %59 = arith.maximumf %57, %58 : vector<16x128xf32>
    %c0_49 = arith.constant 0 : index
    %c0_50 = arith.constant 0 : index
    %c0_51 = arith.constant 0 : index
    %60 = vector.load %arg8[%c0_49, %c0_50, %c0_51] : memref<4x8x16xf32, #tpu.memory_space<vmem>>, vector<1x8x16xf32>
    %61 = vector.shape_cast %60 : vector<1x8x16xf32> to vector<8x16xf32>
    %c0_52 = arith.constant 0 : index
    %c0_53 = arith.constant 0 : index
    %c0_54 = arith.constant 0 : index
    %62 = vector.load %arg9[%c0_52, %c0_53, %c0_54] : memref<4x128x16xf32, #tpu.memory_space<vmem>>, vector<1x128x16xf32>
    %63 = vector.shape_cast %62 : vector<1x128x16xf32> to vector<128x16xf32>
    %cst_55 = arith.constant dense<0.000000e+00> : vector<16x16xf32>
    %64 = tpu.matmul %59, %63, %cst_55 {dimension_numbers = #tpu.dot_dimension_numbers<[1], [0], [0], [1], [0, 0, 1, 1], [], []>} : vector<16x128xf32>, vector<128x16xf32>, vector<16x16xf32> -> vector<16x16xf32>
    %cst_56 = arith.constant dense<0.000000e+00> : vector<8x16xf32>
    %65 = tpu.matmul %61, %64, %cst_56 {dimension_numbers = #tpu.dot_dimension_numbers<[1], [0], [0], [1], [0, 0, 1, 1], [], []>} : vector<8x16xf32>, vector<16x16xf32>, vector<8x16xf32> -> vector<8x16xf32>
    %c1_57 = arith.constant 1 : index
    %c0_58 = arith.constant 0 : index
    %c0_59 = arith.constant 0 : index
    %66 = vector.load %arg8[%c1_57, %c0_58, %c0_59] : memref<4x8x16xf32, #tpu.memory_space<vmem>>, vector<1x8x16xf32>
    %67 = vector.shape_cast %66 : vector<1x8x16xf32> to vector<8x16xf32>
    %c1_60 = arith.constant 1 : index
    %c0_61 = arith.constant 0 : index
    %c0_62 = arith.constant 0 : index
    %68 = vector.load %arg9[%c1_60, %c0_61, %c0_62] : memref<4x128x16xf32, #tpu.memory_space<vmem>>, vector<1x128x16xf32>
    %69 = vector.shape_cast %68 : vector<1x128x16xf32> to vector<128x16xf32>
    %cst_63 = arith.constant dense<0.000000e+00> : vector<16x16xf32>
    %70 = tpu.matmul %59, %69, %cst_63 {dimension_numbers = #tpu.dot_dimension_numbers<[1], [0], [0], [1], [0, 0, 1, 1], [], []>} : vector<16x128xf32>, vector<128x16xf32>, vector<16x16xf32> -> vector<16x16xf32>
    %cst_64 = arith.constant dense<0.000000e+00> : vector<8x16xf32>
    %71 = tpu.matmul %67, %70, %cst_64 {dimension_numbers = #tpu.dot_dimension_numbers<[1], [0], [0], [1], [0, 0, 1, 1], [], []>} : vector<8x16xf32>, vector<16x16xf32>, vector<8x16xf32> -> vector<8x16xf32>
    %72 = arith.addf %65, %71 : vector<8x16xf32>
    %c2_65 = arith.constant 2 : index
    %c0_66 = arith.constant 0 : index
    %c0_67 = arith.constant 0 : index
    %73 = vector.load %arg8[%c2_65, %c0_66, %c0_67] : memref<4x8x16xf32, #tpu.memory_space<vmem>>, vector<1x8x16xf32>
    %74 = vector.shape_cast %73 : vector<1x8x16xf32> to vector<8x16xf32>
    %c2_68 = arith.constant 2 : index
    %c0_69 = arith.constant 0 : index
    %c0_70 = arith.constant 0 : index
    %75 = vector.load %arg9[%c2_68, %c0_69, %c0_70] : memref<4x128x16xf32, #tpu.memory_space<vmem>>, vector<1x128x16xf32>
    %76 = vector.shape_cast %75 : vector<1x128x16xf32> to vector<128x16xf32>
    %cst_71 = arith.constant dense<0.000000e+00> : vector<16x16xf32>
    %77 = tpu.matmul %59, %76, %cst_71 {dimension_numbers = #tpu.dot_dimension_numbers<[1], [0], [0], [1], [0, 0, 1, 1], [], []>} : vector<16x128xf32>, vector<128x16xf32>, vector<16x16xf32> -> vector<16x16xf32>
    %cst_72 = arith.constant dense<0.000000e+00> : vector<8x16xf32>
    %78 = tpu.matmul %74, %77, %cst_72 {dimension_numbers = #tpu.dot_dimension_numbers<[1], [0], [0], [1], [0, 0, 1, 1], [], []>} : vector<8x16xf32>, vector<16x16xf32>, vector<8x16xf32> -> vector<8x16xf32>
    %79 = arith.addf %72, %78 : vector<8x16xf32>
    %c3_73 = arith.constant 3 : index
    %c0_74 = arith.constant 0 : index
    %c0_75 = arith.constant 0 : index
    %80 = vector.load %arg8[%c3_73, %c0_74, %c0_75] : memref<4x8x16xf32, #tpu.memory_space<vmem>>, vector<1x8x16xf32>
    %81 = vector.shape_cast %80 : vector<1x8x16xf32> to vector<8x16xf32>
    %c3_76 = arith.constant 3 : index
    %c0_77 = arith.constant 0 : index
    %c0_78 = arith.constant 0 : index
    %82 = vector.load %arg9[%c3_76, %c0_77, %c0_78] : memref<4x128x16xf32, #tpu.memory_space<vmem>>, vector<1x128x16xf32>
    %83 = vector.shape_cast %82 : vector<1x128x16xf32> to vector<128x16xf32>
    %cst_79 = arith.constant dense<0.000000e+00> : vector<16x16xf32>
    %84 = tpu.matmul %59, %83, %cst_79 {dimension_numbers = #tpu.dot_dimension_numbers<[1], [0], [0], [1], [0, 0, 1, 1], [], []>} : vector<16x128xf32>, vector<128x16xf32>, vector<16x16xf32> -> vector<16x16xf32>
    %cst_80 = arith.constant dense<0.000000e+00> : vector<8x16xf32>
    %85 = tpu.matmul %81, %84, %cst_80 {dimension_numbers = #tpu.dot_dimension_numbers<[1], [0], [0], [1], [0, 0, 1, 1], [], []>} : vector<8x16xf32>, vector<16x16xf32>, vector<8x16xf32> -> vector<8x16xf32>
    %86 = arith.addf %79, %85 : vector<8x16xf32>
    %c0_81 = arith.constant 0 : index
    %c0_82 = arith.constant 0 : index
    %87 = vector.load %arg10[%c0_81, %c0_82] : memref<1x16xf32, #tpu.memory_space<vmem>>, vector<1x16xf32>
    %88 = vector.broadcast %87 : vector<1x16xf32> to vector<8x16xf32>
    %89 = arith.addf %86, %88 : vector<8x16xf32>
    %c0_83 = arith.constant 0 : index
    %c0_84 = arith.constant 0 : index
    %90 = vector.load %arg13[%c0_83, %c0_84] : memref<16x4xf32, #tpu.memory_space<vmem>>, vector<16x4xf32>
    %c0_85 = arith.constant 0 : index
    %c0_86 = arith.constant 0 : index
    %91 = vector.load %arg14[%c0_85, %c0_86] : memref<4x16xf32, #tpu.memory_space<vmem>>, vector<4x16xf32>
    %cst_87 = arith.constant dense<0.000000e+00> : vector<16xf32>
    %92 = vector.multi_reduction <add>, %89, %cst_87 [0] : vector<8x16xf32> to vector<16xf32>
    %93 = vector.shape_cast %92 : vector<16xf32> to vector<1x16xf32>
    %cst_88 = arith.constant dense<0.000000e+00> : vector<1x4xf32>
    %94 = tpu.matmul %93, %90, %cst_88 {dimension_numbers = #tpu.dot_dimension_numbers<[1], [0], [0], [1], [0, 0, 1, 1], [], []>} : vector<1x16xf32>, vector<16x4xf32>, vector<1x4xf32> -> vector<1x4xf32>
    %cst_89 = arith.constant 3.125000e-02 : f32
    %95 = vector.broadcast %cst_89 : f32 to vector<1x4xf32>
    %96 = arith.mulf %94, %95 : vector<1x4xf32>
    %cst_90 = arith.constant dense<0.000000e+00> : vector<1x16xf32>
    %97 = tpu.matmul %96, %91, %cst_90 {dimension_numbers = #tpu.dot_dimension_numbers<[1], [0], [0], [1], [0, 0, 1, 1], [], []>} : vector<1x4xf32>, vector<4x16xf32>, vector<1x16xf32> -> vector<1x16xf32>
    %98 = vector.broadcast %97 : vector<1x16xf32> to vector<8x16xf32>
    %99 = arith.subf %89, %98 : vector<8x16xf32>
    %100 = arith.mulf %99, %99 : vector<8x16xf32>
    %cst_91 = arith.constant dense<0.000000e+00> : vector<16xf32>
    %101 = vector.multi_reduction <add>, %100, %cst_91 [0] : vector<8x16xf32> to vector<16xf32>
    %102 = vector.shape_cast %101 : vector<16xf32> to vector<1x16xf32>
    %cst_92 = arith.constant dense<0.000000e+00> : vector<1x4xf32>
    %103 = tpu.matmul %102, %90, %cst_92 {dimension_numbers = #tpu.dot_dimension_numbers<[1], [0], [0], [1], [0, 0, 1, 1], [], []>} : vector<1x16xf32>, vector<16x4xf32>, vector<1x4xf32> -> vector<1x4xf32>
    %cst_93 = arith.constant 3.125000e-02 : f32
    %104 = vector.broadcast %cst_93 : f32 to vector<1x4xf32>
    %105 = arith.mulf %103, %104 : vector<1x4xf32>
    %c0_94 = arith.constant 0 : index
    %c0_95 = arith.constant 0 : index
    %106 = vector.load %arg11[%c0_94, %c0_95] : memref<1x4xf32, #tpu.memory_space<vmem>>, vector<1x4xf32>
    %cst_96 = arith.constant 9.99999974E-6 : f32
    %107 = vector.broadcast %cst_96 : f32 to vector<1x4xf32>
    %108 = arith.addf %105, %107 : vector<1x4xf32>
    %109 = math.rsqrt %108 : vector<1x4xf32>
    %110 = arith.mulf %106, %109 : vector<1x4xf32>
    %cst_97 = arith.constant dense<0.000000e+00> : vector<1x16xf32>
    %111 = tpu.matmul %110, %91, %cst_97 {dimension_numbers = #tpu.dot_dimension_numbers<[1], [0], [0], [1], [0, 0, 1, 1], [], []>} : vector<1x4xf32>, vector<4x16xf32>, vector<1x16xf32> -> vector<1x16xf32>
    %112 = vector.broadcast %111 : vector<1x16xf32> to vector<8x16xf32>
    %113 = arith.mulf %99, %112 : vector<8x16xf32>
    %c0_98 = arith.constant 0 : index
    %c0_99 = arith.constant 0 : index
    %114 = vector.load %arg12[%c0_98, %c0_99] : memref<1x16xf32, #tpu.memory_space<vmem>>, vector<1x16xf32>
    %115 = vector.broadcast %114 : vector<1x16xf32> to vector<8x16xf32>
    %116 = arith.addf %113, %115 : vector<8x16xf32>
    %cst_100 = arith.constant 0.000000e+00 : f32
    %117 = vector.broadcast %cst_100 : f32 to vector<8x16xf32>
    %118 = arith.maximumf %116, %117 : vector<8x16xf32>
    %c0_101 = arith.constant 0 : index
    %c0_102 = arith.constant 0 : index
    %119 = vector.load %arg15[%c0_101, %c0_102] : memref<16x32xf32, #tpu.memory_space<vmem>>, vector<16x32xf32>
    %cst_103 = arith.constant dense<0.000000e+00> : vector<8x32xf32>
    %120 = tpu.matmul %118, %119, %cst_103 {dimension_numbers = #tpu.dot_dimension_numbers<[1], [0], [0], [1], [0, 0, 1, 1], [], []>} : vector<8x16xf32>, vector<16x32xf32>, vector<8x32xf32> -> vector<8x32xf32>
    %c0_104 = arith.constant 0 : index
    %c0_105 = arith.constant 0 : index
    %121 = vector.load %arg16[%c0_104, %c0_105] : memref<1x32xf32, #tpu.memory_space<vmem>>, vector<1x32xf32>
    %122 = vector.broadcast %121 : vector<1x32xf32> to vector<8x32xf32>
    %123 = arith.addf %120, %122 : vector<8x32xf32>
    %c0_106 = arith.constant 0 : index
    %c0_107 = arith.constant 0 : index
    %124 = vector.load %arg20[%c0_106, %c0_107] : memref<32x4xf32, #tpu.memory_space<vmem>>, vector<32x4xf32>
    %c0_108 = arith.constant 0 : index
    %c0_109 = arith.constant 0 : index
    %125 = vector.load %arg21[%c0_108, %c0_109] : memref<4x32xf32, #tpu.memory_space<vmem>>, vector<4x32xf32>
    %c0_110 = arith.constant 0 : index
    %c0_111 = arith.constant 0 : index
    %126 = vector.load %arg18[%c0_110, %c0_111] : memref<3x1xf32, #tpu.memory_space<vmem>>, vector<3x1xf32>
    %c0_112 = arith.constant 0 : index
    %c0_113 = arith.constant 0 : index
    %127 = vector.load %arg19[%c0_112, %c0_113] : memref<3x32xf32, #tpu.memory_space<vmem>>, vector<3x32xf32>
    %128 = arith.mulf %123, %123 : vector<8x32xf32>
    %cst_114 = arith.constant dense<0.000000e+00> : vector<8x4xf32>
    %129 = tpu.matmul %128, %124, %cst_114 {dimension_numbers = #tpu.dot_dimension_numbers<[1], [0], [0], [1], [0, 0, 1, 1], [], []>} : vector<8x32xf32>, vector<32x4xf32>, vector<8x4xf32> -> vector<8x4xf32>
    %c0_115 = arith.constant 0 : index
    %c0_116 = arith.constant 0 : index
    %c0_117 = arith.constant 0 : index
    %130 = vector.load %arg17[%c0_115, %c0_116, %c0_117] : memref<3x32x4xf32, #tpu.memory_space<vmem>>, vector<1x32x4xf32>
    %131 = vector.shape_cast %130 : vector<1x32x4xf32> to vector<32x4xf32>
    %cst_118 = arith.constant dense<0.000000e+00> : vector<8x4xf32>
    %132 = tpu.matmul %123, %131, %cst_118 {dimension_numbers = #tpu.dot_dimension_numbers<[1], [0], [0], [1], [0, 0, 1, 1], [], []>} : vector<8x32xf32>, vector<32x4xf32>, vector<8x4xf32> -> vector<8x4xf32>
    %cst_119 = arith.constant 2.000000e+00 : f32
    %133 = vector.broadcast %cst_119 : f32 to vector<8x4xf32>
    %134 = arith.mulf %133, %132 : vector<8x4xf32>
    %135 = arith.subf %129, %134 : vector<8x4xf32>
    %136 = vector.extract_strided_slice %126 {offsets = [0, 0], sizes = [1, 1], strides = [1, 1]} : vector<3x1xf32> to vector<1x1xf32>
    %137 = vector.broadcast %136 : vector<1x1xf32> to vector<8x4xf32>
    %138 = arith.addf %135, %137 : vector<8x4xf32>
    %c1_120 = arith.constant 1 : index
    %c0_121 = arith.constant 0 : index
    %c0_122 = arith.constant 0 : index
    %139 = vector.load %arg17[%c1_120, %c0_121, %c0_122] : memref<3x32x4xf32, #tpu.memory_space<vmem>>, vector<1x32x4xf32>
    %140 = vector.shape_cast %139 : vector<1x32x4xf32> to vector<32x4xf32>
    %cst_123 = arith.constant dense<0.000000e+00> : vector<8x4xf32>
    %141 = tpu.matmul %123, %140, %cst_123 {dimension_numbers = #tpu.dot_dimension_numbers<[1], [0], [0], [1], [0, 0, 1, 1], [], []>} : vector<8x32xf32>, vector<32x4xf32>, vector<8x4xf32> -> vector<8x4xf32>
    %cst_124 = arith.constant 2.000000e+00 : f32
    %142 = vector.broadcast %cst_124 : f32 to vector<8x4xf32>
    %143 = arith.mulf %142, %141 : vector<8x4xf32>
    %144 = arith.subf %129, %143 : vector<8x4xf32>
    %145 = vector.extract_strided_slice %126 {offsets = [1, 0], sizes = [1, 1], strides = [1, 1]} : vector<3x1xf32> to vector<1x1xf32>
    %146 = vector.broadcast %145 : vector<1x1xf32> to vector<8x4xf32>
    %147 = arith.addf %144, %146 : vector<8x4xf32>
    %c2_125 = arith.constant 2 : index
    %c0_126 = arith.constant 0 : index
    %c0_127 = arith.constant 0 : index
    %148 = vector.load %arg17[%c2_125, %c0_126, %c0_127] : memref<3x32x4xf32, #tpu.memory_space<vmem>>, vector<1x32x4xf32>
    %149 = vector.shape_cast %148 : vector<1x32x4xf32> to vector<32x4xf32>
    %cst_128 = arith.constant dense<0.000000e+00> : vector<8x4xf32>
    %150 = tpu.matmul %123, %149, %cst_128 {dimension_numbers = #tpu.dot_dimension_numbers<[1], [0], [0], [1], [0, 0, 1, 1], [], []>} : vector<8x32xf32>, vector<32x4xf32>, vector<8x4xf32> -> vector<8x4xf32>
    %cst_129 = arith.constant 2.000000e+00 : f32
    %151 = vector.broadcast %cst_129 : f32 to vector<8x4xf32>
    %152 = arith.mulf %151, %150 : vector<8x4xf32>
    %153 = arith.subf %129, %152 : vector<8x4xf32>
    %154 = vector.extract_strided_slice %126 {offsets = [2, 0], sizes = [1, 1], strides = [1, 1]} : vector<3x1xf32> to vector<1x1xf32>
    %155 = vector.broadcast %154 : vector<1x1xf32> to vector<8x4xf32>
    %156 = arith.addf %153, %155 : vector<8x4xf32>
    %157 = arith.cmpf ole, %138, %147 : vector<8x4xf32>
    %158 = arith.cmpf ole, %138, %156 : vector<8x4xf32>
    %159 = arith.andi %157, %158 : vector<8x4xi1>
    %160 = arith.cmpf ole, %147, %156 : vector<8x4xf32>
    %c1_i32 = arith.constant 1 : i32
    %c2_i32 = arith.constant 2 : i32
    %161 = vector.broadcast %c1_i32 : i32 to vector<8x4xi32>
    %162 = vector.broadcast %c2_i32 : i32 to vector<8x4xi32>
    %163 = arith.select %160, %161, %162 : vector<8x4xi1>, vector<8x4xi32>
    %c0_i32 = arith.constant 0 : i32
    %164 = vector.broadcast %c0_i32 : i32 to vector<8x4xi32>
    %165 = arith.select %159, %164, %163 : vector<8x4xi1>, vector<8x4xi32>
    %c0_130 = arith.constant 0 : index
    %c0_131 = arith.constant 0 : index
    %166 = vector.load %arg34[%c0_130, %c0_131] : memref<8x4xi32, #tpu.memory_space<vmem>>, vector<8x4xi32>
    tpu.vector_store %arg34[%c0_130, %c0_131], %165 {strides = array<i32>} : memref<8x4xi32, #tpu.memory_space<vmem>>, vector<8x4xi32>,
    %167 = arith.extui %159 : vector<8x4xi1> to vector<8x4xi32>
    %168 = arith.sitofp %167 : vector<8x4xi32> to vector<8x4xf32>
    %cst_132 = arith.constant 1.000000e+00 : f32
    %169 = vector.broadcast %cst_132 : f32 to vector<8x4xf32>
    %170 = arith.subf %169, %168 : vector<8x4xf32>
    %171 = arith.extui %160 : vector<8x4xi1> to vector<8x4xi32>
    %172 = arith.sitofp %171 : vector<8x4xi32> to vector<8x4xf32>
    %173 = arith.mulf %170, %172 : vector<8x4xf32>
    %cst_133 = arith.constant 1.000000e+00 : f32
    %174 = vector.broadcast %cst_133 : f32 to vector<8x4xf32>
    %175 = arith.subf %174, %168 : vector<8x4xf32>
    %176 = arith.subf %175, %173 : vector<8x4xf32>
    %cst_134 = arith.constant dense<0.000000e+00> : vector<8x32xf32>
    %177 = tpu.matmul %168, %125, %cst_134 {dimension_numbers = #tpu.dot_dimension_numbers<[1], [0], [0], [1], [0, 0, 1, 1], [], []>} : vector<8x4xf32>, vector<4x32xf32>, vector<8x32xf32> -> vector<8x32xf32>
    %178 = vector.extract_strided_slice %127 {offsets = [0, 0], sizes = [1, 32], strides = [1, 1]} : vector<3x32xf32> to vector<1x32xf32>
    %179 = vector.broadcast %178 : vector<1x32xf32> to vector<8x32xf32>
    %180 = arith.mulf %177, %179 : vector<8x32xf32>
    %cst_135 = arith.constant dense<0.000000e+00> : vector<8x32xf32>
    %181 = tpu.matmul %173, %125, %cst_135 {dimension_numbers = #tpu.dot_dimension_numbers<[1], [0], [0], [1], [0, 0, 1, 1], [], []>} : vector<8x4xf32>, vector<4x32xf32>, vector<8x32xf32> -> vector<8x32xf32>
    %182 = vector.extract_strided_slice %127 {offsets = [1, 0], sizes = [1, 32], strides = [1, 1]} : vector<3x32xf32> to vector<1x32xf32>
    %183 = vector.broadcast %182 : vector<1x32xf32> to vector<8x32xf32>
    %184 = arith.mulf %181, %183 : vector<8x32xf32>
    %185 = arith.addf %180, %184 : vector<8x32xf32>
    %cst_136 = arith.constant dense<0.000000e+00> : vector<8x32xf32>
    %186 = tpu.matmul %176, %125, %cst_136 {dimension_numbers = #tpu.dot_dimension_numbers<[1], [0], [0], [1], [0, 0, 1, 1], [], []>} : vector<8x4xf32>, vector<4x32xf32>, vector<8x32xf32> -> vector<8x32xf32>
    %187 = vector.extract_strided_slice %127 {offsets = [2, 0], sizes = [1, 32], strides = [1, 1]} : vector<3x32xf32> to vector<1x32xf32>
    %188 = vector.broadcast %187 : vector<1x32xf32> to vector<8x32xf32>
    %189 = arith.mulf %186, %188 : vector<8x32xf32>
    %190 = arith.addf %185, %189 : vector<8x32xf32>
    %191 = arith.subf %123, %190 : vector<8x32xf32>
    %192 = arith.mulf %191, %191 : vector<8x32xf32>
    %cst_137 = arith.constant dense<0.000000e+00> : vector<8xf32>
    %193 = vector.multi_reduction <add>, %192, %cst_137 [1] : vector<8x32xf32> to vector<8xf32>
    %194 = vector.shape_cast %193 : vector<8xf32> to vector<8x1xf32>
    %cst_138 = arith.constant dense<0.000000e+00> : vector<1xf32>
    %195 = vector.multi_reduction <add>, %194, %cst_138 [0] : vector<8x1xf32> to vector<1xf32>
    %196 = vector.shape_cast %195 : vector<1xf32> to vector<1x1xf32>
    %cst_139 = arith.constant 4.687500e-03 : f32
    %197 = vector.broadcast %cst_139 : f32 to vector<1x1xf32>
    %198 = arith.mulf %196, %197 : vector<1x1xf32>
    %c0_140 = arith.constant 0 : index
    %c0_141 = arith.constant 0 : index
    %199 = vector.load %arg33[%c0_140, %c0_141] : memref<1x1xf32, #tpu.memory_space<vmem>>, vector<1x1xf32>
    tpu.vector_store %arg33[%c0_140, %c0_141], %198 {strides = array<i32>} : memref<1x1xf32, #tpu.memory_space<vmem>>, vector<1x1xf32>,
    %c0_142 = arith.constant 0 : index
    %c0_143 = arith.constant 0 : index
    %200 = vector.load %arg22[%c0_142, %c0_143] : memref<32x16xf32, #tpu.memory_space<vmem>>, vector<32x16xf32>
    %cst_144 = arith.constant dense<0.000000e+00> : vector<8x16xf32>
    %201 = tpu.matmul %190, %200, %cst_144 {dimension_numbers = #tpu.dot_dimension_numbers<[1], [0], [0], [1], [0, 0, 1, 1], [], []>} : vector<8x32xf32>, vector<32x16xf32>, vector<8x16xf32> -> vector<8x16xf32>
    %c0_145 = arith.constant 0 : index
    %c0_146 = arith.constant 0 : index
    %202 = vector.load %arg23[%c0_145, %c0_146] : memref<1x16xf32, #tpu.memory_space<vmem>>, vector<1x16xf32>
    %203 = vector.broadcast %202 : vector<1x16xf32> to vector<8x16xf32>
    %204 = arith.addf %201, %203 : vector<8x16xf32>
    %c0_147 = arith.constant 0 : index
    %c0_148 = arith.constant 0 : index
    %c0_149 = arith.constant 0 : index
    %205 = vector.load %arg24[%c0_147, %c0_148, %c0_149] : memref<4x16x8xf32, #tpu.memory_space<vmem>>, vector<1x16x8xf32>
    %206 = vector.shape_cast %205 : vector<1x16x8xf32> to vector<16x8xf32>
    %c0_150 = arith.constant 0 : index
    %c0_151 = arith.constant 0 : index
    %c0_152 = arith.constant 0 : index
    %207 = vector.load %arg25[%c0_150, %c0_151, %c0_152] : memref<4x16x128xf32, #tpu.memory_space<vmem>>, vector<1x16x128xf32>
    %208 = vector.shape_cast %207 : vector<1x16x128xf32> to vector<16x128xf32>
    %cst_153 = arith.constant dense<0.000000e+00> : vector<8x128xf32>
    %209 = tpu.matmul %204, %208, %cst_153 {dimension_numbers = #tpu.dot_dimension_numbers<[1], [0], [0], [1], [0, 0, 1, 1], [], []>} : vector<8x16xf32>, vector<16x128xf32>, vector<8x128xf32> -> vector<8x128xf32>
    %cst_154 = arith.constant dense<0.000000e+00> : vector<16x128xf32>
    %210 = tpu.matmul %206, %209, %cst_154 {dimension_numbers = #tpu.dot_dimension_numbers<[1], [0], [0], [1], [0, 0, 1, 1], [], []>} : vector<16x8xf32>, vector<8x128xf32>, vector<16x128xf32> -> vector<16x128xf32>
    %c1_155 = arith.constant 1 : index
    %c0_156 = arith.constant 0 : index
    %c0_157 = arith.constant 0 : index
    %211 = vector.load %arg24[%c1_155, %c0_156, %c0_157] : memref<4x16x8xf32, #tpu.memory_space<vmem>>, vector<1x16x8xf32>
    %212 = vector.shape_cast %211 : vector<1x16x8xf32> to vector<16x8xf32>
    %c1_158 = arith.constant 1 : index
    %c0_159 = arith.constant 0 : index
    %c0_160 = arith.constant 0 : index
    %213 = vector.load %arg25[%c1_158, %c0_159, %c0_160] : memref<4x16x128xf32, #tpu.memory_space<vmem>>, vector<1x16x128xf32>
    %214 = vector.shape_cast %213 : vector<1x16x128xf32> to vector<16x128xf32>
    %cst_161 = arith.constant dense<0.000000e+00> : vector<8x128xf32>
    %215 = tpu.matmul %204, %214, %cst_161 {dimension_numbers = #tpu.dot_dimension_numbers<[1], [0], [0], [1], [0, 0, 1, 1], [], []>} : vector<8x16xf32>, vector<16x128xf32>, vector<8x128xf32> -> vector<8x128xf32>
    %cst_162 = arith.constant dense<0.000000e+00> : vector<16x128xf32>
    %216 = tpu.matmul %212, %215, %cst_162 {dimension_numbers = #tpu.dot_dimension_numbers<[1], [0], [0], [1], [0, 0, 1, 1], [], []>} : vector<16x8xf32>, vector<8x128xf32>, vector<16x128xf32> -> vector<16x128xf32>
    %217 = arith.addf %210, %216 : vector<16x128xf32>
    %c2_163 = arith.constant 2 : index
    %c0_164 = arith.constant 0 : index
    %c0_165 = arith.constant 0 : index
    %218 = vector.load %arg24[%c2_163, %c0_164, %c0_165] : memref<4x16x8xf32, #tpu.memory_space<vmem>>, vector<1x16x8xf32>
    %219 = vector.shape_cast %218 : vector<1x16x8xf32> to vector<16x8xf32>
    %c2_166 = arith.constant 2 : index
    %c0_167 = arith.constant 0 : index
    %c0_168 = arith.constant 0 : index
    %220 = vector.load %arg25[%c2_166, %c0_167, %c0_168] : memref<4x16x128xf32, #tpu.memory_space<vmem>>, vector<1x16x128xf32>
    %221 = vector.shape_cast %220 : vector<1x16x128xf32> to vector<16x128xf32>
    %cst_169 = arith.constant dense<0.000000e+00> : vector<8x128xf32>
    %222 = tpu.matmul %204, %221, %cst_169 {dimension_numbers = #tpu.dot_dimension_numbers<[1], [0], [0], [1], [0, 0, 1, 1], [], []>} : vector<8x16xf32>, vector<16x128xf32>, vector<8x128xf32> -> vector<8x128xf32>
    %cst_170 = arith.constant dense<0.000000e+00> : vector<16x128xf32>
    %223 = tpu.matmul %219, %222, %cst_170 {dimension_numbers = #tpu.dot_dimension_numbers<[1], [0], [0], [1], [0, 0, 1, 1], [], []>} : vector<16x8xf32>, vector<8x128xf32>, vector<16x128xf32> -> vector<16x128xf32>
    %224 = arith.addf %217, %223 : vector<16x128xf32>
    %c3_171 = arith.constant 3 : index
    %c0_172 = arith.constant 0 : index
    %c0_173 = arith.constant 0 : index
    %225 = vector.load %arg24[%c3_171, %c0_172, %c0_173] : memref<4x16x8xf32, #tpu.memory_space<vmem>>, vector<1x16x8xf32>
    %226 = vector.shape_cast %225 : vector<1x16x8xf32> to vector<16x8xf32>
    %c3_174 = arith.constant 3 : index
    %c0_175 = arith.constant 0 : index
    %c0_176 = arith.constant 0 : index
    %227 = vector.load %arg25[%c3_174, %c0_175, %c0_176] : memref<4x16x128xf32, #tpu.memory_space<vmem>>, vector<1x16x128xf32>
    %228 = vector.shape_cast %227 : vector<1x16x128xf32> to vector<16x128xf32>
    %cst_177 = arith.constant dense<0.000000e+00> : vector<8x128xf32>
    %229 = tpu.matmul %204, %228, %cst_177 {dimension_numbers = #tpu.dot_dimension_numbers<[1], [0], [0], [1], [0, 0, 1, 1], [], []>} : vector<8x16xf32>, vector<16x128xf32>, vector<8x128xf32> -> vector<8x128xf32>
    %cst_178 = arith.constant dense<0.000000e+00> : vector<16x128xf32>
    %230 = tpu.matmul %226, %229, %cst_178 {dimension_numbers = #tpu.dot_dimension_numbers<[1], [0], [0], [1], [0, 0, 1, 1], [], []>} : vector<16x8xf32>, vector<8x128xf32>, vector<16x128xf32> -> vector<16x128xf32>
    %231 = arith.addf %224, %230 : vector<16x128xf32>
    %c0_179 = arith.constant 0 : index
    %c0_180 = arith.constant 0 : index
    %232 = vector.load %arg26[%c0_179, %c0_180] : memref<1x128xf32, #tpu.memory_space<vmem>>, vector<1x128xf32>
    %233 = vector.broadcast %232 : vector<1x128xf32> to vector<16x128xf32>
    %234 = arith.addf %231, %233 : vector<16x128xf32>
    %c0_181 = arith.constant 0 : index
    %c0_182 = arith.constant 0 : index
    %235 = vector.load %arg6[%c0_181, %c0_182] : memref<128x16xf32, #tpu.memory_space<vmem>>, vector<128x16xf32>
    %c0_183 = arith.constant 0 : index
    %c0_184 = arith.constant 0 : index
    %236 = vector.load %arg7[%c0_183, %c0_184] : memref<16x128xf32, #tpu.memory_space<vmem>>, vector<16x128xf32>
    %cst_185 = arith.constant dense<0.000000e+00> : vector<128xf32>
    %237 = vector.multi_reduction <add>, %234, %cst_185 [0] : vector<16x128xf32> to vector<128xf32>
    %238 = vector.shape_cast %237 : vector<128xf32> to vector<1x128xf32>
    %cst_186 = arith.constant dense<0.000000e+00> : vector<1x16xf32>
    %239 = tpu.matmul %238, %235, %cst_186 {dimension_numbers = #tpu.dot_dimension_numbers<[1], [0], [0], [1], [0, 0, 1, 1], [], []>} : vector<1x128xf32>, vector<128x16xf32>, vector<1x16xf32> -> vector<1x16xf32>
    %cst_187 = arith.constant 7.812500e-03 : f32
    %240 = vector.broadcast %cst_187 : f32 to vector<1x16xf32>
    %241 = arith.mulf %239, %240 : vector<1x16xf32>
    %cst_188 = arith.constant dense<0.000000e+00> : vector<1x128xf32>
    %242 = tpu.matmul %241, %236, %cst_188 {dimension_numbers = #tpu.dot_dimension_numbers<[1], [0], [0], [1], [0, 0, 1, 1], [], []>} : vector<1x16xf32>, vector<16x128xf32>, vector<1x128xf32> -> vector<1x128xf32>
    %243 = vector.broadcast %242 : vector<1x128xf32> to vector<16x128xf32>
    %244 = arith.subf %234, %243 : vector<16x128xf32>
    %245 = arith.mulf %244, %244 : vector<16x128xf32>
    %cst_189 = arith.constant dense<0.000000e+00> : vector<128xf32>
    %246 = vector.multi_reduction <add>, %245, %cst_189 [0] : vector<16x128xf32> to vector<128xf32>
    %247 = vector.shape_cast %246 : vector<128xf32> to vector<1x128xf32>
    %cst_190 = arith.constant dense<0.000000e+00> : vector<1x16xf32>
    %248 = tpu.matmul %247, %235, %cst_190 {dimension_numbers = #tpu.dot_dimension_numbers<[1], [0], [0], [1], [0, 0, 1, 1], [], []>} : vector<1x128xf32>, vector<128x16xf32>, vector<1x16xf32> -> vector<1x16xf32>
    %cst_191 = arith.constant 7.812500e-03 : f32
    %249 = vector.broadcast %cst_191 : f32 to vector<1x16xf32>
    %250 = arith.mulf %248, %249 : vector<1x16xf32>
    %c0_192 = arith.constant 0 : index
    %c0_193 = arith.constant 0 : index
    %251 = vector.load %arg27[%c0_192, %c0_193] : memref<1x16xf32, #tpu.memory_space<vmem>>, vector<1x16xf32>
    %cst_194 = arith.constant 9.99999974E-6 : f32
    %252 = vector.broadcast %cst_194 : f32 to vector<1x16xf32>
    %253 = arith.addf %250, %252 : vector<1x16xf32>
    %254 = math.rsqrt %253 : vector<1x16xf32>
    %255 = arith.mulf %251, %254 : vector<1x16xf32>
    %cst_195 = arith.constant dense<0.000000e+00> : vector<1x128xf32>
    %256 = tpu.matmul %255, %236, %cst_195 {dimension_numbers = #tpu.dot_dimension_numbers<[1], [0], [0], [1], [0, 0, 1, 1], [], []>} : vector<1x16xf32>, vector<16x128xf32>, vector<1x128xf32> -> vector<1x128xf32>
    %257 = vector.broadcast %256 : vector<1x128xf32> to vector<16x128xf32>
    %258 = arith.mulf %244, %257 : vector<16x128xf32>
    %c0_196 = arith.constant 0 : index
    %c0_197 = arith.constant 0 : index
    %259 = vector.load %arg28[%c0_196, %c0_197] : memref<1x128xf32, #tpu.memory_space<vmem>>, vector<1x128xf32>
    %260 = vector.broadcast %259 : vector<1x128xf32> to vector<16x128xf32>
    %261 = arith.addf %258, %260 : vector<16x128xf32>
    %cst_198 = arith.constant 0.000000e+00 : f32
    %262 = vector.broadcast %cst_198 : f32 to vector<16x128xf32>
    %263 = arith.maximumf %261, %262 : vector<16x128xf32>
    %c0_199 = arith.constant 0 : index
    %c0_200 = arith.constant 0 : index
    %c0_201 = arith.constant 0 : index
    %264 = vector.load %arg29[%c0_199, %c0_200, %c0_201] : memref<4x32x16xf32, #tpu.memory_space<vmem>>, vector<1x32x16xf32>
    %265 = vector.shape_cast %264 : vector<1x32x16xf32> to vector<32x16xf32>
    %c0_202 = arith.constant 0 : index
    %c0_203 = arith.constant 0 : index
    %c0_204 = arith.constant 0 : index
    %266 = vector.load %arg30[%c0_202, %c0_203, %c0_204] : memref<4x128x16xf32, #tpu.memory_space<vmem>>, vector<1x128x16xf32>
    %267 = vector.shape_cast %266 : vector<1x128x16xf32> to vector<128x16xf32>
    %cst_205 = arith.constant dense<0.000000e+00> : vector<16x16xf32>
    %268 = tpu.matmul %263, %267, %cst_205 {dimension_numbers = #tpu.dot_dimension_numbers<[1], [0], [0], [1], [0, 0, 1, 1], [], []>} : vector<16x128xf32>, vector<128x16xf32>, vector<16x16xf32> -> vector<16x16xf32>
    %cst_206 = arith.constant dense<0.000000e+00> : vector<32x16xf32>
    %269 = tpu.matmul %265, %268, %cst_206 {dimension_numbers = #tpu.dot_dimension_numbers<[1], [0], [0], [1], [0, 0, 1, 1], [], []>} : vector<32x16xf32>, vector<16x16xf32>, vector<32x16xf32> -> vector<32x16xf32>
    %c1_207 = arith.constant 1 : index
    %c0_208 = arith.constant 0 : index
    %c0_209 = arith.constant 0 : index
    %270 = vector.load %arg29[%c1_207, %c0_208, %c0_209] : memref<4x32x16xf32, #tpu.memory_space<vmem>>, vector<1x32x16xf32>
    %271 = vector.shape_cast %270 : vector<1x32x16xf32> to vector<32x16xf32>
    %c1_210 = arith.constant 1 : index
    %c0_211 = arith.constant 0 : index
    %c0_212 = arith.constant 0 : index
    %272 = vector.load %arg30[%c1_210, %c0_211, %c0_212] : memref<4x128x16xf32, #tpu.memory_space<vmem>>, vector<1x128x16xf32>
    %273 = vector.shape_cast %272 : vector<1x128x16xf32> to vector<128x16xf32>
    %cst_213 = arith.constant dense<0.000000e+00> : vector<16x16xf32>
    %274 = tpu.matmul %263, %273, %cst_213 {dimension_numbers = #tpu.dot_dimension_numbers<[1], [0], [0], [1], [0, 0, 1, 1], [], []>} : vector<16x128xf32>, vector<128x16xf32>, vector<16x16xf32> -> vector<16x16xf32>
    %cst_214 = arith.constant dense<0.000000e+00> : vector<32x16xf32>
    %275 = tpu.matmul %271, %274, %cst_214 {dimension_numbers = #tpu.dot_dimension_numbers<[1], [0], [0], [1], [0, 0, 1, 1], [], []>} : vector<32x16xf32>, vector<16x16xf32>, vector<32x16xf32> -> vector<32x16xf32>
    %276 = arith.addf %269, %275 : vector<32x16xf32>
    %c2_215 = arith.constant 2 : index
    %c0_216 = arith.constant 0 : index
    %c0_217 = arith.constant 0 : index
    %277 = vector.load %arg29[%c2_215, %c0_216, %c0_217] : memref<4x32x16xf32, #tpu.memory_space<vmem>>, vector<1x32x16xf32>
    %278 = vector.shape_cast %277 : vector<1x32x16xf32> to vector<32x16xf32>
    %c2_218 = arith.constant 2 : index
    %c0_219 = arith.constant 0 : index
    %c0_220 = arith.constant 0 : index
    %279 = vector.load %arg30[%c2_218, %c0_219, %c0_220] : memref<4x128x16xf32, #tpu.memory_space<vmem>>, vector<1x128x16xf32>
    %280 = vector.shape_cast %279 : vector<1x128x16xf32> to vector<128x16xf32>
    %cst_221 = arith.constant dense<0.000000e+00> : vector<16x16xf32>
    %281 = tpu.matmul %263, %280, %cst_221 {dimension_numbers = #tpu.dot_dimension_numbers<[1], [0], [0], [1], [0, 0, 1, 1], [], []>} : vector<16x128xf32>, vector<128x16xf32>, vector<16x16xf32> -> vector<16x16xf32>
    %cst_222 = arith.constant dense<0.000000e+00> : vector<32x16xf32>
    %282 = tpu.matmul %278, %281, %cst_222 {dimension_numbers = #tpu.dot_dimension_numbers<[1], [0], [0], [1], [0, 0, 1, 1], [], []>} : vector<32x16xf32>, vector<16x16xf32>, vector<32x16xf32> -> vector<32x16xf32>
    %283 = arith.addf %276, %282 : vector<32x16xf32>
    %c3_223 = arith.constant 3 : index
    %c0_224 = arith.constant 0 : index
    %c0_225 = arith.constant 0 : index
    %284 = vector.load %arg29[%c3_223, %c0_224, %c0_225] : memref<4x32x16xf32, #tpu.memory_space<vmem>>, vector<1x32x16xf32>
    %285 = vector.shape_cast %284 : vector<1x32x16xf32> to vector<32x16xf32>
    %c3_226 = arith.constant 3 : index
    %c0_227 = arith.constant 0 : index
    %c0_228 = arith.constant 0 : index
    %286 = vector.load %arg30[%c3_226, %c0_227, %c0_228] : memref<4x128x16xf32, #tpu.memory_space<vmem>>, vector<1x128x16xf32>
    %287 = vector.shape_cast %286 : vector<1x128x16xf32> to vector<128x16xf32>
    %cst_229 = arith.constant dense<0.000000e+00> : vector<16x16xf32>
    %288 = tpu.matmul %263, %287, %cst_229 {dimension_numbers = #tpu.dot_dimension_numbers<[1], [0], [0], [1], [0, 0, 1, 1], [], []>} : vector<16x128xf32>, vector<128x16xf32>, vector<16x16xf32> -> vector<16x16xf32>
    %cst_230 = arith.constant dense<0.000000e+00> : vector<32x16xf32>
    %289 = tpu.matmul %285, %288, %cst_230 {dimension_numbers = #tpu.dot_dimension_numbers<[1], [0], [0], [1], [0, 0, 1, 1], [], []>} : vector<32x16xf32>, vector<16x16xf32>, vector<32x16xf32> -> vector<32x16xf32>
    %290 = arith.addf %283, %289 : vector<32x16xf32>
    %c0_231 = arith.constant 0 : index
    %c0_232 = arith.constant 0 : index
    %291 = vector.load %arg31[%c0_231, %c0_232] : memref<1x16xf32, #tpu.memory_space<vmem>>, vector<1x16xf32>
    %292 = vector.broadcast %291 : vector<1x16xf32> to vector<32x16xf32>
    %293 = arith.addf %290, %292 : vector<32x16xf32>
    %294 = math.tanh %293 : vector<32x16xf32>
    %c0_233 = arith.constant 0 : index
    %c0_234 = arith.constant 0 : index
    %295 = vector.load %arg32[%c0_233, %c0_234] : memref<32x16xf32, #tpu.memory_space<vmem>>, vector<32x16xf32>
    tpu.vector_store %arg32[%c0_233, %c0_234], %294 {strides = array<i32>} : memref<32x16xf32, #tpu.memory_space<vmem>>, vector<32x16xf32>,
    return
  }
}

</mosaic_0001>

<bundles_post_ra>
// kernel: vqvae_forward.1
= control target key start
LH: loop header
LB: loop body
LE: loop exit
PB: predicated region body
PF: predicated region fallthrough
CT: control target
= control target key end

     0   :  { %s6338_s6 = smov 1   ;;  %s6339_s10 = smov 2   ;;  %s7316_s0 = inlined_call_operand.smem [shape: u32[35], index: -1, kind: input, shape index: {}] }
   0x1   :  { %s6388_s5 = sld [smem:[%s7316_s0]]   ;;  %s6340_s14 = smov 3  }
   0x2   :  { %s6393_s9 = sld [smem:[%s7316_s0 + %s6338_s6]]   ;;  %s6341_s18 = smov 4  }
   0x3   :  { %s6398_s13 = sld [smem:[%s7316_s0 + %s6339_s10]]   ;;  %s6342_s22 = smov 5  }
   0x4   :  { %s6403_s17 = sld [smem:[%s7316_s0 + %s6340_s14]]   ;;  %s6343_s26 = smov 6  }
   0x5   :  { %s6408_s21 = sld [smem:[%s7316_s0 + %s6341_s18]]   ;;  %s6344_s30 = smov 7  }
   0x6   :  { %s6413_s25 = sld [smem:[%s7316_s0 + %s6342_s22]]   ;;  %s6345_s4 = smov 8  }
   0x7   :  { %s6418_s29 = sld [smem:[%s7316_s0 + %s6343_s26]]   ;;  %s6346_s10 = smov 9  }
   0x8   :  { %s6423_s3 = sld [smem:[%s7316_s0 + %s6344_s30]]   ;;  %s6347_s15 = smov 10  }
   0x9   :  { %s6428_s8 = sld [smem:[%s7316_s0 + %s6345_s4]]   ;;  %s6348_s20 = smov 11  }
   0xa   :  { %s6433_s14 = sld [smem:[%s7316_s0 + %s6346_s10]]   ;;  %s6349_s26 = smov 12  }
   0xb   :  { %s6438_s19 = sld [smem:[%s7316_s0 + %s6347_s15]]   ;;  %s6350_s1 = smov 13  }
   0xc   :  { %s6443_s24 = sld [smem:[%s7316_s0 + %s6348_s20]]   ;;  %s6351_s7 = smov 14  }
   0xd   :  { %s6448_s30 = sld [smem:[%s7316_s0 + %s6349_s26]]   ;;  %s6352_s15 = smov 15  }
   0xe   :  { %s6453_s6 = sld [smem:[%s7316_s0 + %s6350_s1]]   ;;  %s6353_s22 = smov 16  }
   0xf   :  { %s6458_s12 = sld [smem:[%s7316_s0 + %s6351_s7]]   ;;  %s6354_s28 = smov 17  }
  0x10   :  { %s6463_s20 = sld [smem:[%s7316_s0 + %s6352_s15]]   ;;  %s6355_s7 = smov 18  }
  0x11   :  { %s6468_s27 = sld [smem:[%s7316_s0 + %s6353_s22]]   ;;  %s6356_s15 = smov 19  }
  0x12   :  { %s6473_s4 = sld [smem:[%s7316_s0 + %s6354_s28]]   ;;  %s6357_s22 = smov 20  }
  0x13   :  { %7325 = sst [smem:[#allocation9_spill]] %s6448_s30  ;;  %s6358_s28 = smov 21  }
  0x14   :  { %s6478_s30 = sld [smem:[%s7316_s0 + %s6355_s7]]   ;;  %s6359_s7 = smov 22  }
  0x16   :  { %7326 = sst [smem:[#allocation10_spill]] %s6463_s20 }
  0x17   :  { %7327 = sst [smem:[#allocation11_spill]] %s6468_s27 }
  0x18   :  { %7328 = sst [smem:[#allocation12_spill]] %s6473_s4 }
  0x19   :  { %s6483_s20 = sld [smem:[%s7316_s0 + %s6356_s15]]   ;;  %s6360_s15 = smov 23  }
  0x1a   :  { %7329 = sst [smem:[#allocation13_spill]] %s6478_s30 }
  0x1b   :  { %s6488_s27 = sld [smem:[%s7316_s0 + %s6357_s22]]   ;;  %s6361_s22 = smov 24  }
  0x1c   :  { %s6493_s4 = sld [smem:[%s7316_s0 + %s6358_s28]]   ;;  %s6362_s28 = smov 25  }
  0x1d   :  { %s6498_s30 = sld [smem:[%s7316_s0 + %s6359_s7]]   ;;  %s6363_s7 = smov 26  }
  0x1f   :  { %7330 = sst [smem:[#allocation14_spill]] %s6483_s20 }
  0x20   :  { %s6503_s20 = sld [smem:[%s7316_s0 + %s6360_s15]]   ;;  %s6364_s15 = smov 27  }
  0x21   :  { %7331 = sst [smem:[#allocation15_spill]] %s6488_s27 }
  0x22   :  { %7332 = sst [smem:[#allocation16_spill]] %s6493_s4 }
  0x23   :  { %7333 = sst [smem:[#allocation17_spill]] %s6498_s30 }
  0x24   :  { %s6508_s27 = sld [smem:[%s7316_s0 + %s6361_s22]]   ;;  %s6365_s22 = smov 28  }
  0x25   :  { %s6513_s4 = sld [smem:[%s7316_s0 + %s6362_s28]]   ;;  %s6366_s28 = smov 29  }
  0x26   :  { %7334 = sst [smem:[#allocation18_spill]] %s6503_s20 }
  0x27   :  { %s6518_s30 = sld [smem:[%s7316_s0 + %s6363_s7]]   ;;  %s6367_s7 = smov 30  }
  0x28   :  { %s6523_s20 = sld [smem:[%s7316_s0 + %s6364_s15]]   ;;  %s6368_s15 = smov 31  }
  0x2a   :  { %7335 = sst [smem:[#allocation19_spill]] %s6508_s27 }
  0x2b   :  { %7336 = sst [smem:[#allocation20_spill]] %s6513_s4 }
  0x2c   :  { %s6528_s27 = sld [smem:[%s7316_s0 + %s6365_s22]]   ;;  %s6369_s22 = smov 32  }
  0x2d   :  { %7337 = sst [smem:[#allocation21_spill]] %s6518_s30 }
  0x2e   :  { %7338 = sst [smem:[#allocation22_spill]] %s6523_s20 }
  0x2f   :  { %s6533_s4 = sld [smem:[%s7316_s0 + %s6366_s28]]   ;;  %s6370_s28 = smov 33  }
  0x30   :  { %s6538_s30 = sld [smem:[%s7316_s0 + %s6367_s7]]   ;;  %s6371_s7 = smov 34  }
  0x31   :  { %s6543_s20 = sld [smem:[%s7316_s0 + %s6368_s15]]  }
  0x32   :  { %7339 = sst [smem:[#allocation23_spill]] %s6528_s27 }
  0x33   :  { %s6548_s27 = sld [smem:[%s7316_s0 + %s6369_s22]]  }
  0x35   :  { %7340 = sst [smem:[#allocation24_spill]] %s6533_s4 }
  0x36   :  { %7341 = sst [smem:[#allocation25_spill]] %s6538_s30 }
  0x37   :  { %s6553_s4 = sld [smem:[%s7316_s0 + %s6370_s28]]  }
  0x38   :  { %s6558_s30 = sld [smem:[%s7316_s0 + %s6371_s7]]  }
  0x39   :  { %75 = vsyncpa [#allocation3], 0  ;;  %v148_v0 = vld [vmem:[%s6398_s13 + $0x8] sm:$0xff]  ;;  %v4862_v1 = vld [vmem:[%s6398_s13 + $0x18] sm:$0xff]  ;;  %vm149_vm0 = vcmask 130048  }
  0x3a   :  { %v147_v2 = vld [vmem:[%s6398_s13] sm:$0xff]  ;;  %5463 = vmatprep.subr.mxu0 %v148_v0  ;;  %5473 = vmatprep.subr.mxu1 %v4862_v1  ;;  %v4861_v3 = vld [vmem:[%s6398_s13 + $0x10] sm:$0xff] }
  0x3b   :  { %v6565_v4 = vld [vmem:[%s6388_s5] sm:$0xff]  ;;  %5464 = vmatpush3.msra.mxu0 %v148_v0  ;;  %5474 = vmatpush3.msra.mxu1 %v4862_v1 }
  0x3c   :  { %76 = vsyncpa [#allocation5], 0  ;;  %5465 = vmatprep.subr.mxu0 %v147_v2  ;;  %5475 = vmatprep.subr.mxu1 %v4861_v3  ;;  %v6568_v5 = vld [vmem:[%s6388_s5 + $0x8] sm:$0xff]  ;;  %v143_v6 = vld [vmem:[%s6388_s5 + $0x10] sm:$0xff]  ;;  %vm338_vm1 = vcmask 261120   ;;  %v6372_v26 = vmov 0.0  }
  0x3d   :  { %5466 = vmatpush3.msra.mxu0 %v147_v2  ;;  %5467 = vmatprep.mubr.msk.f32.mxu0 %vm149_vm0, %v6565_v4  ;;  %v144_v7 = vld [vmem:[%s6388_s5 + $0x18] sm:$0xff]  ;;  %v4859_v8 = vld [vmem:[%s6393_s9 + $0x10] sm:$0xff]  ;;  %v145_v9 = vld [vmem:[%s6393_s9] sm:$0xff]  ;;  %vm6373_vm2 = vmmov 0   ;;  %vm1971_vm3 = vcmask 1043456   ;;  %vm1967_vm4 = vcmask 31744  }
  0x3e   :  { %5476 = vmatpush3.msra.mxu1 %v4861_v3  ;;  %5477 = vmatprep.mubr.msk.f32.mxu1 %vm149_vm0, %v6565_v4  ;;  %v4860_v18 = vld [vmem:[%s6393_s9 + $0x18] sm:$0xff]  ;;  %v146_v19 = vld [vmem:[%s6393_s9 + $0x8] sm:$0xff]  ;;  %v4873_v21 = vld [vmem:[%s6398_s13 + $0x20] sm:$0xff]  ;;  %s7342_s0 = sld [smem:[#allocation10_spill]]  ;;  %vm2899_vm9 = vcmask 0   ;;  %vm3138_vm10 = vcmask 64512  }
  0x3f   :  { %5468 = vmatmul.mubr.msk.f32.vlgmr.msra.gmra.mxu0 %vm149_vm0, %v6568_v5  ;;  %5478 = vmatmul.mubr.msk.f32.vlgmr.msra.gmra.mxu1 %vm149_vm0, %v6568_v5  ;;  %v4874_v20 = vld [vmem:[%s6398_s13 + $0x28] sm:$0xff]  ;;  %v4884_v22 = vld [vmem:[%s6398_s13 + $0x38] sm:$0xff]  ;;  %v4883_v23 = vld [vmem:[%s6398_s13 + $0x30] sm:$0xff]  ;;  %s7343_s5 = sld [smem:[#allocation15_spill]]  ;;  %s6375_s26 = smov [#allocation4]  }
  0x40   :  { %5470 = vmatprep.mubr.msk.f32.mxu0 %vm149_vm0, %v143_v6  ;;  %5480 = vmatprep.mubr.msk.f32.mxu1 %vm149_vm0, %v143_v6  ;;  %v4871_v24 = vld [vmem:[%s6393_s9 + $0x20] sm:$0xff]  ;;  %v6611_v25 = vld [vmem:[%s6418_s29 + $0x78] sm:$0xff]  ;;  %v4872_v35 = vld [vmem:[%s6393_s9 + $0x28] sm:$0xff]  ;;  %s7345_s13 = sld [smem:[#allocation12_spill]]  ;;  %s4796_s28 = sshll.u32 %s6375_s26, 4  ;;  %s4797_s28 = int_to_ptr.vmem [resolvable:$true] %s4796_s28 }
  0x41   :  { %v4881_v36 = vld [vmem:[%s6393_s9 + $0x30] sm:$0xff]  ;;  %v4882_v39 = vld [vmem:[%s6393_s9 + $0x38] sm:$0xff]  ;;  %v6633_v41 = vld [vmem:[%s6418_s29 + $0x68] sm:$0xff]  ;;  %s7344_s9 = sld [smem:[#allocation9_spill]]  ;;  %s6274_s1 = scalar_lea.vmem %s4797_s28, 16 }
  0x42   :  { %v6628_v40 = vld [vmem:[%s6418_s29 + $0x70] sm:$0xff]  ;;  %v6638_v42 = vld [vmem:[%s6418_s29 + $0x60] sm:$0xff]  ;;  %v6641_v43 = vld [vmem:[%s6418_s29 + $0x58] sm:$0xff]  ;;  %s7352_s15 = sld [smem:[#allocation18_spill]]  ;;  %p6275_p0 = scmp.ne.s32.totalorder %s4797_s28, %s6274_s1 }
  0x43   :  { %5471 = vmatmul.mubr.msk.f32.gmra.mxu0 %vm149_vm0, %v144_v7  ;;  %5481 = vmatmul.mubr.msk.f32.gmra.mxu1 %vm149_vm0, %v144_v7  ;;  %v6648_v44 = vld [vmem:[%s6418_s29 + $0x50] sm:$0xff]  ;;  %v6653_v45 = vld [vmem:[%s6418_s29 + $0x48] sm:$0xff]  ;;  %v6658_v46 = vld [vmem:[%s6418_s29 + $0x40] sm:$0xff]  ;;  %s7353_s16 = sld [smem:[#allocation19_spill]]  ;;  %s6278_s2 = scalar_lea.vmem %s4797_s28, 32 }
  0x44   :  { %5491 = vmatprep.mubr.msk.f32.mxu0 %vm338_vm1, %v4859_v8  ;;  %5502 = vmatprep.mubr.msk.f32.mxu1 %vm338_vm1, %v145_v9  ;;  %v6663_v47 = vld [vmem:[%s6418_s29 + $0x38] sm:$0xff]  ;;  %v6668_v48 = vld [vmem:[%s6418_s29 + $0x30] sm:$0xff]  ;;  %v6673_v49 = vld [vmem:[%s6418_s29 + $0x28] sm:$0xff]  ;;  %s7354_s18 = sld [smem:[#allocation21_spill]]  ;;  %p6279_p1 = scmp.lt.s32.totalorder %s4797_s28, %s4797_s28 }
  0x45   :  { %v6678_v50 = vld [vmem:[%s6418_s29 + $0x20] sm:$0xff]  ;;  %v6683_v51 = vld [vmem:[%s6418_s29 + $0x18] sm:$0xff]  ;;  %v6688_v52 = vld [vmem:[%s6418_s29 + $0x10] sm:$0xff]  ;;  %s7357_s22 = sld [smem:[#allocation23_spill]]  ;;  %p6280_p2 = scmp.lt.s32.totalorder %s6278_s2, %s6274_s1 }
  0x46   :  { %v6693_v53 = vld [vmem:[%s6418_s29 + $0x8] sm:$0xff]  ;;  %v6698_v54 = vld [vmem:[%s6418_s29] sm:$0xff]  ;;  %s7358_s23 = sld [smem:[#allocation24_spill]] }
  0x47   :  { %v4891_v1 = vld [vmem:[%s6403_s17] ss:$0 sm:$0xff]  ;;  %s7346_s17 = sld [smem:[#allocation13_spill]]  ;;  %p6281_p3 = por %p6280_p2, %p6279_p1 }
  0x49   :  { %p6282_p4 = pnand %p6281_p3, %p6275_p0 }
  0xff   :  { %v5469_v10 = vpop.f32.mrf.mxu0  ;;  %v5479_v11 = vpop.f32.mrf.mxu1 }
 0x101   :  { %v228_v12 = vpop.f32.mrf.mxu0  ;;  %v319_v13 = vpop.f32.mrf.mxu1 }
 0x103   :  { %v5472_v14 = vpop.f32.mrf.mxu0  ;;  %v5482_v15 = vpop.f32.mrf.mxu1 }
 0x104   :  { %5483 = vmatprep.subr.mxu0 %v5482_v15  ;;  %5494 = vmatprep.subr.mxu1 %v5472_v14 }
 0x105   :  { %v238_v16 = vpop.f32.mrf.mxu0  ;;  %v329_v17 = vpop.f32.mrf.mxu1  ;;  %5484 = vmatpush3.msra.mxu0 %v5482_v15  ;;  %5495 = vmatpush3.msra.mxu1 %v5472_v14  ;;  %v874_v14 = vld [vmem:[%s6423_s3] sm:$0xff] }
 0x106   :  { %5485 = vmatprep.subr.mxu0 %v329_v17  ;;  %5496 = vmatprep.subr.mxu1 %v238_v16 }
 0x107   :  { %5486 = vmatpush3.msra.mxu0 %v329_v17  ;;  %5497 = vmatpush3.msra.mxu1 %v238_v16 }
 0x108   :  { %5487 = vmatprep.subr.mxu0 %v5479_v11  ;;  %5498 = vmatprep.subr.mxu1 %v5469_v10 }
 0x109   :  { %5488 = vmatpush3.msra.mxu0 %v5479_v11  ;;  %5499 = vmatpush3.msra.mxu1 %v5469_v10 }
 0x10a   :  { %5489 = vmatprep.subr.mxu0 %v319_v13  ;;  %5500 = vmatprep.subr.mxu1 %v228_v12 }
 0x10b   :  { %5490 = vmatpush3.msra.mxu0 %v319_v13  ;;  %5501 = vmatpush3.msra.mxu1 %v228_v12  ;;  %v875_v13 = vld [vmem:[%s6423_s3 + $0x8] sm:$0xff] }
 0x10c   :  { %5492 = vmatmul.mubr.msk.f32.vlgmr.msra.gmra.mxu0 %vm338_vm1, %v4860_v18  ;;  %5503 = vmatmul.mubr.msk.f32.vlgmr.msra.gmra.mxu1 %vm338_vm1, %v146_v19  ;;  %v1027_v18 = vlaneseq }
 0x10d   :  { %5505 = vmatprep.subr.mxu0 %v4874_v20  ;;  %5509 = vmatprep.mubr.msk.f32.mxu0 %vm149_vm0, %v6565_v4 }
 0x10e   :  { %5506 = vmatpush3.msra.mxu0 %v4874_v20  ;;  %5523 = vmatprep.mubr.msk.f32.mxu1 %vm338_vm1, %v4871_v24  ;;  %v6753_v19 = vshrl.u32 %v1027_v18, 7 }
 0x10f   :  { %5507 = vmatprep.subr.mxu0 %v4873_v21 }
 0x110   :  { %5508 = vmatpush3.msra.mxu0 %v4873_v21  ;;  %v6756_v20 = vsub.s32 0, %v6753_v19 }
 0x111   :  { %5510 = vmatmul.mubr.msk.f32.vlgmr.msra.gmra.mxu0 %vm149_vm0, %v6568_v5  ;;  %5526 = vmatprep.subr.mxu0 %v4884_v22 }
 0x112   :  { %5512 = vmatprep.mubr.msk.f32.mxu0 %vm149_vm0, %v143_v6  ;;  %5527 = vmatpush3.msra.mxu0 %v4884_v22 }
 0x113   :  { %5528 = vmatprep.subr.mxu0 %v4883_v23 }
 0x114   :  { %5529 = vmatpush3.msra.mxu0 %v4883_v23 }
 0x115   :  { %5513 = vmatmul.mubr.msk.f32.gmra.mxu0 %vm149_vm0, %v144_v7  ;;  %5547 = vmatprep.subr.mxu0 %v6372_v26 }
 0x116   :  { %5530 = vmatprep.mubr.msk.f32.mxu0 %vm149_vm0, %v6565_v4 }
 0x119   :  { %5531 = vmatmul.mubr.msk.f32.vlgmr.msra.gmra.mxu0 %vm149_vm0, %v6568_v5 }
 0x11a   :  { %5533 = vmatprep.mubr.msk.f32.mxu0 %vm149_vm0, %v143_v6  ;;  %5548 = vmatpush3.msra.mxu0 %v6611_v25 }
 0x11b   :  { %5549 = vmatprep.subr.mxu0 %v6372_v26 }
 0x11c   :  { %5550 = vmatpush3.msra.mxu0 %v6628_v40 }
 0x11d   :  { %5534 = vmatmul.mubr.msk.f32.gmra.mxu0 %vm149_vm0, %v144_v7  ;;  %5551 = vmatprep.subr.mxu0 %v6372_v26 }
 0x11e   :  { %5552 = vmatpush3.msra.mxu0 %v6633_v41  ;;  %5579 = vmatprep.mubr.msk.f32.mxu0 %vm6373_vm2, %v6372_v26 }
 0x11f   :  { %5553 = vmatprep.subr.mxu0 %v6372_v26 }
 0x120   :  { %5554 = vmatpush3.msra.mxu0 %v6638_v42 }
 0x121   :  { %5555 = vmatprep.subr.mxu0 %v6372_v26 }
 0x122   :  { %5556 = vmatpush3.msra.mxu0 %v6641_v43 }
 0x123   :  { %5557 = vmatprep.subr.mxu0 %v6372_v26 }
 0x124   :  { %5558 = vmatpush3.msra.mxu0 %v6648_v44 }
 0x125   :  { %5559 = vmatprep.subr.mxu0 %v6372_v26 }
 0x126   :  { %5560 = vmatpush3.msra.mxu0 %v6653_v45 }
 0x127   :  { %5561 = vmatprep.subr.mxu0 %v6372_v26 }
 0x128   :  { %5562 = vmatpush3.msra.mxu0 %v6658_v46 }
 0x129   :  { %5563 = vmatprep.subr.mxu0 %v6372_v26 }
 0x12a   :  { %5564 = vmatpush3.msra.mxu0 %v6663_v47 }
 0x12b   :  { %5565 = vmatprep.subr.mxu0 %v6372_v26 }
 0x12c   :  { %5566 = vmatpush3.msra.mxu0 %v6668_v48 }
 0x12d   :  { %5567 = vmatprep.subr.mxu0 %v6372_v26 }
 0x12e   :  { %5568 = vmatpush3.msra.mxu0 %v6673_v49 }
 0x12f   :  { %5569 = vmatprep.subr.mxu0 %v6372_v26 }
 0x130   :  { %5570 = vmatpush3.msra.mxu0 %v6678_v50 }
 0x131   :  { %5571 = vmatprep.subr.mxu0 %v6372_v26 }
 0x132   :  { %5572 = vmatpush3.msra.mxu0 %v6683_v51 }
 0x133   :  { %5573 = vmatprep.subr.mxu0 %v6372_v26 }
 0x134   :  { %5574 = vmatpush3.msra.mxu0 %v6688_v52 }
 0x135   :  { %5575 = vmatprep.subr.mxu0 %v6372_v26 }
 0x136   :  { %5576 = vmatpush3.msra.mxu0 %v6693_v53 }
 0x137   :  { %5577 = vmatprep.subr.mxu0 %v6372_v26 }
 0x138   :  { %5578 = vmatpush3.msra.mxu0 %v6698_v54 }
 0x139   :  { %5624 = vmatprep.subr.mxu0 %v6372_v26 }
 0x1cc   :  { %v6616_v27 = vpop.f32.mrf.mxu0  ;;  %v5504_v55 = vpop.f32.mrf.mxu1 }
 0x1cd   :  { %v498_v58 = vadd.f32 %v5504_v55, %v6616_v27 }
 0x1ce   :  { %v6618_v28 = vpop.f32.mrf.mxu0  ;;  %v492_v56 = vpop.f32.mrf.mxu1 }
 0x1cf   :  { %v493_v60 = vadd.f32 %v492_v56, %v6618_v28  ;;  %v1222_v56 = vld [vmem:[%s6433_s14 + $0x70] sm:$0xff] }
 0x1d1   :  { %v5511_v29 = vpop.f32.mrf.mxu0 }
 0x1d3   :  { %v573_v30 = vpop.f32.mrf.mxu0 }
 0x1d5   :  { %v5514_v31 = vpop.f32.mrf.mxu0 }
 0x1d6   :  { %5515 = vmatprep.subr.mxu1 %v5514_v31 }
 0x1d7   :  { %v583_v32 = vpop.f32.mrf.mxu0  ;;  %5516 = vmatpush3.msra.mxu1 %v5514_v31 }
 0x1d8   :  { %5517 = vmatprep.subr.mxu1 %v583_v32 }
 0x1d9   :  { %5518 = vmatpush3.msra.mxu1 %v583_v32  ;;  %v5532_v33 = vpop.f32.mrf.mxu0 }
 0x1da   :  { %5519 = vmatprep.subr.mxu1 %v5511_v29 }
 0x1db   :  { %5520 = vmatpush3.msra.mxu1 %v5511_v29  ;;  %v747_v34 = vpop.f32.mrf.mxu0 }
 0x1dc   :  { %5521 = vmatprep.subr.mxu1 %v573_v30 }
 0x1dd   :  { %5522 = vmatpush3.msra.mxu1 %v573_v30  ;;  %v5535_v37 = vpop.f32.mrf.mxu0 }
 0x1de   :  { %5524 = vmatmul.mubr.msk.f32.vlgmr.msra.gmra.mxu1 %vm338_vm1, %v4872_v35  ;;  %5536 = vmatprep.subr.mxu1 %v5535_v37 }
 0x1df   :  { %v757_v38 = vpop.f32.mrf.mxu0  ;;  %5537 = vmatpush3.msra.mxu1 %v5535_v37  ;;  %5544 = vmatprep.mubr.msk.f32.mxu1 %vm338_vm1, %v4881_v36  ;;  %v4911_v36 = vld [vmem:[%s6433_s14 + $0xf8] sm:$0xff] }
 0x1e0   :  { %5538 = vmatprep.subr.mxu1 %v757_v38  ;;  %v1223_v37 = vld [vmem:[%s6433_s14 + $0x78] sm:$0xff] }
 0x1e1   :  { %5539 = vmatpush3.msra.mxu1 %v757_v38  ;;  %v4910_v38 = vld [vmem:[%s6433_s14 + $0xf0] sm:$0xff] }
 0x1e2   :  { %5540 = vmatprep.subr.mxu1 %v5532_v33 }
 0x1e3   :  { %5541 = vmatpush3.msra.mxu1 %v5532_v33 }
 0x1e4   :  { %5542 = vmatprep.subr.mxu1 %v747_v34 }
 0x1e5   :  { %5543 = vmatpush3.msra.mxu1 %v747_v34 }
 0x1e6   :  { %5545 = vmatmul.mubr.msk.f32.vlgmr.msra.gmra.mxu1 %vm338_vm1, %v4882_v39  ;;  %5582 = vmatprep.subr.mxu1 %v6372_v26  ;;  %v4909_v39 = vld [vmem:[%s6433_s14 + $0xe8] sm:$0xff] }
 0x1e7   :  { %5586 = vmatprep.mubr.msk.f32.mxu1 %vm6373_vm2, %v6372_v26  ;;  %5583 = vmatpush3.msra.mxu1 %v875_v13 }
 0x1e8   :  { %5584 = vmatprep.subr.mxu1 %v6372_v26 }
 0x1e9   :  { %5585 = vmatpush3.msra.mxu1 %v874_v14 }
 0x1ea   :  { %5589 = vmatprep.subr.mxu1 %v6372_v26 }
 0x29e   :  { %v5525_v57 = vpop.f32.mrf.mxu1 }
 0x29f   :  { %v674_v61 = vadd.f32 %v5525_v57, %v498_v58  ;;  %v1221_v57 = vld [vmem:[%s6433_s14 + $0x68] sm:$0xff]  ;;  %v1220_v58 = vld [vmem:[%s6433_s14 + $0x60] sm:$0xff] }
 0x2a0   :  { %v664_v59 = vpop.f32.mrf.mxu1 }
 0x2a1   :  { %v673_v63 = vadd.f32 %v664_v59, %v493_v60  ;;  %v1219_v59 = vld [vmem:[%s6433_s14 + $0x58] sm:$0xff]  ;;  %v1218_v60 = vld [vmem:[%s6433_s14 + $0x50] sm:$0xff] }
 0x2a6   :  { %v5546_v62 = vpop.f32.mrf.mxu1 }
 0x2a7   :  { %v848_v0 = vadd.f32 %v5546_v62, %v674_v61  ;;  %v1217_v61 = vld [vmem:[%s6433_s14 + $0x48] sm:$0xff]  ;;  %v1216_v62 = vld [vmem:[%s6433_s14 + $0x40] sm:$0xff] }
 0x2a8   :  { %v838_v2 = vpop.f32.mrf.mxu1 }
 0x2a9   :  { %v847_v3 = vadd.f32 %v838_v2, %v673_v63  ;;  %v6709_v4 = vadd.f32 %v4891_v1, %v848_v0  ;;  %v1215_v63 = vld [vmem:[%s6433_s14 + $0x38] sm:$0xff]  ;;  %v1214_v0 = vld [vmem:[%s6433_s14 + $0x30] sm:$0xff]  ;;  %v1212_v2 = vld [vmem:[%s6433_s14 + $0x20] sm:$0xff] }
 0x2ab   :  { %v856_v5 = vadd.f32 %v4891_v1, %v847_v3  ;;  %v1213_v1 = vld [vmem:[%s6433_s14 + $0x28] sm:$0xff]  ;;  %v4899_v3 = vld [vmem:[%s6433_s14 + $0x98] sm:$0xff] }
 0x2ad   :  { %v876_v6 = vadd.f32 %v6709_v4, %v856_v5 }
 0x2af   :  { %v877_v7 = vrot.slane %v876_v6, 4 }
 0x2b1   :  { %v878_v8 = vadd.f32 %v877_v7, %v876_v6  ;;  %v1210_v6 = vld [vmem:[%s6433_s14 + $0x10] sm:$0xff]  ;;  %v4897_v7 = vld [vmem:[%s6433_s14 + $0x88] sm:$0xff] }
 0x2b3   :  { %v879_v9 = vrot.slane %v878_v8, 2 }
 0x2b5   :  { %v880_v10 = vadd.f32 %v879_v9, %v878_v8  ;;  %v1209_v8 = vld [vmem:[%s6433_s14 + $0x8] sm:$0xff]  ;;  %v4896_v9 = vld [vmem:[%s6433_s14 + $0x80] sm:$0xff] }
 0x2b7   :  { %v881_v11 = vrot.slane %v880_v10, 1 }
 0x2b9   :  { %v882_v12 = vadd.f32 %v881_v11, %v880_v10  ;;  %v1208_v10 = vld [vmem:[%s6433_s14] sm:$0xff]  ;;  %v4930_v11 = vld [vmem:[%s6433_s14 + $0x178] sm:$0xff] }
 0x2bb   :  { %5580 = vmatmul.mubr.f32.vlgmr.msra.gmra.mxu0 %v882_v12 }
 0x2bc   :  { %5628 = vmatprep.mubr.msk.f32.mxu0 %vm6373_vm2, %v6372_v26  ;;  %5625 = vmatpush3.msra.mxu0 %v875_v13 }
 0x2bd   :  { %5626 = vmatprep.subr.mxu0 %v6372_v26 }
 0x2be   :  { %5627 = vmatpush3.msra.mxu0 %v874_v14  ;;  %v4894_v14 = vld [vmem:[%s6413_s25] ss:$0 sm:$0xff]  ;;  %s7348_s25 = sld [smem:[#allocation16_spill]] }
 0x2bf   :  { %5631 = vmatprep.subr.mxu0 %v1223_v37 }
 0x37b   :  { %v949_v15 = vpop.f32.mrf.mxu0 }
 0x37c   :  { %v953_v16 = vmul.f32 0.0078125, %v949_v15 }
 0x37d   :  { %v5581_v17 = vpop.f32.mrf.mxu0 }
 0x37e   :  { %5587 = vmatmul.mubr.msk.f32.vlgmr.msra.gmra.mxu1 %vm149_vm0, %v953_v16 }
 0x37f   :  { %5590 = vmatpush3.msra.mxu1 %v6611_v25  ;;  %5621 = vmatprep.mubr.msk.f32.mxu1 %vm6373_vm2, %v6372_v26 }
 0x380   :  { %5591 = vmatprep.subr.mxu1 %v6372_v26 }
 0x381   :  { %5592 = vmatpush3.msra.mxu1 %v6628_v40  ;;  %v4908_v40 = vld [vmem:[%s6433_s14 + $0xe0] sm:$0xff] }
 0x382   :  { %5593 = vmatprep.subr.mxu1 %v6372_v26 }
 0x383   :  { %5594 = vmatpush3.msra.mxu1 %v6633_v41  ;;  %v4907_v41 = vld [vmem:[%s6433_s14 + $0xd8] sm:$0xff] }
 0x384   :  { %5595 = vmatprep.subr.mxu1 %v6372_v26 }
 0x385   :  { %5596 = vmatpush3.msra.mxu1 %v6638_v42  ;;  %v4906_v42 = vld [vmem:[%s6433_s14 + $0xd0] sm:$0xff] }
 0x386   :  { %5597 = vmatprep.subr.mxu1 %v6372_v26 }
 0x387   :  { %5598 = vmatpush3.msra.mxu1 %v6641_v43  ;;  %v4905_v43 = vld [vmem:[%s6433_s14 + $0xc8] sm:$0xff] }
 0x388   :  { %5599 = vmatprep.subr.mxu1 %v6372_v26 }
 0x389   :  { %5600 = vmatpush3.msra.mxu1 %v6648_v44  ;;  %v4904_v44 = vld [vmem:[%s6433_s14 + $0xc0] sm:$0xff] }
 0x38a   :  { %5601 = vmatprep.subr.mxu1 %v6372_v26 }
 0x38b   :  { %5602 = vmatpush3.msra.mxu1 %v6653_v45  ;;  %v4903_v45 = vld [vmem:[%s6433_s14 + $0xb8] sm:$0xff] }
 0x38c   :  { %5603 = vmatprep.subr.mxu1 %v6372_v26 }
 0x38d   :  { %5604 = vmatpush3.msra.mxu1 %v6658_v46  ;;  %v4902_v46 = vld [vmem:[%s6433_s14 + $0xb0] sm:$0xff] }
 0x38e   :  { %5605 = vmatprep.subr.mxu1 %v6372_v26 }
 0x38f   :  { %5606 = vmatpush3.msra.mxu1 %v6663_v47  ;;  %v4901_v47 = vld [vmem:[%s6433_s14 + $0xa8] sm:$0xff] }
 0x390   :  { %5607 = vmatprep.subr.mxu1 %v6372_v26 }
 0x391   :  { %5608 = vmatpush3.msra.mxu1 %v6668_v48  ;;  %v4900_v48 = vld [vmem:[%s6433_s14 + $0xa0] sm:$0xff] }
 0x392   :  { %5609 = vmatprep.subr.mxu1 %v6372_v26 }
 0x393   :  { %5610 = vmatpush3.msra.mxu1 %v6673_v49 }
 0x394   :  { %5611 = vmatprep.subr.mxu1 %v6372_v26 }
 0x395   :  { %5612 = vmatpush3.msra.mxu1 %v6678_v50 }
 0x396   :  { %5613 = vmatprep.subr.mxu1 %v6372_v26 }
 0x397   :  { %5614 = vmatpush3.msra.mxu1 %v6683_v51 }
 0x398   :  { %5615 = vmatprep.subr.mxu1 %v6372_v26 }
 0x399   :  { %5616 = vmatpush3.msra.mxu1 %v6688_v52 }
 0x39a   :  { %5617 = vmatprep.subr.mxu1 %v6372_v26 }
 0x39b   :  { %5618 = vmatpush3.msra.mxu1 %v6693_v53  ;;  %v1113_v53 = vld [vmem:[%s6408_s21] sm:$0x1]  ;;  %s7347_s21 = sld [smem:[#allocation11_spill]] }
 0x39c   :  { %5619 = vmatprep.subr.mxu1 %v6372_v26 }
 0x39d   :  { %5620 = vmatpush3.msra.mxu1 %v6698_v54 }
 0x39e   :  { %5666 = vmatprep.subr.mxu1 %v4911_v36 }
 0x43e   :  { %v1023_v21 = vpop.f32.mrf.mxu1 }
 0x43f   :  { %v1030_v22 = vrot.slane %v1023_v21, %v6756_v20 }
 0x440   :  { %v5588_v23 = vpop.f32.mrf.mxu1 }
 0x441   :  { %v6759_v24 = vsub.f32 %v856_v5, %v1030_v22  ;;  %v6762_v25 = vsub.f32 %v6709_v4, %v1030_v22  ;;  %v1211_v4 = vld [vmem:[%s6433_s14 + $0x18] sm:$0xff]  ;;  %v4898_v5 = vld [vmem:[%s6433_s14 + $0x90] sm:$0xff] }
 0x443   :  { %v1033_v27 = vmul.f32 %v6759_v24, %v6759_v24  ;;  %v1034_v28 = vmul.f32 %v6762_v25, %v6762_v25 }
 0x445   :  { %v1035_v29 = vadd.f32 %v1034_v28, %v1033_v27  ;;  %v4929_v27 = vld [vmem:[%s6433_s14 + $0x170] sm:$0xff]  ;;  %v4926_v28 = vld [vmem:[%s6433_s14 + $0x158] sm:$0xff] }
 0x447   :  { %v1036_v30 = vrot.slane %v1035_v29, 4 }
 0x449   :  { %v1037_v31 = vadd.f32 %v1036_v30, %v1035_v29  ;;  %v4925_v29 = vld [vmem:[%s6433_s14 + $0x150] sm:$0xff]  ;;  %v4924_v30 = vld [vmem:[%s6433_s14 + $0x148] sm:$0xff] }
 0x44b   :  { %v1038_v32 = vrot.slane %v1037_v31, 2 }
 0x44d   :  { %v1039_v33 = vadd.f32 %v1038_v32, %v1037_v31  ;;  %v4923_v31 = vld [vmem:[%s6433_s14 + $0x140] sm:$0xff]  ;;  %v4922_v32 = vld [vmem:[%s6433_s14 + $0x138] sm:$0xff] }
 0x44f   :  { %v1040_v34 = vrot.slane %v1039_v33, 1 }
 0x451   :  { %v1041_v35 = vadd.f32 %v1040_v34, %v1039_v33  ;;  %v4921_v33 = vld [vmem:[%s6433_s14 + $0x130] sm:$0xff]  ;;  %v4920_v34 = vld [vmem:[%s6433_s14 + $0x128] sm:$0xff] }
 0x453   :  { %5622 = vmatmul.mubr.f32.vlgmr.msra.gmra.mxu1 %v1041_v35  ;;  %v4919_v35 = vld [vmem:[%s6433_s14 + $0x120] sm:$0xff] }
 0x454   :  { %5667 = vmatpush3.msra.mxu1 %v4911_v36  ;;  %v4918_v36 = vld [vmem:[%s6433_s14 + $0x118] sm:$0xff] }
 0x455   :  { %5668 = vmatprep.subr.mxu1 %v4910_v38 }
 0x456   :  { %5669 = vmatpush3.msra.mxu1 %v4910_v38  ;;  %v4916_v38 = vld [vmem:[%s6433_s14 + $0x108] sm:$0xff] }
 0x457   :  { %5670 = vmatprep.subr.mxu1 %v4909_v39 }
 0x458   :  { %5671 = vmatpush3.msra.mxu1 %v4909_v39  ;;  %v4915_v39 = vld [vmem:[%s6433_s14 + $0x100] sm:$0xff] }
 0x459   :  { %5672 = vmatprep.subr.mxu1 %v4908_v40 }
 0x45a   :  { %5673 = vmatpush3.msra.mxu1 %v4908_v40 }
 0x45b   :  { %5674 = vmatprep.subr.mxu1 %v4907_v41 }
 0x45c   :  { %5675 = vmatpush3.msra.mxu1 %v4907_v41  ;;  %v4895_v41 = vld [vmem:[%s6428_s8 + $0x8] sm:$0xff] }
 0x45d   :  { %5676 = vmatprep.subr.mxu1 %v4906_v42 }
 0x45e   :  { %5677 = vmatpush3.msra.mxu1 %v4906_v42 }
 0x45f   :  { %5678 = vmatprep.subr.mxu1 %v4905_v43 }
 0x460   :  { %5679 = vmatpush3.msra.mxu1 %v4905_v43 }
 0x461   :  { %5680 = vmatprep.subr.mxu1 %v4904_v44 }
 0x462   :  { %5681 = vmatpush3.msra.mxu1 %v4904_v44  ;;  %v1207_v44 = vld [vmem:[%s6428_s8] sm:$0xff] }
 0x463   :  { %5682 = vmatprep.subr.mxu1 %v4903_v45 }
 0x464   :  { %5683 = vmatpush3.msra.mxu1 %v4903_v45 }
 0x465   :  { %5684 = vmatprep.subr.mxu1 %v4902_v46 }
 0x466   :  { %5685 = vmatpush3.msra.mxu1 %v4902_v46 }
 0x467   :  { %5686 = vmatprep.subr.mxu1 %v4901_v47 }
 0x468   :  { %5687 = vmatpush3.msra.mxu1 %v4901_v47  ;;  %v4914_v47 = vld [vmem:[%s6428_s8 + $0x10] sm:$0xff] }
 0x469   :  { %5688 = vmatprep.subr.mxu1 %v4900_v48 }
 0x46a   :  { %5689 = vmatpush3.msra.mxu1 %v4900_v48  ;;  %v4948_v48 = vld [vmem:[%s6433_s14 + $0x1f8] sm:$0xff] }
 0x46b   :  { %5690 = vmatprep.subr.mxu1 %v4899_v3 }
 0x46c   :  { %5691 = vmatpush3.msra.mxu1 %v4899_v3 }
 0x46d   :  { %5692 = vmatprep.subr.mxu1 %v4898_v5 }
 0x46e   :  { %5693 = vmatpush3.msra.mxu1 %v4898_v5 }
 0x46f   :  { %5694 = vmatprep.subr.mxu1 %v4897_v7 }
 0x470   :  { %5695 = vmatpush3.msra.mxu1 %v4897_v7 }
 0x471   :  { %5696 = vmatprep.subr.mxu1 %v4896_v9 }
 0x472   :  { %5697 = vmatpush3.msra.mxu1 %v4896_v9 }
 0x473   :  { %5715 = vmatprep.subr.mxu1 %v4930_v11 }
 0x513   :  { %v1108_v49 = vpop.f32.mrf.mxu1 }
 0x514   :  { %v1112_v50 = vmul.f32 0.0078125, %v1108_v49 }
 0x515   :  { %v5623_v51 = vpop.f32.mrf.mxu1 }
 0x516   :  { %v1114_v52 = vadd.f32 1e-05, %v1112_v50  ;;  %v4947_v50 = vld [vmem:[%s6433_s14 + $0x1f0] sm:$0xff]  ;;  %v4946_v51 = vld [vmem:[%s6433_s14 + $0x1e8] sm:$0xff] }
 0x518   :  { %6260 = vrsqrt.f32 %v1114_v52  ;;  %v4945_v52 = vld [vmem:[%s6433_s14 + $0x1e0] sm:$0xff] }
 0x525   :  { %v6261_v54 = vpop.eup %6260 }
 0x526   :  { %v1116_v55 = vmul.f32 %v6261_v54, %v1113_v53  ;;  %v4944_v53 = vld [vmem:[%s6433_s14 + $0x1d8] sm:$0xff]  ;;  %v4943_v54 = vld [vmem:[%s6433_s14 + $0x1d0] sm:$0xff] }
 0x528   :  { %5629 = vmatmul.mubr.msk.f32.vlgmr.msra.gmra.mxu0 %vm149_vm0, %v1116_v55  ;;  %v4942_v55 = vld [vmem:[%s6433_s14 + $0x1c8] sm:$0xff] }
 0x529   :  { %5632 = vmatpush3.msra.mxu0 %v1223_v37  ;;  %v4917_v37 = vld [vmem:[%s6433_s14 + $0x110] sm:$0xff] }
 0x52a   :  { %5633 = vmatprep.subr.mxu0 %v1222_v56 }
 0x52b   :  { %5634 = vmatpush3.msra.mxu0 %v1222_v56  ;;  %v4941_v56 = vld [vmem:[%s6433_s14 + $0x1c0] sm:$0xff] }
 0x52c   :  { %5635 = vmatprep.subr.mxu0 %v1221_v57 }
 0x52d   :  { %5636 = vmatpush3.msra.mxu0 %v1221_v57  ;;  %v4940_v57 = vld [vmem:[%s6433_s14 + $0x1b8] sm:$0xff] }
 0x52e   :  { %5637 = vmatprep.subr.mxu0 %v1220_v58 }
 0x52f   :  { %5638 = vmatpush3.msra.mxu0 %v1220_v58  ;;  %v4939_v58 = vld [vmem:[%s6433_s14 + $0x1b0] sm:$0xff] }
 0x530   :  { %5639 = vmatprep.subr.mxu0 %v1219_v59 }
 0x531   :  { %5640 = vmatpush3.msra.mxu0 %v1219_v59  ;;  %v4938_v59 = vld [vmem:[%s6433_s14 + $0x1a8] sm:$0xff] }
 0x532   :  { %5641 = vmatprep.subr.mxu0 %v1218_v60 }
 0x533   :  { %5642 = vmatpush3.msra.mxu0 %v1218_v60  ;;  %v4937_v60 = vld [vmem:[%s6433_s14 + $0x1a0] sm:$0xff] }
 0x534   :  { %5643 = vmatprep.subr.mxu0 %v1217_v61 }
 0x535   :  { %5644 = vmatpush3.msra.mxu0 %v1217_v61  ;;  %v4936_v61 = vld [vmem:[%s6433_s14 + $0x198] sm:$0xff] }
 0x536   :  { %5645 = vmatprep.subr.mxu0 %v1216_v62 }
 0x537   :  { %5646 = vmatpush3.msra.mxu0 %v1216_v62  ;;  %v4935_v62 = vld [vmem:[%s6433_s14 + $0x190] sm:$0xff] }
 0x538   :  { %5647 = vmatprep.subr.mxu0 %v1215_v63 }
 0x539   :  { %5648 = vmatpush3.msra.mxu0 %v1215_v63  ;;  %v4934_v63 = vld [vmem:[%s6433_s14 + $0x188] sm:$0xff] }
 0x53a   :  { %5649 = vmatprep.subr.mxu0 %v1214_v0 }
 0x53b   :  { %5650 = vmatpush3.msra.mxu0 %v1214_v0  ;;  %v4933_v0 = vld [vmem:[%s6433_s14 + $0x180] sm:$0xff] }
 0x53c   :  { %5651 = vmatprep.subr.mxu0 %v1213_v1 }
 0x53d   :  { %5652 = vmatpush3.msra.mxu0 %v1213_v1 }
 0x53e   :  { %5653 = vmatprep.subr.mxu0 %v1212_v2 }
 0x53f   :  { %5654 = vmatpush3.msra.mxu0 %v1212_v2 }
 0x540   :  { %5655 = vmatprep.subr.mxu0 %v1211_v4 }
 0x541   :  { %5656 = vmatpush3.msra.mxu0 %v1211_v4 }
 0x542   :  { %5657 = vmatprep.subr.mxu0 %v1210_v6 }
 0x543   :  { %5658 = vmatpush3.msra.mxu0 %v1210_v6 }
 0x544   :  { %5659 = vmatprep.subr.mxu0 %v1209_v8 }
 0x545   :  { %5660 = vmatpush3.msra.mxu0 %v1209_v8 }
 0x546   :  { %5661 = vmatprep.subr.mxu0 %v1208_v10 }
 0x547   :  { %5662 = vmatpush3.msra.mxu0 %v1208_v10  ;;  %v4932_v10 = vld [vmem:[%s6428_s8 + $0x18] sm:$0xff] }
 0x548   :  { %5701 = vmatprep.subr.mxu0 %v6372_v26 }
 0x5e8   :  { %v1186_v12 = vpop.f32.mrf.mxu0 }
 0x5e9   :  { %v1193_v13 = vrot.slane %v1186_v12, %v6756_v20  ;;  %v1884_v12 = vld [vmem:[%s6453_s6 + $0x8] sm:$0xff] }
 0x5ea   :  { %v5630_v15 = vpop.f32.mrf.mxu0 }
 0x5eb   :  { %v1194_v16 = vmul.f32 %v1193_v13, %v6759_v24  ;;  %v1195_v17 = vmul.f32 %v1193_v13, %v6762_v25  ;;  %v4928_v24 = vld [vmem:[%s6433_s14 + $0x168] sm:$0xff]  ;;  %v4927_v25 = vld [vmem:[%s6433_s14 + $0x160] sm:$0xff] }
 0x5ec   :  { %v1883_v13 = vld [vmem:[%s6453_s6] sm:$0xff]  ;;  %s7350_s6 = sld [smem:[#allocation14_spill]] }
 0x5ed   :  { %v1203_v18 = vadd.f32 %v4894_v14, %v1194_v16  ;;  %v1204_v21 = vadd.f32 %v4894_v14, %v1195_v17  ;;  %v4950_v15 = vld [vmem:[%s6438_s19] ss:$0 sm:$0xff] }
 0x5ef   :  { %v6808_v22 = vmax.f32 %v1203_v18, 0.0  ;;  %v6810_v23 = vmax.f32 %v1204_v21, 0.0 }
 0x5f1   :  { %5663 = vmatprep.mubr.f32.mxu0 %v6808_v22  ;;  %5698 = vmatprep.mubr.f32.mxu1 %v6808_v22 }
 0x5f2   :  { %5664 = vmatmul.mubr.f32.vlgmr.msra.gmra.mxu0 %v6810_v23  ;;  %5699 = vmatmul.mubr.f32.vlgmr.msra.gmra.mxu1 %v6810_v23 }
 0x5f3   :  { %5716 = vmatpush3.msra.mxu1 %v4930_v11  ;;  %5747 = vmatprep.mubr.f32.mxu1 %v6808_v22 }
 0x5f4   :  { %5717 = vmatprep.subr.mxu1 %v4929_v27  ;;  %5705 = vmatprep.mubr.msk.f32.mxu0 %vm6373_vm2, %v6372_v26 }
 0x5f5   :  { %5718 = vmatpush3.msra.mxu1 %v4929_v27 }
 0x5f6   :  { %5719 = vmatprep.subr.mxu1 %v4928_v24 }
 0x5f7   :  { %5720 = vmatpush3.msra.mxu1 %v4928_v24 }
 0x5f8   :  { %5721 = vmatprep.subr.mxu1 %v4927_v25 }
 0x5f9   :  { %5722 = vmatpush3.msra.mxu1 %v4927_v25 }
 0x5fa   :  { %5723 = vmatprep.subr.mxu1 %v4926_v28 }
 0x5fb   :  { %5724 = vmatpush3.msra.mxu1 %v4926_v28 }
 0x5fc   :  { %5725 = vmatprep.subr.mxu1 %v4925_v29 }
 0x5fd   :  { %5726 = vmatpush3.msra.mxu1 %v4925_v29  ;;  %v1885_v29 = vld [vmem:[%s6458_s12] sm:$0xf]  ;;  %s7351_s12 = sld [smem:[#allocation20_spill]] }
 0x5fe   :  { %5727 = vmatprep.subr.mxu1 %v4924_v30 }
 0x5ff   :  { %5728 = vmatpush3.msra.mxu1 %v4924_v30 }
 0x600   :  { %5729 = vmatprep.subr.mxu1 %v4923_v31 }
 0x601   :  { %5730 = vmatpush3.msra.mxu1 %v4923_v31 }
 0x602   :  { %5731 = vmatprep.subr.mxu1 %v4922_v32 }
 0x603   :  { %5732 = vmatpush3.msra.mxu1 %v4922_v32 }
 0x604   :  { %5733 = vmatprep.subr.mxu1 %v4921_v33 }
 0x605   :  { %5734 = vmatpush3.msra.mxu1 %v4921_v33 }
 0x606   :  { %5735 = vmatprep.subr.mxu1 %v4920_v34 }
 0x607   :  { %5736 = vmatpush3.msra.mxu1 %v4920_v34 }
 0x608   :  { %5737 = vmatprep.subr.mxu1 %v4919_v35 }
 0x609   :  { %5738 = vmatpush3.msra.mxu1 %v4919_v35 }
 0x60a   :  { %5739 = vmatprep.subr.mxu1 %v4918_v36 }
 0x60b   :  { %5740 = vmatpush3.msra.mxu1 %v4918_v36 }
 0x60c   :  { %5741 = vmatprep.subr.mxu1 %v4917_v37 }
 0x60d   :  { %5742 = vmatpush3.msra.mxu1 %v4917_v37 }
 0x60e   :  { %5743 = vmatprep.subr.mxu1 %v4916_v38 }
 0x60f   :  { %5744 = vmatpush3.msra.mxu1 %v4916_v38 }
 0x610   :  { %5745 = vmatprep.subr.mxu1 %v4915_v39 }
 0x611   :  { %5746 = vmatpush3.msra.mxu1 %v4915_v39 }
 0x612   :  { %5748 = vmatmul.mubr.f32.vlgmr.msra.gmra.mxu1 %v6810_v23  ;;  %5792 = vmatprep.subr.mxu1 %v6372_v26 }
 0x613   :  { %5796 = vmatprep.mubr.msk.f32.mxu1 %vm6373_vm2, %v6372_v26 }
 0x6b2   :  { %v5700_v40 = vpop.f32.mrf.mxu1  ;;  %v5665_v42 = vpop.f32.mrf.mxu0 }
 0x6b3   :  { %5702 = vmatpush3.msra.mxu0 %v5700_v40 }
 0x6b4   :  { %v1384_v43 = vpop.f32.mrf.mxu1  ;;  %5703 = vmatprep.subr.mxu0 %v6372_v26  ;;  %v1290_v45 = vpop.f32.mrf.mxu0 }
 0x6b5   :  { %5704 = vmatpush3.msra.mxu0 %v1384_v43 }
 0x6b6   :  { %5708 = vmatprep.subr.mxu0 %v6372_v26  ;;  %5706 = vmatmul.mubr.msk.f32.vlgmr.msra.gmra.mxu0 %vm149_vm0, %v4895_v41 }
 0x6b7   :  { %5709 = vmatpush3.msra.mxu0 %v5665_v42  ;;  %5712 = vmatprep.mubr.msk.f32.mxu0 %vm6373_vm2, %v6372_v26 }
 0x6b8   :  { %5710 = vmatprep.subr.mxu0 %v6372_v26 }
 0x6b9   :  { %5711 = vmatpush3.msra.mxu0 %v1290_v45 }
 0x6ba   :  { %5713 = vmatmul.mubr.msk.f32.vlgmr.msra.gmra.mxu0 %vm149_vm0, %v1207_v44  ;;  %5750 = vmatprep.subr.mxu0 %v6372_v26 }
 0x6bb   :  { %5754 = vmatprep.mubr.msk.f32.mxu0 %vm6373_vm2, %v6372_v26 }
 0x6d2   :  { %v5749_v46 = vpop.f32.mrf.mxu1 }
 0x6d3   :  { %5751 = vmatpush3.msra.mxu0 %v5749_v46 }
 0x6d4   :  { %v1624_v49 = vpop.f32.mrf.mxu1  ;;  %5752 = vmatprep.subr.mxu0 %v6372_v26 }
 0x6d5   :  { %5753 = vmatpush3.msra.mxu0 %v1624_v49  ;;  %v2132_v49 = vld [vmem:[%s6443_s24] sm:$0x1]  ;;  %s7349_s24 = sld [smem:[#allocation17_spill]] }
 0x6d6   :  { %5755 = vmatmul.mubr.msk.f32.vlgmr.msra.gmra.mxu0 %vm149_vm0, %v4914_v47  ;;  %5757 = vmatprep.subr.mxu0 %v4948_v48 }
 0x6d7   :  { %5758 = vmatpush3.msra.mxu0 %v4948_v48  ;;  %5789 = vmatprep.mubr.f32.mxu0 %v6808_v22 }
 0x6d8   :  { %5759 = vmatprep.subr.mxu0 %v4947_v50 }
 0x6d9   :  { %5760 = vmatpush3.msra.mxu0 %v4947_v50 }
 0x6da   :  { %5761 = vmatprep.subr.mxu0 %v4946_v51 }
 0x6db   :  { %5762 = vmatpush3.msra.mxu0 %v4946_v51 }
 0x6dc   :  { %5763 = vmatprep.subr.mxu0 %v4945_v52 }
 0x6dd   :  { %5764 = vmatpush3.msra.mxu0 %v4945_v52  ;;  %v2224_v52 = vld [vmem:[%s7342_s0 + $0x8] sm:$0xff] }
 0x6de   :  { %5765 = vmatprep.subr.mxu0 %v4944_v53 }
 0x6df   :  { %5766 = vmatpush3.msra.mxu0 %v4944_v53  ;;  %v2223_v53 = vld [vmem:[%s7342_s0] sm:$0xff] }
 0x6e0   :  { %5767 = vmatprep.subr.mxu0 %v4943_v54 }
 0x6e1   :  { %5768 = vmatpush3.msra.mxu0 %v4943_v54  ;;  %v2308_v54 = vld [vmem:[%s7343_s5 + $0x18] sm:$0xff] }
 0x6e2   :  { %5769 = vmatprep.subr.mxu0 %v4942_v55 }
 0x6e3   :  { %5770 = vmatpush3.msra.mxu0 %v4942_v55  ;;  %v2307_v55 = vld [vmem:[%s7343_s5 + $0x10] sm:$0xff] }
 0x6e4   :  { %5771 = vmatprep.subr.mxu0 %v4941_v56 }
 0x6e5   :  { %5772 = vmatpush3.msra.mxu0 %v4941_v56 }
 0x6e6   :  { %5773 = vmatprep.subr.mxu0 %v4940_v57 }
 0x6e7   :  { %5774 = vmatpush3.msra.mxu0 %v4940_v57 }
 0x6e8   :  { %5775 = vmatprep.subr.mxu0 %v4939_v58 }
 0x6e9   :  { %5776 = vmatpush3.msra.mxu0 %v4939_v58  ;;  %v4957_v58 = vld [vmem:[%s7344_s9] ss:$0 sm:$0xff] }
 0x6ea   :  { %5777 = vmatprep.subr.mxu0 %v4938_v59 }
 0x6eb   :  { %5778 = vmatpush3.msra.mxu0 %v4938_v59 }
 0x6ec   :  { %5779 = vmatprep.subr.mxu0 %v4937_v60 }
 0x6ed   :  { %5780 = vmatpush3.msra.mxu0 %v4937_v60 }
 0x6ee   :  { %5781 = vmatprep.subr.mxu0 %v4936_v61 }
 0x6ef   :  { %5782 = vmatpush3.msra.mxu0 %v4936_v61 }
 0x6f0   :  { %5783 = vmatprep.subr.mxu0 %v4935_v62 }
 0x6f1   :  { %5784 = vmatpush3.msra.mxu0 %v4935_v62 }
 0x6f2   :  { %5785 = vmatprep.subr.mxu0 %v4934_v63 }
 0x6f3   :  { %5786 = vmatpush3.msra.mxu0 %v4934_v63  ;;  %v2389_v63 = vld [vmem:[%s7345_s13 + $0x18] sm:$0xff] }
 0x6f4   :  { %5787 = vmatprep.subr.mxu0 %v4933_v0 }
 0x6f5   :  { %5788 = vmatpush3.msra.mxu0 %v4933_v0  ;;  %v2388_v0 = vld [vmem:[%s7345_s13 + $0x10] sm:$0xff] }
 0x6f6   :  { %5790 = vmatmul.mubr.f32.vlgmr.msra.gmra.mxu0 %v6810_v23  ;;  %5806 = vmatprep.subr.mxu0 %v6372_v26 }
 0x6f7   :  { %5808 = vmatprep.mubr.msk.f32.mxu0 %vm6373_vm2, %v6372_v26  ;;  %5807 = vmatpush3.msk.msra.mxu0 %vm1971_vm3, %v1885_v29 }
 0x6f8   :  { %5818 = vmatprep.subr.mxu0 %v6372_v26 }
 0x776   :  { %v1462_v1 = vpop.f32.mrf.mxu0 }
 0x778   :  { %v5707_v2 = vpop.f32.mrf.mxu0 }
 0x779   :  { %v2306_v2 = vld [vmem:[%s7343_s5 + $0x8] sm:$0xff] }
 0x77a   :  { %v1535_v3 = vpop.f32.mrf.mxu0 }
 0x77b   :  { %v1536_v4 = vadd.f32 %v1535_v3, %v1462_v1  ;;  %v2387_v1 = vld [vmem:[%s7345_s13 + $0x8] sm:$0xff]  ;;  %v2386_v3 = vld [vmem:[%s7345_s13] sm:$0xff] }
 0x77c   :  { %v5714_v5 = vpop.f32.mrf.mxu0 }
 0x77d   :  { %v2310_v5 = vld [vmem:[%s7346_s17] sm:$0x7] }
 0x77e   :  { %6212 = vpush %v2310_v5 }
 0x796   :  { %v1702_v6 = vpop.f32.mrf.mxu0 }
 0x797   :  { %v1706_v7 = vadd.f32 %v1702_v6, %v1536_v4  ;;  %v2305_v4 = vld [vmem:[%s7343_s5] sm:$0xff]  ;;  %v2547_v6 = vrot.slane %v2310_v5, 1 }
 0x798   :  { %v5756_v8 = vpop.f32.mrf.mxu0 }
 0x799   :  { %6214 = vpush %v2547_v6  ;;  %v4958_v8 = vld [vmem:[%s7347_s21] ss:$0 sm:$0xff] }
 0x7af   :  { %s6213_s8 = spop %6212 }
 0x7b6   :  { %v5791_v9 = vpop.f32.mrf.mxu0 }
 0x7b7   :  { %5793 = vmatpush3.msra.mxu1 %v5791_v9 }
 0x7b8   :  { %v1792_v11 = vpop.f32.mrf.mxu0  ;;  %5794 = vmatprep.subr.mxu1 %v6372_v26 }
 0x7b9   :  { %5795 = vmatpush3.msra.mxu1 %v1792_v11  ;;  %v4970_v11 = vld [vmem:[%s7345_s13 + $0x58] sm:$0xff] }
 0x7ba   :  { %5797 = vmatmul.mubr.msk.f32.vlgmr.msra.gmra.mxu1 %vm149_vm0, %v4932_v10  ;;  %5799 = vmatprep.subr.mxu1 %v6372_v26 }
 0x7bb   :  { %5803 = vmatprep.mubr.msk.f32.mxu1 %vm6373_vm2, %v6372_v26  ;;  %5800 = vmatpush3.msra.mxu1 %v1884_v12 }
 0x7bc   :  { %5801 = vmatprep.subr.mxu1 %v6372_v26 }
 0x7bd   :  { %5802 = vmatpush3.msra.mxu1 %v1883_v13 }
 0x7be   :  { %5811 = vmatprep.subr.mxu1 %v6372_v26 }
 0x7ca   :  { %s6215_s14 = spop %6214 }
 0x87a   :  { %v1870_v14 = vpop.f32.mrf.mxu1 }
 0x87b   :  { %v1874_v16 = vadd.f32 %v1870_v14, %v1706_v7  ;;  %v2629_v7 = vrot.slane %v2310_v5, 2  ;;  %v4965_v14 = vld [vmem:[%s7345_s13 + $0x38] sm:$0xff] }
 0x87c   :  { %v5798_v17 = vpop.f32.mrf.mxu1 }
 0x87d   :  { %v1882_v18 = vadd.f32 %v4950_v15, %v1874_v16  ;;  %6216 = vpush %v2629_v7  ;;  %v4969_v15 = vld [vmem:[%s7345_s13 + $0x50] sm:$0xff]  ;;  %v4968_v17 = vld [vmem:[%s7345_s13 + $0x48] sm:$0xff] }
 0x87e   :  { %v4964_v16 = vld [vmem:[%s7345_s13 + $0x30] sm:$0xff] }
 0x87f   :  { %v1886_v21 = vsel %vm149_vm0, %v1882_v18, 0.0 }
 0x880   :  { %v1887_v22 = vrot.slane %v1886_v21, 4 }
 0x882   :  { %v1888_v23 = vadd.f32 %v1887_v22, %v1886_v21  ;;  %v4967_v21 = vld [vmem:[%s7345_s13 + $0x40] sm:$0xff] }
 0x883   :  { %v4962_v22 = vld [vmem:[%s7345_s13 + $0x20] sm:$0xff] }
 0x884   :  { %v1889_v27 = vrot.slane %v1888_v23, 2 }
 0x886   :  { %v1890_v24 = vadd.f32 %v1889_v27, %v1888_v23  ;;  %v2309_v23 = vld [vmem:[%s7348_s25] sm:$0xf] }
 0x888   :  { %v1891_v25 = vrot.slane %v1890_v24, 1 }
 0x88a   :  { %v1892_v28 = vadd.f32 %v1891_v25, %v1890_v24 }
 0x88c   :  { %5804 = vmatmul.mubr.msk.f32.vlgmr.msra.gmra.mxu1 %vm149_vm0, %v1892_v28 }
 0x88d   :  { %5812 = vmatpush3.msra.mxu1 %v1884_v12  ;;  %5815 = vmatprep.mubr.msk.f32.mxu1 %vm6373_vm2, %v6372_v26 }
 0x88e   :  { %5813 = vmatprep.subr.mxu1 %v6372_v26 }
 0x88f   :  { %5814 = vmatpush3.msra.mxu1 %v1883_v13 }
 0x890   :  { %5823 = vmatprep.subr.mxu1 %v6372_v26 }
 0x8ae   :  { %s6217_s19 = spop %6216 }
 0x94c   :  { %v1962_v30 = vpop.f32.mrf.mxu1 }
 0x94d   :  { %v1966_v31 = vmul.f32 0.03125, %v1962_v30 }
 0x94e   :  { %v5805_v32 = vpop.f32.mrf.mxu1 }
 0x94f   :  { %5809 = vmatmul.mubr.msk.f32.vlgmr.msra.gmra.mxu0 %vm1967_vm4, %v1966_v31 }
 0x950   :  { %5819 = vmatpush3.msk.msra.mxu0 %vm1971_vm3, %v1885_v29  ;;  %5820 = vmatprep.mubr.msk.f32.mxu0 %vm6373_vm2, %v6372_v26 }
 0x951   :  { %5830 = vmatprep.subr.mxu0 %v6372_v26 }
 0xa0f   :  { %v2041_v33 = vpop.f32.mrf.mxu0 }
 0xa10   :  { %v2048_v34 = vrot.slane %v2041_v33, %v6756_v20 }
 0xa11   :  { %v5810_v35 = vpop.f32.mrf.mxu0 }
 0xa12   :  { %v2049_v36 = vsub.f32 %v1882_v18, %v2048_v34  ;;  %v4963_v18 = vld [vmem:[%s7345_s13 + $0x28] sm:$0xff]  ;;  %v2631_v34 = vstv %s6217_s19 }
 0xa14   :  { %v2050_v37 = vmul.f32 %v2049_v36, %v2049_v36 }
 0xa16   :  { %v2051_v38 = vsel %vm149_vm0, %v2050_v37, 0.0 }
 0xa17   :  { %v2052_v39 = vrot.slane %v2051_v38, 4 }
 0xa19   :  { %v2053_v40 = vadd.f32 %v2052_v39, %v2051_v38  ;;  %v2467_v38 = vstv %s6213_s8  ;;  %v2549_v39 = vstv %s6215_s14 }
 0xa1b   :  { %v2054_v41 = vrot.slane %v2053_v40, 2 }
 0xa1d   :  { %v2055_v42 = vadd.f32 %v2054_v41, %v2053_v40 }
 0xa1f   :  { %v2056_v43 = vrot.slane %v2055_v42, 1 }
 0xa21   :  { %v2057_v44 = vadd.f32 %v2056_v43, %v2055_v42 }
 0xa23   :  { %5816 = vmatmul.mubr.msk.f32.vlgmr.msra.gmra.mxu1 %vm149_vm0, %v2057_v44 }
 0xa24   :  { %5827 = vmatprep.mubr.msk.f32.mxu1 %vm6373_vm2, %v6372_v26  ;;  %5824 = vmatpush3.msra.mxu1 %v2224_v52 }
 0xa25   :  { %5825 = vmatprep.subr.mxu1 %v6372_v26 }
 0xa26   :  { %5826 = vmatpush3.msra.mxu1 %v2223_v53  ;;  %v2904_v53 = vld [vmem:[%s7349_s24 + $0x18] sm:$0xff] }
 0xa27   :  { %5841 = vmatprep.subr.mxu1 %v6372_v26 }
 0xae3   :  { %v2127_v45 = vpop.f32.mrf.mxu1 }
 0xae4   :  { %v2131_v46 = vmul.f32 0.03125, %v2127_v45  ;;  %v6374_v45 = vmov 2  }
 0xae5   :  { %v5817_v47 = vpop.f32.mrf.mxu1 }
 0xae6   :  { %v2133_v48 = vadd.f32 1e-05, %v2131_v46 }
 0xae8   :  { %6262 = vrsqrt.f32 %v2133_v48 }
 0xaf5   :  { %v6263_v50 = vpop.eup %6262 }
 0xaf6   :  { %v2135_v51 = vmul.f32 %v6263_v50, %v2132_v49 }
 0xaf8   :  { %5821 = vmatmul.mubr.msk.f32.vlgmr.msra.gmra.mxu0 %vm1967_vm4, %v2135_v51 }
 0xaf9   :  { %5838 = vmatprep.mubr.msk.f32.mxu0 %vm6373_vm2, %v6372_v26  ;;  %5831 = vmatpush3.msra.mxu0 %v2308_v54  ;;  %v2903_v54 = vld [vmem:[%s7349_s24 + $0x10] sm:$0xff] }
 0xafa   :  { %5832 = vmatprep.subr.mxu0 %v6372_v26 }
 0xafb   :  { %5833 = vmatpush3.msra.mxu0 %v2307_v55  ;;  %v2902_v55 = vld [vmem:[%s7349_s24 + $0x8] sm:$0xff] }
 0xafc   :  { %5834 = vmatprep.subr.mxu0 %v6372_v26 }
 0xafd   :  { %5835 = vmatpush3.msra.mxu0 %v2306_v2 }
 0xafe   :  { %5836 = vmatprep.subr.mxu0 %v6372_v26 }
 0xaff   :  { %5837 = vmatpush3.msra.mxu0 %v2305_v4 }
 0xb00   :  { %5852 = vmatprep.subr.mxu0 %v6372_v26 }
 0xbb8   :  { %v2205_v56 = vpop.f32.mrf.mxu0 }
 0xbb9   :  { %v2212_v57 = vrot.slane %v2205_v56, %v6756_v20  ;;  %v2901_v56 = vld [vmem:[%s7349_s24] sm:$0xff] }
 0xbba   :  { %v5822_v59 = vpop.f32.mrf.mxu0 }
 0xbbb   :  { %v2213_v60 = vmul.f32 %v2212_v57, %v2049_v36  ;;  %v2804_v57 = vsub.s32 1, %v6753_v19  ;;  %v2883_v59 = vsub.s32 2, %v6753_v19 }
 0xbbd   :  { %v2221_v61 = vadd.f32 %v4957_v58, %v2213_v60  ;;  %v2311_v58 = vld [vmem:[%s7350_s6] sm:$0x7] }
 0xbbf   :  { %v2222_v62 = vmax.f32 %v2221_v61, 0.0  ;;  %v2727_v61 = vrot.slane %v2311_v58, %v6756_v20 }
 0xbc1   :  { %5828 = vmatmul.mubr.msk.f32.vlgmr.msra.gmra.mxu1 %vm149_vm0, %v2222_v62  ;;  %v2805_v62 = vrot.slane %v2311_v58, %v2804_v57  ;;  %v7072_v57 = vld [vmem:[%s6418_s29 + $0x58] sm:$0xff] }
 0xbc2   :  { %5842 = vmatpush3.msra.mxu1 %v2389_v63  ;;  %5849 = vmatprep.mubr.msk.f32.mxu1 %vm6373_vm2, %v6372_v26 }
 0xbc3   :  { %5843 = vmatprep.subr.mxu1 %v6372_v26 }
 0xbc4   :  { %5844 = vmatpush3.msra.mxu1 %v2388_v0  ;;  %v2884_v0 = vrot.slane %v2311_v58, %v2883_v59  ;;  %v7077_v58 = vld [vmem:[%s6418_s29 + $0x50] sm:$0xff]  ;;  %v7082_v59 = vld [vmem:[%s6418_s29 + $0x48] sm:$0xff] }
 0xbc5   :  { %5845 = vmatprep.subr.mxu1 %v6372_v26 }
 0xbc6   :  { %5846 = vmatpush3.msra.mxu1 %v2387_v1 }
 0xbc7   :  { %5847 = vmatprep.subr.mxu1 %v6372_v26 }
 0xbc8   :  { %5848 = vmatpush3.msra.mxu1 %v2386_v3 }
 0xbc9   :  { %5863 = vmatprep.subr.mxu1 %v6372_v26 }
 0xc81   :  { %v2301_v9 = vpop.f32.mrf.mxu1 }
 0xc82   :  { %v6935_v10 = vadd.f32 %v4958_v8, %v2301_v9 }
 0xc83   :  { %v5829_v12 = vpop.f32.mrf.mxu1 }
 0xc84   :  { %5850 = vmatmul.mubr.msk.f32.vlgmr.msra.gmra.mxu1 %vm338_vm1, %v6935_v10  ;;  %v2312_v13 = vmul.f32 %v6935_v10, %v6935_v10 }
 0xc85   :  { %5864 = vmatpush3.msra.mxu1 %v4970_v11  ;;  %5871 = vmatprep.mubr.msk.f32.mxu1 %vm6373_vm2, %v6372_v26 }
 0xc86   :  { %5865 = vmatprep.subr.mxu1 %v6372_v26  ;;  %5839 = vmatmul.mubr.msk.f32.vlgmr.msra.gmra.mxu0 %vm338_vm1, %v2312_v13  ;;  %v2988_v13 = vld [vmem:[%s7351_s12 + $0x8] sm:$0xff] }
 0xc87   :  { %5853 = vmatpush3.msra.mxu0 %v4965_v14  ;;  %5866 = vmatpush3.msra.mxu1 %v4969_v15  ;;  %v2987_v14 = vld [vmem:[%s7351_s12] sm:$0xff] }
 0xc88   :  { %5854 = vmatprep.subr.mxu0 %v6372_v26  ;;  %5867 = vmatprep.subr.mxu1 %v6372_v26 }
 0xc89   :  { %5855 = vmatpush3.msra.mxu0 %v4964_v16  ;;  %5868 = vmatpush3.msra.mxu1 %v4968_v17 }
 0xc8a   :  { %5856 = vmatprep.subr.mxu0 %v6372_v26  ;;  %5869 = vmatprep.subr.mxu1 %v6372_v26 }
 0xc8b   :  { %5857 = vmatpush3.msra.mxu0 %v4963_v18  ;;  %5870 = vmatpush3.msra.mxu1 %v4967_v21 }
 0xc8c   :  { %5858 = vmatprep.subr.mxu0 %v6372_v26  ;;  %5872 = vmatmul.mubr.msk.f32.vlgmr.msra.gmra.mxu1 %vm338_vm1, %v6935_v10 }
 0xc8d   :  { %5859 = vmatpush3.msra.mxu0 %v4962_v22  ;;  %5860 = vmatprep.mubr.msk.f32.mxu0 %vm6373_vm2, %v6372_v26 }
 0xc8e   :  { %5861 = vmatmul.mubr.msk.f32.vlgmr.msra.gmra.mxu0 %vm338_vm1, %v6935_v10  ;;  %5874 = vmatprep.subr.mxu0 %v6372_v26 }
 0xc8f   :  { %5876 = vmatprep.mubr.msk.f32.mxu0 %vm6373_vm2, %v6372_v26  ;;  %5879 = vmatprep.subr.mxu1 %v6372_v26 }
 0xc90   :  { %5881 = vmatprep.mubr.msk.f32.mxu1 %vm6373_vm2, %v6372_v26  ;;  %5875 = vmatpush3.msk.msra.mxu0 %vm1971_vm3, %v2309_v23 }
 0xc91   :  { %5880 = vmatpush3.msk.msra.mxu1 %vm1971_vm3, %v2309_v23  ;;  %5884 = vmatprep.subr.mxu0 %v6372_v26 }
 0xc92   :  { %5889 = vmatprep.subr.mxu1 %v6372_v26 }
 0xd44   :  { %v2459_v27 = vpop.f32.mrf.mxu1 }
 0xd45   :  { %v2463_v29 = vmul.f32 2.0, %v2459_v27  ;;  %v4980_v27 = vld [vmem:[%s7352_s15] ss:$0 sm:$0xff] }
 0xd46   :  { %v2382_v24 = vpop.f32.mrf.mxu0  ;;  %v5851_v25 = vpop.f32.mrf.mxu1 }
 0xd47   :  { %v2464_v35 = vsub.f32 %v2382_v24, %v2463_v29 }
 0xd48   :  { %v5840_v28 = vpop.f32.mrf.mxu0 }
 0xd49   :  { %v2469_v43 = vadd.f32 %v2467_v38, %v2464_v35  ;;  %v4986_v28 = vld [vmem:[%s7351_s12 + $0x18] sm:$0xff]  ;;  %v4995_v38 = vld [vmem:[%s7351_s12 + $0x28] sm:$0xff] }
 0xd4c   :  { %v2623_v30 = vpop.f32.mrf.mxu1 }
 0xd4d   :  { %v2627_v31 = vmul.f32 2.0, %v2623_v30  ;;  %v4985_v30 = vld [vmem:[%s7351_s12 + $0x10] sm:$0xff] }
 0xd4e   :  { %v2541_v32 = vpop.f32.mrf.mxu0  ;;  %v5873_v33 = vpop.f32.mrf.mxu1 }
 0xd4f   :  { %v2628_v36 = vsub.f32 %v2382_v24, %v2627_v31  ;;  %v2545_v37 = vmul.f32 2.0, %v2541_v32  ;;  %v4983_v31 = vld [vmem:[%s7353_s16 + $0x10] sm:$0xff]  ;;  %v2985_v32 = vld [vmem:[%s7353_s16] sm:$0xff] }
 0xd50   :  { %v5862_v40 = vpop.f32.mrf.mxu0 }
 0xd51   :  { %v2546_v41 = vsub.f32 %v2382_v24, %v2545_v37  ;;  %v2633_v42 = vadd.f32 %v2631_v34, %v2628_v36  ;;  %v2986_v34 = vld [vmem:[%s7353_s16 + $0x8] sm:$0xff]  ;;  %v4984_v37 = vld [vmem:[%s7353_s16 + $0x18] sm:$0xff]  ;;  %v4994_v40 = vld [vmem:[%s7351_s12 + $0x20] sm:$0xff] }
 0xd53   :  { %v2551_v44 = vadd.f32 %v2549_v39, %v2546_v41  ;;  %vm2635_vm6 = vcmp.le.f32.partialorder %v2469_v43, %v2633_v42  ;;  %v5002_v41 = vld [vmem:[%s7351_s12 + $0x38] sm:$0xff] }
 0xd55   :  { %vm2634_vm5 = vcmp.le.f32.partialorder %v2469_v43, %v2551_v44  ;;  %vm2637_vm7 = vcmp.le.f32.partialorder %v2551_v44, %v2633_v42  ;;  %v5001_v42 = vld [vmem:[%s7351_s12 + $0x30] sm:$0xff]  ;;  %v4992_v43 = vld [vmem:[%s7353_s16 + $0x20] sm:$0xff]  ;;  %v7043_v44 = vld [vmem:[%s6418_s29 + $0x78] sm:$0xff] }
 0xd56   :  { %vm2636_vm8 = vmand %vm2634_vm5, %vm2635_vm6  ;;  %v2638_v46 = vsel %vm2637_vm7, 1, %v6374_v45  ;;  %v4973_v50 = vsel %vm2637_vm7, 1.0, %v6372_v26  ;;  %v7046_v45 = vld [vmem:[%s6418_s29 + $0x70] sm:$0xff] }
 0xd57   :  { %v4972_v47 = vsel %vm2636_vm8, 1.0, %v6372_v26  ;;  %v2639_v48 = vsel %vm2636_vm8, 0, %v2638_v46  ;;  %v7051_v46 = vld [vmem:[%s6418_s29 + $0x68] sm:$0xff] }
 0xd58   :  { %v2643_v49 = vsub.f32 1.0, %v4972_v47  ;;  %5877 = vmatmul.mubr.msk.f32.vlgmr.msra.gmra.mxu0 %vm1967_vm4, %v4972_v47  ;;  %2640 = vst.msk [vmem:[#allocation6] sm:$0xff] %vm1967_vm4, %v2639_v48 }
 0xd59   :  { %5885 = vmatpush3.msk.msra.mxu0 %vm1971_vm3, %v2309_v23  ;;  %5886 = vmatprep.mubr.msk.f32.mxu0 %vm6373_vm2, %v6372_v26 }
 0xd5a   :  { %v2646_v51 = vmul.f32 %v4973_v50, %v2643_v49  ;;  %5900 = vmatprep.subr.mxu0 %v6372_v26  ;;  %v4993_v50 = vld [vmem:[%s7353_s16 + $0x28] sm:$0xff] }
 0xd5c   :  { %v2647_v52 = vsub.f32 %v2643_v49, %v2646_v51  ;;  %5882 = vmatmul.mubr.msk.f32.vlgmr.msra.gmra.mxu1 %vm1967_vm4, %v2646_v51  ;;  %v4999_v51 = vld [vmem:[%s7353_s16 + $0x30] sm:$0xff] }
 0xd5d   :  { %5897 = vmatprep.mubr.msk.f32.mxu1 %vm6373_vm2, %v6372_v26  ;;  %5890 = vmatpush3.msra.mxu1 %v2904_v53 }
 0xd5e   :  { %5887 = vmatmul.mubr.msk.f32.vlgmr.msra.gmra.mxu0 %vm1967_vm4, %v2647_v52  ;;  %5891 = vmatprep.subr.mxu1 %v6372_v26 }
 0xd5f   :  { %5904 = vmatprep.mubr.msk.f32.mxu0 %vm6373_vm2, %v6372_v26  ;;  %5892 = vmatpush3.msra.mxu1 %v2903_v54  ;;  %v5000_v54 = vld [vmem:[%s7353_s16 + $0x38] sm:$0xff] }
 0xd60   :  { %5893 = vmatprep.subr.mxu1 %v6372_v26  ;;  %5901 = vmatpush3.msra.mxu0 %v2988_v13 }
 0xd61   :  { %5894 = vmatpush3.msra.mxu1 %v2902_v55  ;;  %5902 = vmatprep.subr.mxu0 %v6372_v26 }
 0xd62   :  { %5895 = vmatprep.subr.mxu1 %v6372_v26  ;;  %5903 = vmatpush3.msra.mxu0 %v2987_v14 }
 0xd63   :  { %5896 = vmatpush3.msra.mxu1 %v2901_v56  ;;  %5907 = vmatprep.subr.mxu0 %v6372_v26  ;;  %v7067_v56 = vld [vmem:[%s6418_s29 + $0x60] sm:$0xff] }
 0xe18   :  { %v2720_v60 = vpop.f32.mrf.mxu0 }
 0xe19   :  { %v2728_v2 = vmul.f32 %v2727_v61, %v2720_v60  ;;  %v7087_v60 = vld [vmem:[%s6418_s29 + $0x40] sm:$0xff]  ;;  %v7092_v61 = vld [vmem:[%s6418_s29 + $0x38] sm:$0xff] }
 0xe1a   :  { %v5878_v63 = vpop.f32.mrf.mxu0 }
 0xe1b   :  { %v7102_v63 = vld [vmem:[%s6418_s29 + $0x28] sm:$0xff] }
 0xe1c   :  { %v2798_v1 = vpop.f32.mrf.mxu1 }
 0xe1d   :  { %v2806_v3 = vmul.f32 %v2805_v62, %v2798_v1  ;;  %v7097_v62 = vld [vmem:[%s6418_s29 + $0x30] sm:$0xff]  ;;  %v7112_v1 = vld [vmem:[%s6418_s29 + $0x18] sm:$0xff] }
 0xe1e   :  { %v5883_v4 = vpop.f32.mrf.mxu1  ;;  %v2877_v5 = vpop.f32.mrf.mxu0 }
 0xe1f   :  { %v2807_v6 = vadd.f32 %v2806_v3, %v2728_v2  ;;  %v2885_v7 = vmul.f32 %v2884_v0, %v2877_v5  ;;  %v7107_v0 = vld [vmem:[%s6418_s29 + $0x20] sm:$0xff]  ;;  %v7117_v2 = vld [vmem:[%s6418_s29 + $0x10] sm:$0xff]  ;;  %v7120_v3 = vld [vmem:[%s6418_s29 + $0x8] sm:$0xff] }
 0xe20   :  { %v5888_v8 = vpop.f32.mrf.mxu0  ;;  %v7125_v4 = vld [vmem:[%s6418_s29] sm:$0xff]  ;;  %s7355_s29 = sld [smem:[#allocation25_spill]] }
 0xe21   :  { %v2886_v9 = vadd.f32 %v2885_v7, %v2807_v6 }
 0xe23   :  { %5898 = vmatmul.mubr.msk.f32.vlgmr.msra.gmra.mxu1 %vm338_vm1, %v2886_v9  ;;  %v2887_v19 = vsub.f32 %v6935_v10, %v2886_v9 }
 0xe24   :  { %5916 = vmatprep.mubr.msk.f32.mxu1 %vm3138_vm10, %v4983_v31 }
 0xe25   :  { %v2888_v11 = vmul.f32 %v2887_v19, %v2887_v19 }
 0xe27   :  { %v2889_v12 = vsel %vm338_vm1, %v2888_v11, 0.0 }
 0xe28   :  { %2890 = vadd.xlane.f32.xlu0 %v2889_v12 }
 0xeb1   :  { %v2891_v15 = vpop.xlane.xlu0 %2890 }
 0xeb2   :  { %v2892_v16 = vrot.slane %v2891_v15, 4 }
 0xeb4   :  { %v2893_v17 = vadd.f32 %v2892_v16, %v2891_v15  ;;  %v5006_v15 = vld [vmem:[%s7354_s18] ss:$0 sm:$0xff] }
 0xeb6   :  { %v2894_v18 = vrot.slane %v2893_v17, 2 }
 0xeb8   :  { %v2895_v10 = vadd.f32 %v2894_v18, %v2893_v17 }
 0xeba   :  { %v2896_v21 = vrot.slane %v2895_v10, 1 }
 0xebc   :  { %v2897_v22 = vadd.f32 %v2896_v21, %v2895_v10 }
 0xebe   :  { %v2898_v23 = vmul.f32 0.0046875, %v2897_v22 }
 0xec0   :  { %2900 = vst.msk [vmem:[#allocation4] sm:$0x1] %vm2899_vm9, %v2898_v23 }
 0xee3   :  { %v2981_v24 = vpop.f32.mrf.mxu1 }
 0xee4   :  { %v2982_v25 = vadd.f32 %v4980_v27, %v2981_v24 }
 0xee5   :  { %v5899_v29 = vpop.f32.mrf.mxu1 }
 0xee6   :  { %5905 = vmatmul.mubr.msk.f32.vlgmr.msra.gmra.mxu0 %vm149_vm0, %v2982_v25  ;;  %v3645_v29 = vld [vmem:[%s6423_s3 + $0x8] sm:$0xff] }
 0xee7   :  { %5908 = vmatpush3.msra.mxu0 %v4986_v28  ;;  %5911 = vmatprep.mubr.msk.f32.mxu0 %vm6373_vm2, %v6372_v26 }
 0xee8   :  { %5909 = vmatprep.subr.mxu0 %v6372_v26 }
 0xee9   :  { %5910 = vmatpush3.msra.mxu0 %v4985_v30  ;;  %v3644_v30 = vld [vmem:[%s6423_s3] sm:$0xff]  ;;  %s7356_s3 = sld [smem:[#allocation22_spill]] }
 0xeea   :  { %5912 = vmatmul.mubr.msk.f32.vlgmr.msra.gmra.mxu0 %vm149_vm0, %v2982_v25 }
 0xeeb   :  { %5921 = vmatprep.mubr.msk.f32.mxu0 %vm3138_vm10, %v2985_v32 }
 0xfa6   :  { %v3058_v33 = vpop.f32.mrf.mxu0 }
 0xfa7   :  { %5919 = vmatprep.subr.mxu0 %v3058_v33 }
 0xfa8   :  { %v5906_v35 = vpop.f32.mrf.mxu0  ;;  %5920 = vmatpush3.msra.mxu0 %v3058_v33 }
 0xfa9   :  { %5922 = vmatmul.mubr.msk.f32.vlgmr.msra.gmra.mxu0 %vm3138_vm10, %v2986_v34 }
 0xfaa   :  { %v3134_v36 = vpop.f32.mrf.mxu0  ;;  %5933 = vmatprep.mubr.msk.f32.mxu0 %vm3138_vm10, %v4992_v43 }
 0xfab   :  { %5914 = vmatprep.subr.mxu1 %v3134_v36 }
 0xfac   :  { %v5913_v39 = vpop.f32.mrf.mxu0  ;;  %5915 = vmatpush3.msra.mxu1 %v3134_v36 }
 0xfad   :  { %5917 = vmatmul.mubr.msk.f32.vlgmr.msra.gmra.mxu1 %vm3138_vm10, %v4984_v37  ;;  %5924 = vmatprep.subr.mxu1 %v6372_v26 }
 0xfae   :  { %5925 = vmatpush3.msra.mxu1 %v4995_v38  ;;  %5928 = vmatprep.mubr.msk.f32.mxu1 %vm6373_vm2, %v6372_v26 }
 0xfaf   :  { %5926 = vmatprep.subr.mxu1 %v6372_v26 }
 0xfb0   :  { %5927 = vmatpush3.msra.mxu1 %v4994_v40 }
 0xfb1   :  { %5929 = vmatmul.mubr.msk.f32.vlgmr.msra.gmra.mxu1 %vm149_vm0, %v2982_v25  ;;  %5936 = vmatprep.subr.mxu1 %v6372_v26 }
 0xfb2   :  { %5937 = vmatpush3.msra.mxu1 %v5002_v41  ;;  %5940 = vmatprep.mubr.msk.f32.mxu1 %vm6373_vm2, %v6372_v26 }
 0xfb3   :  { %5938 = vmatprep.subr.mxu1 %v6372_v26 }
 0xfb4   :  { %5939 = vmatpush3.msra.mxu1 %v5001_v42 }
 0xfb5   :  { %5941 = vmatmul.mubr.msk.f32.vlgmr.msra.gmra.mxu1 %vm149_vm0, %v2982_v25  ;;  %5948 = vmatprep.subr.mxu1 %v6372_v26 }
 0xfb6   :  { %5980 = vmatprep.mubr.msk.f32.mxu1 %vm6373_vm2, %v6372_v26  ;;  %5949 = vmatpush3.msra.mxu1 %v7043_v44 }
 0xfb7   :  { %5950 = vmatprep.subr.mxu1 %v6372_v26 }
 0xfb8   :  { %5951 = vmatpush3.msra.mxu1 %v7046_v45 }
 0xfb9   :  { %5952 = vmatprep.subr.mxu1 %v6372_v26 }
 0xfba   :  { %5953 = vmatpush3.msra.mxu1 %v7051_v46 }
 0xfbb   :  { %5954 = vmatprep.subr.mxu1 %v6372_v26 }
 0xfbc   :  { %5955 = vmatpush3.msra.mxu1 %v7067_v56 }
 0xfbd   :  { %5956 = vmatprep.subr.mxu1 %v6372_v26 }
 0xfbe   :  { %5957 = vmatpush3.msra.mxu1 %v7072_v57 }
 0xfbf   :  { %5958 = vmatprep.subr.mxu1 %v6372_v26 }
 0xfc0   :  { %5959 = vmatpush3.msra.mxu1 %v7077_v58 }
 0xfc1   :  { %5960 = vmatprep.subr.mxu1 %v6372_v26 }
 0xfc2   :  { %5961 = vmatpush3.msra.mxu1 %v7082_v59 }
 0xfc3   :  { %5962 = vmatprep.subr.mxu1 %v6372_v26 }
 0xfc4   :  { %5963 = vmatpush3.msra.mxu1 %v7087_v60 }
 0xfc5   :  { %5964 = vmatprep.subr.mxu1 %v6372_v26 }
 0xfc6   :  { %5965 = vmatpush3.msra.mxu1 %v7092_v61 }
 0xfc7   :  { %5966 = vmatprep.subr.mxu1 %v6372_v26 }
 0xfc8   :  { %5967 = vmatpush3.msra.mxu1 %v7097_v62 }
 0xfc9   :  { %5968 = vmatprep.subr.mxu1 %v6372_v26 }
 0xfca   :  { %5969 = vmatpush3.msra.mxu1 %v7102_v63 }
 0xfcb   :  { %5970 = vmatprep.subr.mxu1 %v6372_v26 }
 0xfcc   :  { %5971 = vmatpush3.msra.mxu1 %v7107_v0 }
 0xfcd   :  { %5972 = vmatprep.subr.mxu1 %v6372_v26 }
 0xfce   :  { %5973 = vmatpush3.msra.mxu1 %v7112_v1 }
 0xfcf   :  { %5974 = vmatprep.subr.mxu1 %v6372_v26 }
 0xfd0   :  { %5975 = vmatpush3.msra.mxu1 %v7117_v2 }
 0xfd1   :  { %5976 = vmatprep.subr.mxu1 %v6372_v26 }
 0xfd2   :  { %5977 = vmatpush3.msra.mxu1 %v7120_v3 }
 0xfd3   :  { %5978 = vmatprep.subr.mxu1 %v6372_v26 }
 0xfd4   :  { %5979 = vmatpush3.msra.mxu1 %v7125_v4 }
 0xfd5   :  { %6025 = vmatprep.subr.mxu1 %v6372_v26 }
0x1069   :  { %v5923_v5 = vpop.f32.mrf.mxu0 }
0x106b   :  { %v3292_v6 = vpop.f32.mrf.mxu0 }
0x106d   :  { %v5918_v47 = vpop.f32.mrf.mxu1 }
0x106e   :  { %v3298_v8 = vadd.f32 %v5923_v5, %v5918_v47  ;;  %v3996_v47 = vld [vmem:[%s7355_s29 + $0x78] sm:$0xff] }
0x106f   :  { %v3211_v48 = vpop.f32.mrf.mxu1  ;;  %v3992_v5 = vld [vmem:[%s7355_s29 + $0x58] sm:$0xff] }
0x1070   :  { %v3293_v19 = vadd.f32 %v3292_v6, %v3211_v48  ;;  %v5029_v48 = vld [vmem:[%s7355_s29 + $0xf8] sm:$0xff]  ;;  %v3991_v6 = vld [vmem:[%s7355_s29 + $0x50] sm:$0xff] }
0x1071   :  { %v3373_v49 = vpop.f32.mrf.mxu1 }
0x1072   :  { %5931 = vmatprep.subr.mxu0 %v3373_v49 }
0x1073   :  { %v5930_v52 = vpop.f32.mrf.mxu1  ;;  %5932 = vmatpush3.msra.mxu0 %v3373_v49  ;;  %v5028_v49 = vld [vmem:[%s7355_s29 + $0xf0] sm:$0xff] }
0x1074   :  { %5934 = vmatmul.mubr.msk.f32.vlgmr.msra.gmra.mxu0 %vm3138_vm10, %v4993_v50  ;;  %v5027_v50 = vld [vmem:[%s7355_s29 + $0xe8] sm:$0xff]  ;;  %v5025_v52 = vld [vmem:[%s7355_s29 + $0xd8] sm:$0xff] }
0x1075   :  { %v3532_v53 = vpop.f32.mrf.mxu1  ;;  %5945 = vmatprep.mubr.msk.f32.mxu0 %vm3138_vm10, %v4999_v51  ;;  %v5026_v51 = vld [vmem:[%s7355_s29 + $0xe0] sm:$0xff] }
0x1076   :  { %5943 = vmatprep.subr.mxu0 %v3532_v53 }
0x1077   :  { %v5942_v55 = vpop.f32.mrf.mxu1  ;;  %5944 = vmatpush3.msra.mxu0 %v3532_v53  ;;  %v5024_v53 = vld [vmem:[%s7355_s29 + $0xd0] sm:$0xff] }
0x1078   :  { %5946 = vmatmul.mubr.msk.f32.vlgmr.msra.gmra.mxu0 %vm3138_vm10, %v5000_v54  ;;  %5983 = vmatprep.subr.mxu0 %v6372_v26  ;;  %v5023_v54 = vld [vmem:[%s7355_s29 + $0xc8] sm:$0xff]  ;;  %v5022_v55 = vld [vmem:[%s7355_s29 + $0xc0] sm:$0xff] }
0x1079   :  { %5987 = vmatprep.mubr.msk.f32.mxu0 %vm6373_vm2, %v6372_v26  ;;  %5984 = vmatpush3.msra.mxu0 %v3645_v29 }
0x107a   :  { %5985 = vmatprep.subr.mxu0 %v6372_v26 }
0x107b   :  { %5986 = vmatpush3.msra.mxu0 %v3644_v30 }
0x107c   :  { %5990 = vmatprep.subr.mxu0 %v6372_v26 }
0x1134   :  { %v5935_v7 = vpop.f32.mrf.mxu0 }
0x1135   :  { %v3459_v11 = vadd.f32 %v5935_v7, %v3298_v8  ;;  %v3990_v7 = vld [vmem:[%s7355_s29 + $0x48] sm:$0xff]  ;;  %v3989_v8 = vld [vmem:[%s7355_s29 + $0x40] sm:$0xff] }
0x1136   :  { %v3449_v9 = vpop.f32.mrf.mxu0 }
0x1137   :  { %v3458_v13 = vadd.f32 %v3449_v9, %v3293_v19  ;;  %v3988_v9 = vld [vmem:[%s7355_s29 + $0x38] sm:$0xff]  ;;  %v3987_v19 = vld [vmem:[%s7355_s29 + $0x30] sm:$0xff] }
0x1138   :  { %v5947_v12 = vpop.f32.mrf.mxu0 }
0x1139   :  { %v3618_v14 = vadd.f32 %v5947_v12, %v3459_v11  ;;  %v3986_v11 = vld [vmem:[%s7355_s29 + $0x28] sm:$0xff]  ;;  %v3985_v12 = vld [vmem:[%s7355_s29 + $0x20] sm:$0xff] }
0x113a   :  { %v3608_v16 = vpop.f32.mrf.mxu0 }
0x113b   :  { %v3617_v17 = vadd.f32 %v3608_v16, %v3458_v13  ;;  %v3627_v18 = vadd.f32 %v5006_v15, %v3618_v14  ;;  %v5018_v13 = vld [vmem:[%s7355_s29 + $0xa0] sm:$0xff]  ;;  %v3984_v14 = vld [vmem:[%s7355_s29 + $0x18] sm:$0xff]  ;;  %v3983_v16 = vld [vmem:[%s7355_s29 + $0x10] sm:$0xff] }
0x113d   :  { %v3626_v10 = vadd.f32 %v5006_v15, %v3617_v17  ;;  %v5017_v15 = vld [vmem:[%s7355_s29 + $0x98] sm:$0xff]  ;;  %v5016_v17 = vld [vmem:[%s7355_s29 + $0x90] sm:$0xff] }
0x113f   :  { %v3646_v21 = vadd.f32 %v3627_v18, %v3626_v10 }
0x1141   :  { %v3647_v22 = vrot.slane %v3646_v21, 4 }
0x1143   :  { %v3648_v23 = vadd.f32 %v3647_v22, %v3646_v21  ;;  %v3981_v21 = vld [vmem:[%s7355_s29] sm:$0xff] }
0x1144   :  { %v5014_v22 = vld [vmem:[%s7355_s29 + $0x80] sm:$0xff] }
0x1145   :  { %v3649_v27 = vrot.slane %v3648_v23, 2 }
0x1147   :  { %v3650_v24 = vadd.f32 %v3649_v27, %v3648_v23 }
0x1149   :  { %v3651_v25 = vrot.slane %v3650_v24, 1 }
0x114b   :  { %v3652_v28 = vadd.f32 %v3651_v25, %v3650_v24  ;;  %v5009_v24 = vld [vmem:[%s7357_s22] ss:$0 sm:$0xff] }
0x114d   :  { %5981 = vmatmul.mubr.f32.vlgmr.msra.gmra.mxu1 %v3652_v28 }
0x114e   :  { %6029 = vmatprep.mubr.msk.f32.mxu1 %vm6373_vm2, %v6372_v26  ;;  %6026 = vmatpush3.msra.mxu1 %v3645_v29 }
0x114f   :  { %6027 = vmatprep.subr.mxu1 %v6372_v26 }
0x1150   :  { %6028 = vmatpush3.msra.mxu1 %v3644_v30 }
0x1151   :  { %6032 = vmatprep.subr.mxu1 %v3996_v47 }
0x120d   :  { %v3719_v31 = vpop.f32.mrf.mxu1 }
0x120e   :  { %v3723_v32 = vmul.f32 0.0078125, %v3719_v31 }
0x120f   :  { %v5982_v33 = vpop.f32.mrf.mxu1 }
0x1210   :  { %5988 = vmatmul.mubr.msk.f32.vlgmr.msra.gmra.mxu0 %vm149_vm0, %v3723_v32 }
0x1211   :  { %5991 = vmatpush3.msra.mxu0 %v7043_v44  ;;  %6022 = vmatprep.mubr.msk.f32.mxu0 %vm6373_vm2, %v6372_v26 }
0x1212   :  { %5992 = vmatprep.subr.mxu0 %v6372_v26 }
0x1213   :  { %5993 = vmatpush3.msra.mxu0 %v7046_v45 }
0x1214   :  { %5994 = vmatprep.subr.mxu0 %v6372_v26 }
0x1215   :  { %5995 = vmatpush3.msra.mxu0 %v7051_v46 }
0x1216   :  { %5996 = vmatprep.subr.mxu0 %v6372_v26 }
0x1217   :  { %5997 = vmatpush3.msra.mxu0 %v7067_v56  ;;  %v5021_v56 = vld [vmem:[%s7355_s29 + $0xb8] sm:$0xff] }
0x1218   :  { %5998 = vmatprep.subr.mxu0 %v6372_v26 }
0x1219   :  { %5999 = vmatpush3.msra.mxu0 %v7072_v57  ;;  %v5020_v57 = vld [vmem:[%s7355_s29 + $0xb0] sm:$0xff] }
0x121a   :  { %6000 = vmatprep.subr.mxu0 %v6372_v26 }
0x121b   :  { %6001 = vmatpush3.msra.mxu0 %v7077_v58  ;;  %v5019_v58 = vld [vmem:[%s7355_s29 + $0xa8] sm:$0xff] }
0x121c   :  { %6002 = vmatprep.subr.mxu0 %v6372_v26 }
0x121d   :  { %6003 = vmatpush3.msra.mxu0 %v7082_v59 }
0x121e   :  { %6004 = vmatprep.subr.mxu0 %v6372_v26 }
0x121f   :  { %6005 = vmatpush3.msra.mxu0 %v7087_v60 }
0x1220   :  { %6006 = vmatprep.subr.mxu0 %v6372_v26 }
0x1221   :  { %6007 = vmatpush3.msra.mxu0 %v7092_v61 }
0x1222   :  { %6008 = vmatprep.subr.mxu0 %v6372_v26 }
0x1223   :  { %6009 = vmatpush3.msra.mxu0 %v7097_v62 }
0x1224   :  { %6010 = vmatprep.subr.mxu0 %v6372_v26 }
0x1225   :  { %6011 = vmatpush3.msra.mxu0 %v7102_v63  ;;  %v3883_v63 = vld [vmem:[%s7356_s3] sm:$0x1] }
0x1226   :  { %6012 = vmatprep.subr.mxu0 %v6372_v26 }
0x1227   :  { %6013 = vmatpush3.msra.mxu0 %v7107_v0 }
0x1228   :  { %6014 = vmatprep.subr.mxu0 %v6372_v26 }
0x1229   :  { %6015 = vmatpush3.msra.mxu0 %v7112_v1 }
0x122a   :  { %6016 = vmatprep.subr.mxu0 %v6372_v26 }
0x122b   :  { %6017 = vmatpush3.msra.mxu0 %v7117_v2  ;;  %v3995_v2 = vld [vmem:[%s7355_s29 + $0x70] sm:$0xff] }
0x122c   :  { %6018 = vmatprep.subr.mxu0 %v6372_v26 }
0x122d   :  { %6019 = vmatpush3.msra.mxu0 %v7120_v3  ;;  %v3994_v3 = vld [vmem:[%s7355_s29 + $0x68] sm:$0xff] }
0x122e   :  { %6020 = vmatprep.subr.mxu0 %v6372_v26 }
0x122f   :  { %6021 = vmatpush3.msra.mxu0 %v7125_v4  ;;  %v3993_v4 = vld [vmem:[%s7355_s29 + $0x60] sm:$0xff] }
0x1230   :  { %6067 = vmatprep.subr.mxu0 %v5029_v48 }
0x12d0   :  { %v3793_v34 = vpop.f32.mrf.mxu0 }
0x12d1   :  { %v3800_v35 = vrot.slane %v3793_v34, %v6756_v20  ;;  %v3977_v34 = vld [vmem:[%s7358_s23] sm:$0xff] }
0x12d2   :  { %v5989_v36 = vpop.f32.mrf.mxu0 }
0x12d3   :  { %v7174_v37 = vsub.f32 %v3626_v10, %v3800_v35  ;;  %v7176_v38 = vsub.f32 %v3627_v18, %v3800_v35  ;;  %v3982_v18 = vld [vmem:[%s7355_s29 + $0x8] sm:$0xff] }
0x12d4   :  { %v5015_v10 = vld [vmem:[%s7355_s29 + $0x88] sm:$0xff] }
0x12d5   :  { %v3803_v39 = vmul.f32 %v7174_v37, %v7174_v37  ;;  %v3804_v40 = vmul.f32 %v7176_v38, %v7176_v38 }
0x12d7   :  { %v3805_v26 = vadd.f32 %v3804_v40, %v3803_v39  ;;  %v5011_v39 = vld [vmem:[%s7358_s23 + $0x28] sm:$0xff] }
0x12d8   :  { %v3978_v40 = vld [vmem:[%s7358_s23 + $0x8] sm:$0xff] }
0x12d9   :  { %v3806_v41 = vrot.slane %v3805_v26, 4 }
0x12db   :  { %v3807_v42 = vadd.f32 %v3806_v41, %v3805_v26  ;;  %v5057_v26 = vld [vmem:[%s7355_s29 + $0x178] sm:$0xff]  ;;  %v5012_v41 = vld [vmem:[%s7358_s23 + $0x30] sm:$0xff] }
0x12dd   :  { %v3808_v43 = vrot.slane %v3807_v42, 2 }
0x12df   :  { %v3809_v44 = vadd.f32 %v3808_v43, %v3807_v42  ;;  %v3979_v42 = vld [vmem:[%s7358_s23 + $0x10] sm:$0xff] }
0x12e0   :  { %v5056_v43 = vld [vmem:[%s7355_s29 + $0x170] sm:$0xff] }
0x12e1   :  { %v3810_v45 = vrot.slane %v3809_v44, 1 }
0x12e3   :  { %v3811_v46 = vadd.f32 %v3810_v45, %v3809_v44  ;;  %v3980_v44 = vld [vmem:[%s7358_s23 + $0x18] sm:$0xff] }
0x12e4   :  { %v5013_v45 = vld [vmem:[%s7358_s23 + $0x38] sm:$0xff] }
0x12e5   :  { %6023 = vmatmul.mubr.f32.vlgmr.msra.gmra.mxu0 %v3811_v46  ;;  %v5055_v46 = vld [vmem:[%s7355_s29 + $0x168] sm:$0xff] }
0x12e6   :  { %6068 = vmatpush3.msra.mxu0 %v5029_v48  ;;  %v5053_v48 = vld [vmem:[%s7355_s29 + $0x158] sm:$0xff] }
0x12e7   :  { %6069 = vmatprep.subr.mxu0 %v5028_v49 }
0x12e8   :  { %6070 = vmatpush3.msra.mxu0 %v5028_v49  ;;  %v5052_v49 = vld [vmem:[%s7355_s29 + $0x150] sm:$0xff] }
0x12e9   :  { %6071 = vmatprep.subr.mxu0 %v5027_v50 }
0x12ea   :  { %6072 = vmatpush3.msra.mxu0 %v5027_v50  ;;  %v5051_v50 = vld [vmem:[%s7355_s29 + $0x148] sm:$0xff] }
0x12eb   :  { %6073 = vmatprep.subr.mxu0 %v5026_v51 }
0x12ec   :  { %6074 = vmatpush3.msra.mxu0 %v5026_v51  ;;  %v5050_v51 = vld [vmem:[%s7355_s29 + $0x140] sm:$0xff] }
0x12ed   :  { %6075 = vmatprep.subr.mxu0 %v5025_v52 }
0x12ee   :  { %6076 = vmatpush3.msra.mxu0 %v5025_v52  ;;  %v5049_v52 = vld [vmem:[%s7355_s29 + $0x138] sm:$0xff] }
0x12ef   :  { %6077 = vmatprep.subr.mxu0 %v5024_v53 }
0x12f0   :  { %6078 = vmatpush3.msra.mxu0 %v5024_v53  ;;  %v5048_v53 = vld [vmem:[%s7355_s29 + $0x130] sm:$0xff] }
0x12f1   :  { %6079 = vmatprep.subr.mxu0 %v5023_v54 }
0x12f2   :  { %6080 = vmatpush3.msra.mxu0 %v5023_v54  ;;  %v5047_v54 = vld [vmem:[%s7355_s29 + $0x128] sm:$0xff] }
0x12f3   :  { %6081 = vmatprep.subr.mxu0 %v5022_v55 }
0x12f4   :  { %6082 = vmatpush3.msra.mxu0 %v5022_v55  ;;  %v5046_v55 = vld [vmem:[%s7355_s29 + $0x120] sm:$0xff] }
0x12f5   :  { %6083 = vmatprep.subr.mxu0 %v5021_v56 }
0x12f6   :  { %6084 = vmatpush3.msra.mxu0 %v5021_v56  ;;  %v5045_v56 = vld [vmem:[%s7355_s29 + $0x118] sm:$0xff] }
0x12f7   :  { %6085 = vmatprep.subr.mxu0 %v5020_v57 }
0x12f8   :  { %6086 = vmatpush3.msra.mxu0 %v5020_v57  ;;  %v5044_v57 = vld [vmem:[%s7355_s29 + $0x110] sm:$0xff] }
0x12f9   :  { %6087 = vmatprep.subr.mxu0 %v5019_v58 }
0x12fa   :  { %6088 = vmatpush3.msra.mxu0 %v5019_v58  ;;  %v5043_v58 = vld [vmem:[%s7355_s29 + $0x108] sm:$0xff] }
0x12fb   :  { %6089 = vmatprep.subr.mxu0 %v5018_v13 }
0x12fc   :  { %6090 = vmatpush3.msra.mxu0 %v5018_v13  ;;  %v5041_v13 = vld [vmem:[%s7358_s23 + $0x58] sm:$0xff] }
0x12fd   :  { %6091 = vmatprep.subr.mxu0 %v5017_v15 }
0x12fe   :  { %6092 = vmatpush3.msra.mxu0 %v5017_v15  ;;  %v5078_v15 = vld [vmem:[%s7355_s29 + $0x1e0] sm:$0xff] }
0x12ff   :  { %6093 = vmatprep.subr.mxu0 %v5016_v17 }
0x1300   :  { %6094 = vmatpush3.msra.mxu0 %v5016_v17  ;;  %v5076_v17 = vld [vmem:[%s7355_s29 + $0x1d0] sm:$0xff] }
0x1301   :  { %6095 = vmatprep.subr.mxu0 %v5015_v10 }
0x1302   :  { %6096 = vmatpush3.msra.mxu0 %v5015_v10  ;;  %v5074_v10 = vld [vmem:[%s7355_s29 + $0x1c0] sm:$0xff] }
0x1303   :  { %6097 = vmatprep.subr.mxu0 %v5014_v22 }
0x1304   :  { %6098 = vmatpush3.msra.mxu0 %v5014_v22  ;;  %v5072_v22 = vld [vmem:[%s7355_s29 + $0x1b0] sm:$0xff] }
0x13a5   :  { %v3878_v59 = vpop.f32.mrf.mxu0 }
0x13a6   :  { %v3882_v60 = vmul.f32 0.0078125, %v3878_v59  ;;  %v5042_v59 = vld [vmem:[%s7355_s29 + $0x100] sm:$0xff] }
0x13a7   :  { %v6024_v61 = vpop.f32.mrf.mxu0 }
0x13a8   :  { %v3884_v62 = vadd.f32 1e-05, %v3882_v60  ;;  %v5038_v60 = vld [vmem:[%s7358_s23 + $0x40] sm:$0xff] }
0x13aa   :  { %6264 = vrsqrt.f32 %v3884_v62 }
0x13b7   :  { %v6265_v0 = vpop.eup %6264 }
0x13b8   :  { %v3886_v1 = vmul.f32 %v6265_v0, %v3883_v63 }
0x13ba   :  { %6030 = vmatmul.mubr.msk.f32.vlgmr.msra.gmra.mxu1 %vm149_vm0, %v3886_v1 }
0x13bb   :  { %6033 = vmatpush3.msra.mxu1 %v3996_v47  ;;  %v5054_v47 = vld [vmem:[%s7355_s29 + $0x160] sm:$0xff] }
0x13bc   :  { %6034 = vmatprep.subr.mxu1 %v3995_v2 }
0x13bd   :  { %6035 = vmatpush3.msra.mxu1 %v3995_v2 }
0x13be   :  { %6036 = vmatprep.subr.mxu1 %v3994_v3 }
0x13bf   :  { %6037 = vmatpush3.msra.mxu1 %v3994_v3 }
0x13c0   :  { %6038 = vmatprep.subr.mxu1 %v3993_v4 }
0x13c1   :  { %6039 = vmatpush3.msra.mxu1 %v3993_v4 }
0x13c2   :  { %6040 = vmatprep.subr.mxu1 %v3992_v5 }
0x13c3   :  { %6041 = vmatpush3.msra.mxu1 %v3992_v5 }
0x13c4   :  { %6042 = vmatprep.subr.mxu1 %v3991_v6 }
0x13c5   :  { %6043 = vmatpush3.msra.mxu1 %v3991_v6 }
0x13c6   :  { %6044 = vmatprep.subr.mxu1 %v3990_v7 }
0x13c7   :  { %6045 = vmatpush3.msra.mxu1 %v3990_v7 }
0x13c8   :  { %6046 = vmatprep.subr.mxu1 %v3989_v8 }
0x13c9   :  { %6047 = vmatpush3.msra.mxu1 %v3989_v8 }
0x13ca   :  { %6048 = vmatprep.subr.mxu1 %v3988_v9 }
0x13cb   :  { %6049 = vmatpush3.msra.mxu1 %v3988_v9  ;;  %v5039_v9 = vld [vmem:[%s7358_s23 + $0x48] sm:$0xff] }
0x13cc   :  { %6050 = vmatprep.subr.mxu1 %v3987_v19 }
0x13cd   :  { %6051 = vmatpush3.msra.mxu1 %v3987_v19  ;;  %v5081_v19 = vld [vmem:[%s7355_s29 + $0x1f8] sm:$0xff] }
0x13ce   :  { %6052 = vmatprep.subr.mxu1 %v3986_v11 }
0x13cf   :  { %6053 = vmatpush3.msra.mxu1 %v3986_v11  ;;  %v5040_v11 = vld [vmem:[%s7358_s23 + $0x50] sm:$0xff] }
0x13d0   :  { %6054 = vmatprep.subr.mxu1 %v3985_v12 }
0x13d1   :  { %6055 = vmatpush3.msra.mxu1 %v3985_v12  ;;  %v5080_v12 = vld [vmem:[%s7355_s29 + $0x1f0] sm:$0xff] }
0x13d2   :  { %6056 = vmatprep.subr.mxu1 %v3984_v14 }
0x13d3   :  { %6057 = vmatpush3.msra.mxu1 %v3984_v14  ;;  %v5079_v14 = vld [vmem:[%s7355_s29 + $0x1e8] sm:$0xff] }
0x13d4   :  { %6058 = vmatprep.subr.mxu1 %v3983_v16 }
0x13d5   :  { %6059 = vmatpush3.msra.mxu1 %v3983_v16  ;;  %v5077_v16 = vld [vmem:[%s7355_s29 + $0x1d8] sm:$0xff] }
0x13d6   :  { %6060 = vmatprep.subr.mxu1 %v3982_v18 }
0x13d7   :  { %6061 = vmatpush3.msra.mxu1 %v3982_v18  ;;  %v5075_v18 = vld [vmem:[%s7355_s29 + $0x1c8] sm:$0xff] }
0x13d8   :  { %6062 = vmatprep.subr.mxu1 %v3981_v21 }
0x13d9   :  { %6063 = vmatpush3.msra.mxu1 %v3981_v21  ;;  %v5073_v21 = vld [vmem:[%s7355_s29 + $0x1b8] sm:$0xff] }
0x147a   :  { %v3956_v23 = vpop.f32.mrf.mxu1 }
0x147b   :  { %v3963_v27 = vrot.slane %v3956_v23, %v6756_v20  ;;  %v5010_v20 = vld [vmem:[%s7358_s23 + $0x20] sm:$0xff]  ;;  %v5071_v23 = vld [vmem:[%s7355_s29 + $0x1a8] sm:$0xff] }
0x147c   :  { %v6031_v25 = vpop.f32.mrf.mxu1 }
0x147d   :  { %v3964_v28 = vmul.f32 %v3963_v27, %v7174_v37  ;;  %v3965_v29 = vmul.f32 %v3963_v27, %v7176_v38  ;;  %v5070_v27 = vld [vmem:[%s7355_s29 + $0x1a0] sm:$0xff]  ;;  %v5068_v25 = vld [vmem:[%s7355_s29 + $0x190] sm:$0xff] }
0x147f   :  { %v3973_v30 = vadd.f32 %v5009_v24, %v3964_v28  ;;  %v3974_v31 = vadd.f32 %v5009_v24, %v3965_v29  ;;  %v5069_v24 = vld [vmem:[%s7355_s29 + $0x198] sm:$0xff]  ;;  %v5067_v28 = vld [vmem:[%s7355_s29 + $0x188] sm:$0xff]  ;;  %v5066_v29 = vld [vmem:[%s7355_s29 + $0x180] sm:$0xff] }
0x1481   :  { %v7220_v32 = vmax.f32 %v3973_v30, 0.0  ;;  %v7222_v33 = vmax.f32 %v3974_v31, 0.0  ;;  %v5062_v30 = vld [vmem:[%s7358_s23 + $0x60] sm:$0xff] }
0x1483   :  { %6064 = vmatprep.mubr.f32.mxu1 %v7220_v32  ;;  %6099 = vmatprep.mubr.f32.mxu0 %v7220_v32 }
0x1484   :  { %6065 = vmatmul.mubr.f32.vlgmr.msra.gmra.mxu1 %v7222_v33  ;;  %6100 = vmatmul.mubr.f32.vlgmr.msra.gmra.mxu0 %v7222_v33 }
0x1485   :  { %6106 = vmatprep.mubr.msk.f32.mxu1 %vm149_vm0, %v5010_v20  ;;  %6116 = vmatprep.mubr.msk.f32.mxu0 %vm149_vm0, %v3977_v34 }
0x1544   :  { %v6066_v35 = vpop.f32.mrf.mxu1  ;;  %v6101_v36 = vpop.f32.mrf.mxu0 }
0x1545   :  { %6102 = vmatprep.subr.mxu1 %v6101_v36  ;;  %6112 = vmatprep.subr.mxu0 %v6066_v35 }
0x1546   :  { %v4063_v37 = vpop.f32.mrf.mxu1  ;;  %v4160_v38 = vpop.f32.mrf.mxu0  ;;  %6103 = vmatpush3.msra.mxu1 %v6101_v36  ;;  %6113 = vmatpush3.msra.mxu0 %v6066_v35 }
0x1547   :  { %6104 = vmatprep.subr.mxu1 %v4160_v38  ;;  %6114 = vmatprep.subr.mxu0 %v4063_v37 }
0x1548   :  { %6105 = vmatpush3.msra.mxu1 %v4160_v38  ;;  %6115 = vmatpush3.msra.mxu0 %v4063_v37 }
0x1549   :  { %6107 = vmatmul.mubr.msk.f32.vlgmr.msra.gmra.mxu1 %vm149_vm0, %v5011_v39  ;;  %6117 = vmatmul.mubr.msk.f32.vlgmr.msra.gmra.mxu0 %vm149_vm0, %v3978_v40 }
0x154a   :  { %6122 = vmatprep.subr.mxu1 %v5057_v26  ;;  %6109 = vmatprep.mubr.msk.f32.mxu1 %vm149_vm0, %v5012_v41  ;;  %v5063_v41 = vld [vmem:[%s7358_s23 + $0x68] sm:$0xff] }
0x154b   :  { %6123 = vmatpush3.msra.mxu1 %v5057_v26  ;;  %6119 = vmatprep.mubr.msk.f32.mxu0 %vm149_vm0, %v3979_v42  ;;  %v5064_v42 = vld [vmem:[%s7358_s23 + $0x70] sm:$0xff] }
0x154c   :  { %6124 = vmatprep.subr.mxu1 %v5056_v43 }
0x154d   :  { %6125 = vmatpush3.msra.mxu1 %v5056_v43  ;;  %6120 = vmatmul.mubr.msk.f32.gmra.mxu0 %vm149_vm0, %v3980_v44  ;;  %v5065_v43 = vld [vmem:[%s7358_s23 + $0x78] sm:$0xff] }
0x154e   :  { %6110 = vmatmul.mubr.msk.f32.gmra.mxu1 %vm149_vm0, %v5013_v45  ;;  %6126 = vmatprep.subr.mxu1 %v5055_v46 }
0x154f   :  { %6127 = vmatpush3.msra.mxu1 %v5055_v46  ;;  %6154 = vmatprep.mubr.f32.mxu1 %v7220_v32 }
0x1550   :  { %6128 = vmatprep.subr.mxu1 %v5054_v47  ;;  %6161 = vmatprep.mubr.msk.f32.mxu0 %vm149_vm0, %v5038_v60 }
0x1551   :  { %6129 = vmatpush3.msra.mxu1 %v5054_v47 }
0x1552   :  { %6130 = vmatprep.subr.mxu1 %v5053_v48 }
0x1553   :  { %6131 = vmatpush3.msra.mxu1 %v5053_v48 }
0x1554   :  { %6132 = vmatprep.subr.mxu1 %v5052_v49 }
0x1555   :  { %6133 = vmatpush3.msra.mxu1 %v5052_v49 }
0x1556   :  { %6134 = vmatprep.subr.mxu1 %v5051_v50 }
0x1557   :  { %6135 = vmatpush3.msra.mxu1 %v5051_v50 }
0x1558   :  { %6136 = vmatprep.subr.mxu1 %v5050_v51 }
0x1559   :  { %6137 = vmatpush3.msra.mxu1 %v5050_v51 }
0x155a   :  { %6138 = vmatprep.subr.mxu1 %v5049_v52 }
0x155b   :  { %6139 = vmatpush3.msra.mxu1 %v5049_v52 }
0x155c   :  { %6140 = vmatprep.subr.mxu1 %v5048_v53 }
0x155d   :  { %6141 = vmatpush3.msra.mxu1 %v5048_v53 }
0x155e   :  { %6142 = vmatprep.subr.mxu1 %v5047_v54 }
0x155f   :  { %6143 = vmatpush3.msra.mxu1 %v5047_v54 }
0x1560   :  { %6144 = vmatprep.subr.mxu1 %v5046_v55 }
0x1561   :  { %6145 = vmatpush3.msra.mxu1 %v5046_v55 }
0x1562   :  { %6146 = vmatprep.subr.mxu1 %v5045_v56 }
0x1563   :  { %6147 = vmatpush3.msra.mxu1 %v5045_v56 }
0x1564   :  { %6148 = vmatprep.subr.mxu1 %v5044_v57 }
0x1565   :  { %6149 = vmatpush3.msra.mxu1 %v5044_v57 }
0x1566   :  { %6150 = vmatprep.subr.mxu1 %v5043_v58 }
0x1567   :  { %6151 = vmatpush3.msra.mxu1 %v5043_v58 }
0x1568   :  { %6152 = vmatprep.subr.mxu1 %v5042_v59 }
0x1569   :  { %6153 = vmatpush3.msra.mxu1 %v5042_v59 }
0x156a   :  { %6155 = vmatmul.mubr.f32.vlgmr.msra.gmra.mxu1 %v7222_v33 }
0x156b   :  { %6206 = vmatprep.mubr.msk.f32.mxu1 %vm149_vm0, %v5062_v30 }
0x1609   :  { %v6108_v61 = vpop.f32.mrf.mxu1  ;;  %v6118_v62 = vpop.f32.mrf.mxu0 }
0x160a   :  { %v7264_v63 = vadd.f32 %v6118_v62, %v6108_v61 }
0x160b   :  { %v4247_v0 = vpop.f32.mrf.mxu1  ;;  %v4344_v1 = vpop.f32.mrf.mxu0 }
0x160c   :  { %v7266_v2 = vadd.f32 %v4344_v1, %v4247_v0 }
0x160d   :  { %v6121_v4 = vpop.f32.mrf.mxu0 }
0x160e   :  { %v6111_v3 = vpop.f32.mrf.mxu1 }
0x160f   :  { %v7268_v5 = vadd.f32 %v6121_v4, %v6111_v3  ;;  %v4354_v31 = vpop.f32.mrf.mxu0 }
0x1610   :  { %v7270_v6 = vpop.f32.mrf.mxu1 }
0x1611   :  { %v4355_v37 = vadd.f32 %v4354_v31, %v7270_v6 }
0x162a   :  { %v6156_v7 = vpop.f32.mrf.mxu1 }
0x162b   :  { %6157 = vmatprep.subr.mxu0 %v6156_v7 }
0x162c   :  { %v4451_v8 = vpop.f32.mrf.mxu1  ;;  %6158 = vmatpush3.msra.mxu0 %v6156_v7 }
0x162d   :  { %6159 = vmatprep.subr.mxu0 %v4451_v8 }
0x162e   :  { %6160 = vmatpush3.msra.mxu0 %v4451_v8 }
0x162f   :  { %6162 = vmatmul.mubr.msk.f32.vlgmr.msra.gmra.mxu0 %vm149_vm0, %v5039_v9  ;;  %6167 = vmatprep.subr.mxu0 %v5081_v19 }
0x1630   :  { %6168 = vmatpush3.msra.mxu0 %v5081_v19  ;;  %6164 = vmatprep.mubr.msk.f32.mxu0 %vm149_vm0, %v5040_v11 }
0x1631   :  { %6169 = vmatprep.subr.mxu0 %v5080_v12 }
0x1632   :  { %6170 = vmatpush3.msra.mxu0 %v5080_v12 }
0x1633   :  { %6165 = vmatmul.mubr.msk.f32.gmra.mxu0 %vm149_vm0, %v5041_v13  ;;  %6171 = vmatprep.subr.mxu0 %v5079_v14 }
0x1634   :  { %6172 = vmatpush3.msra.mxu0 %v5079_v14  ;;  %6199 = vmatprep.mubr.f32.mxu0 %v7220_v32 }
0x1635   :  { %6173 = vmatprep.subr.mxu0 %v5078_v15 }
0x1636   :  { %6174 = vmatpush3.msra.mxu0 %v5078_v15 }
0x1637   :  { %6175 = vmatprep.subr.mxu0 %v5077_v16 }
0x1638   :  { %6176 = vmatpush3.msra.mxu0 %v5077_v16 }
0x1639   :  { %6177 = vmatprep.subr.mxu0 %v5076_v17 }
0x163a   :  { %6178 = vmatpush3.msra.mxu0 %v5076_v17 }
0x163b   :  { %6179 = vmatprep.subr.mxu0 %v5075_v18 }
0x163c   :  { %6180 = vmatpush3.msra.mxu0 %v5075_v18 }
0x163d   :  { %6181 = vmatprep.subr.mxu0 %v5074_v10 }
0x163e   :  { %6182 = vmatpush3.msra.mxu0 %v5074_v10 }
0x163f   :  { %6183 = vmatprep.subr.mxu0 %v5073_v21 }
0x1640   :  { %6184 = vmatpush3.msra.mxu0 %v5073_v21 }
0x1641   :  { %6185 = vmatprep.subr.mxu0 %v5072_v22 }
0x1642   :  { %6186 = vmatpush3.msra.mxu0 %v5072_v22 }
0x1643   :  { %6187 = vmatprep.subr.mxu0 %v5071_v23 }
0x1644   :  { %6188 = vmatpush3.msra.mxu0 %v5071_v23 }
0x1645   :  { %6189 = vmatprep.subr.mxu0 %v5070_v27 }
0x1646   :  { %6190 = vmatpush3.msra.mxu0 %v5070_v27 }
0x1647   :  { %6191 = vmatprep.subr.mxu0 %v5069_v24 }
0x1648   :  { %6192 = vmatpush3.msra.mxu0 %v5069_v24 }
0x1649   :  { %6193 = vmatprep.subr.mxu0 %v5068_v25 }
0x164a   :  { %6194 = vmatpush3.msra.mxu0 %v5068_v25 }
0x164b   :  { %6195 = vmatprep.subr.mxu0 %v5067_v28 }
0x164c   :  { %6196 = vmatpush3.msra.mxu0 %v5067_v28 }
0x164d   :  { %6197 = vmatprep.subr.mxu0 %v5066_v29 }
0x164e   :  { %6198 = vmatpush3.msra.mxu0 %v5066_v29 }
0x164f   :  { %6200 = vmatmul.mubr.f32.vlgmr.msra.gmra.mxu0 %v7222_v33 }
0x16ef   :  { %v6163_v32 = vpop.f32.mrf.mxu0 }
0x16f0   :  { %v4558_v20 = vadd.f32 %v6163_v32, %v7264_v63 }
0x16f1   :  { %v4538_v34 = vpop.f32.mrf.mxu0 }
0x16f2   :  { %v4557_v35 = vadd.f32 %v4538_v34, %v7266_v2 }
0x16f3   :  { %v6166_v36 = vpop.f32.mrf.mxu0 }
0x16f4   :  { %v4560_v38 = vadd.f32 %v6166_v36, %v7268_v5 }
0x16f5   :  { %v4548_v39 = vpop.f32.mrf.mxu0 }
0x16f6   :  { %v4559_v33 = vadd.f32 %v4548_v39, %v4355_v37 }
0x170f   :  { %v6201_v40 = vpop.f32.mrf.mxu0 }
0x1710   :  { %6202 = vmatprep.subr.mxu1 %v6201_v40 }
0x1711   :  { %v4649_v26 = vpop.f32.mrf.mxu0  ;;  %6203 = vmatpush3.msra.mxu1 %v6201_v40 }
0x1712   :  { %6204 = vmatprep.subr.mxu1 %v4649_v26 }
0x1713   :  { %6205 = vmatpush3.msra.mxu1 %v4649_v26 }
0x1714   :  { %6207 = vmatmul.mubr.msk.f32.vlgmr.msra.gmra.mxu1 %vm149_vm0, %v5063_v41 }
0x1715   :  { %6209 = vmatprep.mubr.msk.f32.mxu1 %vm149_vm0, %v5064_v42 }
0x1718   :  { %6210 = vmatmul.mubr.msk.f32.gmra.mxu1 %vm149_vm0, %v5065_v43 }
0x1719   :  { %6285 = shalt.err (!%p6282_p4)
}
0x171a   :  { %4799 = dma.vmem_to_hbm [thread:$0]  %s4797_s28, 16, %s6553_s4, [#allocation5]  }
0x171b   :  { %s6376_s7 = smov [#allocation6]  }
0x171c   :  { %s4806_s10 = sshll.u32 %s6376_s7, 4  ;;  %s4807_s10 = int_to_ptr.vmem [resolvable:$true] %s4806_s10 }
0x171d   :  { %s6294_s11 = scalar_lea.vmem %s4807_s10, 128  ;;  %p6299_p6 = scmp.lt.s32.totalorder %s4807_s10, %s4807_s10 }
0x171e   :  { %p6295_p5 = scmp.ne.s32.totalorder %s4807_s10, %s6294_s11  ;;  %p6300_p7 = scmp.lt.s32.totalorder %s6294_s11, %s6294_s11 }
0x1720   :  { %p6301_p8 = por %p6300_p7, %p6299_p6 }
0x1722   :  { %p6302_p9 = pnand %p6301_p8, %p6295_p5 }
0x1724   :  { %6305 = shalt.err (!%p6302_p9)
}
0x1725   :  { %4809 = dma.vmem_to_hbm [thread:$0]  %s4807_s10, 128, %s6558_s30, [#allocation5]   ;;  %v5086_v45 = vld [vmem:[%s6543_s20] ss:$0 sm:$0xff] }
0x1726   :  { %s6377_s30 = smov [#allocation2]  }
0x1727   :  { %s4783_s20 = sshll.u32 %s6377_s30, 4  ;;  %s4784_s20 = int_to_ptr.vmem [resolvable:$true] %s4783_s20 }
0x1728   :  { %s6314_s4 = scalar_lea.vmem %s4784_s20, 512  ;;  %p6319_p11 = scmp.lt.s32.totalorder %s4784_s20, %s4784_s20 }
0x1729   :  { %p6315_p10 = scmp.ne.s32.totalorder %s4784_s20, %s6314_s4  ;;  %p6320_p12 = scmp.lt.s32.totalorder %s6314_s4, %s6314_s4 }
0x172b   :  { %p6321_p13 = por %p6320_p12, %p6319_p11 }
0x172d   :  { %p6322_p0 = pnand %p6321_p13, %p6315_p10 }
0x17d4   :  { %v6208_v44 = vpop.f32.mrf.mxu1 }
0x17d5   :  { %v4756_v46 = vadd.f32 %v6208_v44, %v4558_v20 }
0x17d6   :  { %v4736_v47 = vpop.f32.mrf.mxu1 }
0x17d7   :  { %v4767_v48 = vadd.f32 %v5086_v45, %v4756_v46  ;;  %v4755_v49 = vadd.f32 %v4736_v47, %v4557_v35 }
0x17d8   :  { %v6211_v50 = vpop.f32.mrf.mxu1 }
0x17d9   :  { %6266 = vtanh.f32 %v4767_v48  ;;  %v4766_v51 = vadd.f32 %v5086_v45, %v4755_v49  ;;  %v4758_v52 = vadd.f32 %v6211_v50, %v4560_v38 }
0x17da   :  { %v4746_v53 = vpop.f32.mrf.mxu1 }
0x17db   :  { %6268 = vtanh.f32 %v4766_v51  ;;  %v4769_v54 = vadd.f32 %v5086_v45, %v4758_v52  ;;  %v4757_v55 = vadd.f32 %v4746_v53, %v4559_v33 }
0x17dd   :  { %6270 = vtanh.f32 %v4769_v54  ;;  %v4768_v56 = vadd.f32 %v5086_v45, %v4757_v55 }
0x17df   :  { %6272 = vtanh.f32 %v4768_v56 }
0x17e6   :  { %v6267_v57 = vpop.eup %6266 }
0x17e7   :  { %4775 = vst.msk [vmem:[#allocation2 + $0x8] sm:$0xff] %vm149_vm0, %v6267_v57 }
0x17e8   :  { %v6269_v58 = vpop.eup %6268 }
0x17e9   :  { %4774 = vst.msk [vmem:[#allocation2] sm:$0xff] %vm149_vm0, %v6269_v58 }
0x17ea   :  { %v6271_v59 = vpop.eup %6270 }
0x17eb   :  { %4777 = vst.msk [vmem:[#allocation2 + $0x18] sm:$0xff] %vm149_vm0, %v6271_v59 }
0x17ec   :  { %v6273_v60 = vpop.eup %6272 }
0x17ed   :  { %4776 = vst.msk [vmem:[#allocation2 + $0x10] sm:$0xff] %vm149_vm0, %v6273_v60 }
0x17ee   :  { %6325 = shalt.err (!%p6322_p0)
}
0x17ef   :  { %s6378_s0 = smov 128   ;;  %s6379_s5 = smov 8  }
0x17f0   :  { %4789 = dma.vmem_to_hbm [thread:$0]  %s4784_s20, 512, %s6548_s27, [#allocation3], %s6378_s0, %s6378_s0, %s6379_s5  }
0x17f1   :  { %6334 = dma.done.wait [#allocation3], 512  }
0x17f2   :  { %6335 = vsyncadd [#allocation3], 4294966784 }
0x17f3   :  { %6336 = dma.done.wait [#allocation5], 144  }
0x17f4   :  { %6337 = vsyncadd [#allocation5], 4294967152 }
0x17f5   :  { %4819 = vsyncpa [#allocation3], 1 }
0x17f6   :  { %4820 = vsyncpa [#allocation5], 1 }

</bundles_post_ra>
